<compile_context>
chip_gen: v7x
topology: tpu7x:2x2x1
jax: 0.10.0
libtpu: 0.0.40
codegen_flags: <defaults>
</compile_context>

<pallas_src>
import math
from functools import partial

import jax
import jax.numpy as jnp
from jax.experimental import pallas as pl
from jax.experimental.pallas import tpu as pltpu


def cross_attention_kernel(tgt_ref, qpos_ref, mem_ref, kpos_ref,
                           wq_ref, wk_ref, wv_ref,
                           bq_ref, bk_ref, bv_ref,
                           wo_ref, bo_ref,
                           gamma_ref, beta_ref,
                           out_ref, *, nhead):
    Bb, Lq, E = tgt_ref.shape
    Lk = mem_ref.shape[1]
    Dh = E // nhead

    tgt = tgt_ref[...]                                    # (Bb, Lq, E) bf16
    q_in = (tgt + qpos_ref[...]).reshape(Bb * Lq, E)      # with_pos_embed(tgt, query_pos)
    mem = mem_ref[...]                                    # (Bb, Lk, E) bf16
    k_in = (mem + kpos_ref[...]).reshape(Bb * Lk, E)      # with_pos_embed(memory, pos)
    v_in = mem.reshape(Bb * Lk, E)                        # value = memory (no pos embed)

    # In-projections on the bf16 MXU path with f32 accumulation. Weights are
    # pre-transposed to (E_in, E_out) in the wrapper; 1/sqrt(Dh) is folded
    # into wq / bq, so no per-step scaling or transpose happens in-kernel.
    q = jnp.dot(q_in, wq_ref[...], preferred_element_type=jnp.float32) + bq_ref[...]
    k = jnp.dot(k_in, wk_ref[...], preferred_element_type=jnp.float32) + bk_ref[...]
    v = jnp.dot(v_in, wv_ref[...], preferred_element_type=jnp.float32) + bv_ref[...]
    qb = q.reshape(Bb, Lq, E).astype(jnp.bfloat16)
    kb = k.reshape(Bb, Lk, E).astype(jnp.bfloat16)
    vb = v.reshape(Bb, Lk, E).astype(jnp.bfloat16)

    # Per-head attention with the output projection folded into the loop: head
    # results accumulate straight into a lane-dense (Bb*Lq, E) f32 tile, so
    # there is no lane-sliced scratch write. The accumulator data-dependence
    # keeps each head's temporaries dead after its iteration.
    # TODO(synk): attn_mask / key_padding_mask are not implemented (None path only).
    acc = jnp.zeros((Bb * Lq, E), jnp.float32)
    for h in range(nhead):                                # small static head count
        sl = slice(h * Dh, (h + 1) * Dh)
        s = jnp.einsum('bqd,bkd->bqk', qb[:, :, sl], kb[:, :, sl],
                       preferred_element_type=jnp.float32)        # (Bb, Lq, Lk)
        s = s - jnp.max(s, axis=-1, keepdims=True)
        p = jnp.exp(s)
        denom = jnp.sum(p, axis=-1, keepdims=True)
        # Deferred softmax normalization: scale the small (Bb, Lq, Dh) P@V
        # result rather than the (Bb, Lq, Lk) probabilities.
        o_h = jnp.einsum('bqk,bkd->bqd', p.astype(jnp.bfloat16), vb[:, :, sl],
                         preferred_element_type=jnp.float32)
        o_h = o_h * pl.reciprocal(denom, approx=False)
        # Fold the output projection: (Bb*Lq, Dh) @ (Dh, E), f32 accumulation.
        acc = acc + jnp.dot(o_h.reshape(Bb * Lq, Dh).astype(jnp.bfloat16),
                            wo_ref[h],                            # (Dh, E) head slab
                            preferred_element_type=jnp.float32)

    attn_out = acc + bo_ref[...]

    # Residual (dropout p=0 -> identity) + LayerNorm(eps=1e-5), all in f32.
    x = tgt.astype(jnp.float32).reshape(Bb * Lq, E) + attn_out
    mean = jnp.mean(x, axis=-1, keepdims=True)
    var = jnp.mean((x - mean) ** 2, axis=-1, keepdims=True)
    xn = (x - mean) * jax.lax.rsqrt(var + 1e-5)
    y = xn * gamma_ref[...] + beta_ref[...]
    out_ref[...] = y.reshape(Bb, Lq, E).astype(out_ref.dtype)


def _vmem_limit_bytes():
    """Per-generation VMEM limit: ~96 MiB on 128 MiB parts (v5e/v6e), ~48 MiB on v7x."""
    cap = 64 * 1024 * 1024
    try:
        info = pltpu.get_tpu_info()
        cap = int(getattr(info, "vmem_capacity_bytes", cap) or cap)
    except Exception:
        pass
    return int(min(cap * 3 // 4, cap - 8 * 1024 * 1024))


def _pick_batch_block(N, Lq, Lk, E, vmem_budget_bytes):
    """Largest batch block that (a) targets ~256-row MXU M tiles and (b) fits VMEM."""
    bf, f32 = 2, 4
    per_b = (2 * (2 * Lq * E * bf)              # tgt + query_pos tiles, double-buffered
             + 2 * (2 * Lk * E * bf)            # memory + pos tiles, double-buffered
             + 2 * Lq * E * f32                 # output tile, double-buffered
             + (Lq + 2 * Lk) * E * (f32 + bf)   # q/k/v f32 accum + bf16 copies
             + 2 * Lq * Lk * f32                # per-head scores + probs
             + 2 * Lq * E * f32)                # accumulator + misc temporaries
    fixed = 2 * 4 * E * E * bf + 16 * E * f32   # weights (worst-case 2-buffered) + vectors
    avail = max(int(vmem_budget_bytes) - fixed, per_b)
    bb_vmem = max(1, avail // per_b)
    bb_mxu = max(1, 256 // max(1, Lq))          # ~256 rows of Bb*Lq for the 256-wide MXU
    return int(max(1, min(N, bb_vmem, bb_mxu)))


def cross_attention_layer(tgt, memory, params, *, nhead, pos=None, query_pos=None,
                          batch_block=None):
    """tgt: (Lq, N, E), memory: (Lk, N, E) — PyTorch seq-first convention."""
    Lq, N, E = tgt.shape
    Lk = memory.shape[0]
    assert E % nhead == 0, "d_model must be divisible by nhead"
    Dh = E // nhead
    scale = 1.0 / math.sqrt(Dh)
    out_dtype = tgt.dtype
    bf16 = jnp.bfloat16

    if query_pos is None:
        query_pos = jnp.zeros_like(tgt)
    if pos is None:
        pos = jnp.zeros_like(memory)

    # One-time parameter prep (XLA side, outside the grid loop): transpose to
    # (E_in, E_out), fold 1/sqrt(Dh) into the q projection, cast to bf16, and
    # reshape wo to (nhead, Dh, E) so the kernel indexes a head's slab on the
    # leading axis (no lane/sublane slicing of the weight tile in-kernel).
    wq_t = (params["wq"] * scale).T.astype(bf16)
    wk_t = params["wk"].T.astype(bf16)
    wv_t = params["wv"].T.astype(bf16)
    wo_h = params["wo"].T.reshape(nhead, Dh, E).astype(bf16)
    bq = (params["bq"] * scale).astype(jnp.float32)
    bk = params["bk"].astype(jnp.float32)
    bv = params["bv"].astype(jnp.float32)
    bo = params["bo"].astype(jnp.float32)
    gamma = params["gamma"].astype(jnp.float32)
    beta = params["beta"].astype(jnp.float32)

    # Batch-first bf16 activations so each grid step sees lane-dense tiles and
    # activation DMA bytes are halved.
    # TODO(synk): the (L,N,E)->(N,L,E) transposes are still an extra HBM pass;
    # removing them needs gridding the middle axis + an in-kernel relayout.
    tgt_b = jnp.transpose(tgt, (1, 0, 2)).astype(bf16)
    qpos_b = jnp.transpose(query_pos, (1, 0, 2)).astype(bf16)
    mem_b = jnp.transpose(memory, (1, 0, 2)).astype(bf16)
    kpos_b = jnp.transpose(pos, (1, 0, 2)).astype(bf16)

    vmem_limit = _vmem_limit_bytes()
    if batch_block is None:
        Bb = _pick_batch_block(N, Lq, Lk, E, int(vmem_limit * 0.8))
    else:
        Bb = max(1, min(int(batch_block), N))

    n_blocks = -(-N // Bb)
    if n_blocks > 1 and n_blocks % 2 == 1:
        # Even block count so the "parallel" batch axis splits evenly across
        # v7x's two TensorCores (harmless elsewhere: one extra padded block).
        n_blocks += 1
    N_pad = n_blocks * Bb
    if N_pad != N:
        pad = ((0, N_pad - N), (0, 0), (0, 0))
        tgt_b = jnp.pad(tgt_b, pad)
        qpos_b = jnp.pad(qpos_b, pad)
        mem_b = jnp.pad(mem_b, pad)
        kpos_b = jnp.pad(kpos_b, pad)

    def run(single_buffer_consts):
        def const_spec(shape):
            zero = lambda b: (0,) * len(shape)
            if single_buffer_consts:
                # Constant operands: DMA'd once, single-buffered (no wasted 2nd buffer).
                return pl.BlockSpec(shape, zero, pipeline_mode=pl.Buffered(1))
            return pl.BlockSpec(shape, zero)

        seq_q = pl.BlockSpec((Bb, Lq, E), lambda b: (b, 0, 0))
        seq_k = pl.BlockSpec((Bb, Lk, E), lambda b: (b, 0, 0))
        mat = const_spec((E, E))
        vec = const_spec((1, E))
        wo_spec = const_spec((nhead, Dh, E))

        out = pl.pallas_call(
            partial(cross_attention_kernel, nhead=nhead),
            grid=(n_blocks,),
            in_specs=[seq_q, seq_q, seq_k, seq_k,
                      mat, mat, mat,
                      vec, vec, vec,
                      wo_spec, vec,
                      vec, vec],
            out_specs=pl.BlockSpec((Bb, Lq, E), lambda b: (b, 0, 0)),
            out_shape=jax.ShapeDtypeStruct((N_pad, Lq, E), out_dtype),
            compiler_params=pltpu.CompilerParams(
                dimension_semantics=("parallel",),
                vmem_limit_bytes=int(vmem_limit)),
        )(tgt_b, qpos_b, mem_b, kpos_b,
          wq_t, wk_t, wv_t, bq, bk, bv, wo_h, bo, gamma, beta)
        return jax.block_until_ready(out)

    try:
        out_b = run(True)      # constants single-buffered via pl.Buffered(1)
    except Exception:
        out_b = run(False)     # fallback: default double buffering

    out_b = out_b[:N]
    return jnp.transpose(out_b, (1, 0, 2))   # back to (Lq, N, E)


def init_params(key, d_model):
    """Deterministic synthetic init mirroring the module's _reset_parameters:
    xavier_uniform_ on weights (dim>1), zero biases, LayerNorm gamma=1 beta=0."""
    k1, k2 = jax.random.split(key)
    bound_in = math.sqrt(6.0 / (d_model + 3 * d_model))   # in_proj_weight (3E, E)
    in_proj = jax.random.uniform(k1, (3 * d_model, d_model), jnp.float32,
                                 -bound_in, bound_in)
    bound_out = math.sqrt(6.0 / (d_model + d_model))      # out_proj.weight (E, E)
    wo = jax.random.uniform(k2, (d_model, d_model), jnp.float32,
                            -bound_out, bound_out)
    wq, wk, wv = jnp.split(in_proj, 3, axis=0)
    zeros = jnp.zeros((1, d_model), jnp.float32)
    return dict(wq=wq, wk=wk, wv=wv,
                bq=zeros, bk=zeros, bv=zeros,
                wo=wo, bo=zeros,
                gamma=jnp.ones((1, d_model), jnp.float32),
                beta=jnp.zeros((1, d_model), jnp.float32))


def reference(tgt, memory, params, nhead, pos, query_pos):
    """Pure-JAX f32 reference of forward_post (normalize_before=False, dropout=0)."""
    Lq, N, E = tgt.shape
    Lk = memory.shape[0]
    Dh = E // nhead
    q_in = tgt + query_pos
    k_in = memory + pos

    def proj(x, w, b):
        return jnp.einsum('lne,fe->lnf', x, w) + b[0]

    q = proj(q_in, params['wq'], params['bq'])
    k = proj(k_in, params['wk'], params['bk'])
    v = proj(memory, params['wv'], params['bv'])

    def split_heads(x, L):
        return x.reshape(L, N, nhead, Dh).transpose(1, 2, 0, 3)

    qh, kh, vh = split_heads(q, Lq), split_heads(k, Lk), split_heads(v, Lk)
    s = jnp.einsum('nhqd,nhkd->nhqk', qh, kh) / math.sqrt(Dh)
    p = jax.nn.softmax(s, axis=-1)
    o = jnp.einsum('nhqk,nhkd->nhqd', p, vh)
    o = o.transpose(2, 0, 1, 3).reshape(Lq, N, E)
    o = jnp.einsum('lne,fe->lnf', o, params['wo']) + params['bo'][0]
    x = tgt + o
    mean = x.mean(-1, keepdims=True)
    var = ((x - mean) ** 2).mean(-1, keepdims=True)
    xn = (x - mean) / jnp.sqrt(var + 1e-5)
    return xn * params['gamma'][0] + params['beta'][0]


if __name__ == "__main__":
    d_model, nhead = 32, 4
    Lq, Lk, N = 8, 16, 2

    key = jax.random.PRNGKey(0)
    kp, kt, km, kqp, kpo = jax.random.split(key, 5)
    params = init_params(kp, d_model)
    tgt = jax.random.normal(kt, (Lq, N, d_model), jnp.float32)
    memory = jax.random.normal(km, (Lk, N, d_model), jnp.float32)
    query_pos = jax.random.normal(kqp, (Lq, N, d_model), jnp.float32)
    pos = jax.random.normal(kpo, (Lk, N, d_model), jnp.float32)

    out = cross_attention_layer(tgt, memory, params, nhead=nhead,
                                pos=pos, query_pos=query_pos)
    out = jax.block_until_ready(out)

    ref = reference(tgt, memory, params, nhead, pos, query_pos)
    max_err = float(jnp.max(jnp.abs(out - ref)))
    # bf16 MXU operands -> tolerance loosened vs the f32 path (review note).
    assert jnp.allclose(out, ref, atol=5e-2, rtol=5e-2), f"max_err={max_err}"
    print("KERNEL_OK")
</pallas_src>

<mosaic_0001>
module attributes {stable_mosaic.version = 11 : i64} {
  func.func @cross_attention_kernel(%arg0: i32, %arg1: memref<2x8x32xbf16, #tpu.memory_space<vmem>>, %arg2: memref<2x8x32xbf16, #tpu.memory_space<vmem>>, %arg3: memref<2x16x32xbf16, #tpu.memory_space<vmem>>, %arg4: memref<2x16x32xbf16, #tpu.memory_space<vmem>>, %arg5: memref<32x32xbf16, #tpu.memory_space<vmem>>, %arg6: memref<32x32xbf16, #tpu.memory_space<vmem>>, %arg7: memref<32x32xbf16, #tpu.memory_space<vmem>>, %arg8: memref<1x32xf32, #tpu.memory_space<vmem>>, %arg9: memref<1x32xf32, #tpu.memory_space<vmem>>, %arg10: memref<1x32xf32, #tpu.memory_space<vmem>>, %arg11: memref<4x8x32xbf16, #tpu.memory_space<vmem>>, %arg12: memref<1x32xf32, #tpu.memory_space<vmem>>, %arg13: memref<1x32xf32, #tpu.memory_space<vmem>>, %arg14: memref<1x32xf32, #tpu.memory_space<vmem>>, %arg15: memref<2x8x32xf32, #tpu.memory_space<vmem>>) attributes {dimension_semantics = [#tpu.dimension_semantics<parallel>], iteration_bounds = array<i64: 1>, scalar_prefetch = 0 : i64, scratch_operands = 0 : i64, tpu.core_type = #tpu.core_type<tc>, window_params = [{transform_indices = @transform_0, window_bounds = array<i64: 2, 8, 32>}, {transform_indices = @transform_1, window_bounds = array<i64: 2, 8, 32>}, {transform_indices = @transform_2, window_bounds = array<i64: 2, 16, 32>}, {transform_indices = @transform_3, window_bounds = array<i64: 2, 16, 32>}, {pipeline_mode = #tpu.pipeline_mode<synchronous>, transform_indices = @transform_4, window_bounds = array<i64: 32, 32>}, {pipeline_mode = #tpu.pipeline_mode<synchronous>, transform_indices = @transform_5, window_bounds = array<i64: 32, 32>}, {pipeline_mode = #tpu.pipeline_mode<synchronous>, transform_indices = @transform_6, window_bounds = array<i64: 32, 32>}, {pipeline_mode = #tpu.pipeline_mode<synchronous>, transform_indices = @transform_7, window_bounds = array<i64: 1, 32>}, {pipeline_mode = #tpu.pipeline_mode<synchronous>, transform_indices = @transform_8, window_bounds = array<i64: 1, 32>}, {pipeline_mode = #tpu.pipeline_mode<synchronous>, transform_indices = @transform_9, window_bounds = array<i64: 1, 32>}, {pipeline_mode = #tpu.pipeline_mode<synchronous>, transform_indices = @transform_10, window_bounds = array<i64: 4, 8, 32>}, {pipeline_mode = #tpu.pipeline_mode<synchronous>, transform_indices = @transform_11, window_bounds = array<i64: 1, 32>}, {pipeline_mode = #tpu.pipeline_mode<synchronous>, transform_indices = @transform_12, window_bounds = array<i64: 1, 32>}, {pipeline_mode = #tpu.pipeline_mode<synchronous>, transform_indices = @transform_13, window_bounds = array<i64: 1, 32>}, {transform_indices = @transform_14, window_bounds = array<i64: 2, 8, 32>}]} {
    %c0 = arith.constant 0 : index
    %c0_0 = arith.constant 0 : index
    %c0_1 = arith.constant 0 : index
    %0 = vector.load %arg1[%c0, %c0_0, %c0_1] : memref<2x8x32xbf16, #tpu.memory_space<vmem>>, vector<2x8x32xbf16>
    %c0_2 = arith.constant 0 : index
    %c0_3 = arith.constant 0 : index
    %c0_4 = arith.constant 0 : index
    %1 = vector.load %arg2[%c0_2, %c0_3, %c0_4] : memref<2x8x32xbf16, #tpu.memory_space<vmem>>, vector<2x8x32xbf16>
    %2 = arith.addf %0, %1 : vector<2x8x32xbf16>
    %3 = vector.shape_cast %2 : vector<2x8x32xbf16> to vector<16x32xbf16>
    %c0_5 = arith.constant 0 : index
    %c0_6 = arith.constant 0 : index
    %c0_7 = arith.constant 0 : index
    %4 = vector.load %arg3[%c0_5, %c0_6, %c0_7] : memref<2x16x32xbf16, #tpu.memory_space<vmem>>, vector<2x16x32xbf16>
    %c0_8 = arith.constant 0 : index
    %c0_9 = arith.constant 0 : index
    %c0_10 = arith.constant 0 : index
    %5 = vector.load %arg4[%c0_8, %c0_9, %c0_10] : memref<2x16x32xbf16, #tpu.memory_space<vmem>>, vector<2x16x32xbf16>
    %6 = arith.addf %4, %5 : vector<2x16x32xbf16>
    %7 = vector.shape_cast %6 : vector<2x16x32xbf16> to vector<32x32xbf16>
    %8 = vector.shape_cast %4 : vector<2x16x32xbf16> to vector<32x32xbf16>
    %c0_11 = arith.constant 0 : index
    %c0_12 = arith.constant 0 : index
    %9 = vector.load %arg5[%c0_11, %c0_12] : memref<32x32xbf16, #tpu.memory_space<vmem>>, vector<32x32xbf16>
    %cst = arith.constant dense<0.000000e+00> : vector<16x32xf32>
    %10 = tpu.matmul %3, %9, %cst {dimension_numbers = #tpu.dot_dimension_numbers<[1], [0], [0], [1], [0, 0, 1, 1], [], []>} : vector<16x32xbf16>, vector<32x32xbf16>, vector<16x32xf32> -> vector<16x32xf32>
    %c0_13 = arith.constant 0 : index
    %c0_14 = arith.constant 0 : index
    %11 = vector.load %arg8[%c0_13, %c0_14] : memref<1x32xf32, #tpu.memory_space<vmem>>, vector<1x32xf32>
    %12 = vector.broadcast %11 : vector<1x32xf32> to vector<16x32xf32>
    %13 = arith.addf %10, %12 : vector<16x32xf32>
    %c0_15 = arith.constant 0 : index
    %c0_16 = arith.constant 0 : index
    %14 = vector.load %arg6[%c0_15, %c0_16] : memref<32x32xbf16, #tpu.memory_space<vmem>>, vector<32x32xbf16>
    %cst_17 = arith.constant dense<0.000000e+00> : vector<32x32xf32>
    %15 = tpu.matmul %7, %14, %cst_17 {dimension_numbers = #tpu.dot_dimension_numbers<[1], [0], [0], [1], [0, 0, 1, 1], [], []>} : vector<32x32xbf16>, vector<32x32xbf16>, vector<32x32xf32> -> vector<32x32xf32>
    %c0_18 = arith.constant 0 : index
    %c0_19 = arith.constant 0 : index
    %16 = vector.load %arg9[%c0_18, %c0_19] : memref<1x32xf32, #tpu.memory_space<vmem>>, vector<1x32xf32>
    %17 = vector.broadcast %16 : vector<1x32xf32> to vector<32x32xf32>
    %18 = arith.addf %15, %17 : vector<32x32xf32>
    %c0_20 = arith.constant 0 : index
    %c0_21 = arith.constant 0 : index
    %19 = vector.load %arg7[%c0_20, %c0_21] : memref<32x32xbf16, #tpu.memory_space<vmem>>, vector<32x32xbf16>
    %cst_22 = arith.constant dense<0.000000e+00> : vector<32x32xf32>
    %20 = tpu.matmul %8, %19, %cst_22 {dimension_numbers = #tpu.dot_dimension_numbers<[1], [0], [0], [1], [0, 0, 1, 1], [], []>} : vector<32x32xbf16>, vector<32x32xbf16>, vector<32x32xf32> -> vector<32x32xf32>
    %c0_23 = arith.constant 0 : index
    %c0_24 = arith.constant 0 : index
    %21 = vector.load %arg10[%c0_23, %c0_24] : memref<1x32xf32, #tpu.memory_space<vmem>>, vector<1x32xf32>
    %22 = vector.broadcast %21 : vector<1x32xf32> to vector<32x32xf32>
    %23 = arith.addf %20, %22 : vector<32x32xf32>
    %24 = vector.shape_cast %13 : vector<16x32xf32> to vector<2x8x32xf32>
    %25 = arith.truncf %24 : vector<2x8x32xf32> to vector<2x8x32xbf16>
    %26 = vector.shape_cast %18 : vector<32x32xf32> to vector<2x16x32xf32>
    %27 = arith.truncf %26 : vector<2x16x32xf32> to vector<2x16x32xbf16>
    %28 = vector.shape_cast %23 : vector<32x32xf32> to vector<2x16x32xf32>
    %29 = arith.truncf %28 : vector<2x16x32xf32> to vector<2x16x32xbf16>
    %cst_25 = arith.constant 0.000000e+00 : f32
    %30 = vector.broadcast %cst_25 : f32 to vector<16x32xf32>
    %31 = vector.extract_strided_slice %25 {offsets = [0, 0, 0], sizes = [2, 8, 8], strides = [1, 1, 1]} : vector<2x8x32xbf16> to vector<2x8x8xbf16>
    %32 = vector.extract_strided_slice %27 {offsets = [0, 0, 0], sizes = [2, 16, 8], strides = [1, 1, 1]} : vector<2x16x32xbf16> to vector<2x16x8xbf16>
    "tpu.trace_start"() <{level = 10 : i32, message = "bqd,bkd->bqk"}> : () -> ()
    %cst_26 = arith.constant dense<0.000000e+00> : vector<2x8x16xf32>
    %33 = tpu.matmul %31, %32, %cst_26 {dimension_numbers = #tpu.dot_dimension_numbers<[2], [2], [1], [1], [0, 0, 0, 1, 1, 1], [0], [0]>} : vector<2x8x8xbf16>, vector<2x16x8xbf16>, vector<2x8x16xf32> -> vector<2x8x16xf32>
    "tpu.trace_stop"() : () -> ()
    %cst_27 = arith.constant dense<0xFF800000> : vector<2x8xf32>
    %34 = vector.multi_reduction <maximumf>, %33, %cst_27 [2] : vector<2x8x16xf32> to vector<2x8xf32>
    %35 = vector.shape_cast %34 : vector<2x8xf32> to vector<2x8x1xf32>
    %36 = vector.broadcast %35 : vector<2x8x1xf32> to vector<2x8x16xf32>
    %37 = arith.subf %33, %36 : vector<2x8x16xf32>
    %38 = math.exp %37 : vector<2x8x16xf32>
    %cst_28 = arith.constant dense<0.000000e+00> : vector<2x8xf32>
    %39 = vector.multi_reduction <add>, %38, %cst_28 [2] : vector<2x8x16xf32> to vector<2x8xf32>
    %40 = vector.shape_cast %39 : vector<2x8xf32> to vector<2x8x1xf32>
    %41 = arith.truncf %38 : vector<2x8x16xf32> to vector<2x8x16xbf16>
    %42 = vector.extract_strided_slice %29 {offsets = [0, 0, 0], sizes = [2, 16, 8], strides = [1, 1, 1]} : vector<2x16x32xbf16> to vector<2x16x8xbf16>
    "tpu.trace_start"() <{level = 10 : i32, message = "bqk,bkd->bqd"}> : () -> ()
    %cst_29 = arith.constant dense<0.000000e+00> : vector<2x8x8xf32>
    %43 = tpu.matmul %41, %42, %cst_29 {dimension_numbers = #tpu.dot_dimension_numbers<[2], [1], [1], [2], [0, 0, 0, 1, 1, 2], [0], [0]>} : vector<2x8x16xbf16>, vector<2x16x8xbf16>, vector<2x8x8xf32> -> vector<2x8x8xf32>
    "tpu.trace_stop"() : () -> ()
    %44 = tpu.reciprocal %40 : vector<2x8x1xf32> -> vector<2x8x1xf32>
    %45 = vector.broadcast %44 : vector<2x8x1xf32> to vector<2x8x8xf32>
    %46 = arith.mulf %43, %45 : vector<2x8x8xf32>
    %47 = vector.shape_cast %46 : vector<2x8x8xf32> to vector<16x8xf32>
    %48 = arith.truncf %47 : vector<16x8xf32> to vector<16x8xbf16>
    %c0_30 = arith.constant 0 : index
    %c0_31 = arith.constant 0 : index
    %c0_32 = arith.constant 0 : index
    %49 = vector.load %arg11[%c0_30, %c0_31, %c0_32] : memref<4x8x32xbf16, #tpu.memory_space<vmem>>, vector<1x8x32xbf16>
    %50 = vector.shape_cast %49 : vector<1x8x32xbf16> to vector<8x32xbf16>
    %cst_33 = arith.constant dense<0.000000e+00> : vector<16x32xf32>
    %51 = tpu.matmul %48, %50, %cst_33 {dimension_numbers = #tpu.dot_dimension_numbers<[1], [0], [0], [1], [0, 0, 1, 1], [], []>} : vector<16x8xbf16>, vector<8x32xbf16>, vector<16x32xf32> -> vector<16x32xf32>
    %52 = arith.addf %30, %51 : vector<16x32xf32>
    %53 = vector.extract_strided_slice %25 {offsets = [0, 0, 8], sizes = [2, 8, 8], strides = [1, 1, 1]} : vector<2x8x32xbf16> to vector<2x8x8xbf16>
    %54 = vector.extract_strided_slice %27 {offsets = [0, 0, 8], sizes = [2, 16, 8], strides = [1, 1, 1]} : vector<2x16x32xbf16> to vector<2x16x8xbf16>
    "tpu.trace_start"() <{level = 10 : i32, message = "bqd,bkd->bqk"}> : () -> ()
    %cst_34 = arith.constant dense<0.000000e+00> : vector<2x8x16xf32>
    %55 = tpu.matmul %53, %54, %cst_34 {dimension_numbers = #tpu.dot_dimension_numbers<[2], [2], [1], [1], [0, 0, 0, 1, 1, 1], [0], [0]>} : vector<2x8x8xbf16>, vector<2x16x8xbf16>, vector<2x8x16xf32> -> vector<2x8x16xf32>
    "tpu.trace_stop"() : () -> ()
    %cst_35 = arith.constant dense<0xFF800000> : vector<2x8xf32>
    %56 = vector.multi_reduction <maximumf>, %55, %cst_35 [2] : vector<2x8x16xf32> to vector<2x8xf32>
    %57 = vector.shape_cast %56 : vector<2x8xf32> to vector<2x8x1xf32>
    %58 = vector.broadcast %57 : vector<2x8x1xf32> to vector<2x8x16xf32>
    %59 = arith.subf %55, %58 : vector<2x8x16xf32>
    %60 = math.exp %59 : vector<2x8x16xf32>
    %cst_36 = arith.constant dense<0.000000e+00> : vector<2x8xf32>
    %61 = vector.multi_reduction <add>, %60, %cst_36 [2] : vector<2x8x16xf32> to vector<2x8xf32>
    %62 = vector.shape_cast %61 : vector<2x8xf32> to vector<2x8x1xf32>
    %63 = arith.truncf %60 : vector<2x8x16xf32> to vector<2x8x16xbf16>
    %64 = vector.extract_strided_slice %29 {offsets = [0, 0, 8], sizes = [2, 16, 8], strides = [1, 1, 1]} : vector<2x16x32xbf16> to vector<2x16x8xbf16>
    "tpu.trace_start"() <{level = 10 : i32, message = "bqk,bkd->bqd"}> : () -> ()
    %cst_37 = arith.constant dense<0.000000e+00> : vector<2x8x8xf32>
    %65 = tpu.matmul %63, %64, %cst_37 {dimension_numbers = #tpu.dot_dimension_numbers<[2], [1], [1], [2], [0, 0, 0, 1, 1, 2], [0], [0]>} : vector<2x8x16xbf16>, vector<2x16x8xbf16>, vector<2x8x8xf32> -> vector<2x8x8xf32>
    "tpu.trace_stop"() : () -> ()
    %66 = tpu.reciprocal %62 : vector<2x8x1xf32> -> vector<2x8x1xf32>
    %67 = vector.broadcast %66 : vector<2x8x1xf32> to vector<2x8x8xf32>
    %68 = arith.mulf %65, %67 : vector<2x8x8xf32>
    %69 = vector.shape_cast %68 : vector<2x8x8xf32> to vector<16x8xf32>
    %70 = arith.truncf %69 : vector<16x8xf32> to vector<16x8xbf16>
    %c1 = arith.constant 1 : index
    %c0_38 = arith.constant 0 : index
    %c0_39 = arith.constant 0 : index
    %71 = vector.load %arg11[%c1, %c0_38, %c0_39] : memref<4x8x32xbf16, #tpu.memory_space<vmem>>, vector<1x8x32xbf16>
    %72 = vector.shape_cast %71 : vector<1x8x32xbf16> to vector<8x32xbf16>
    %cst_40 = arith.constant dense<0.000000e+00> : vector<16x32xf32>
    %73 = tpu.matmul %70, %72, %cst_40 {dimension_numbers = #tpu.dot_dimension_numbers<[1], [0], [0], [1], [0, 0, 1, 1], [], []>} : vector<16x8xbf16>, vector<8x32xbf16>, vector<16x32xf32> -> vector<16x32xf32>
    %74 = arith.addf %52, %73 : vector<16x32xf32>
    %75 = vector.extract_strided_slice %25 {offsets = [0, 0, 16], sizes = [2, 8, 8], strides = [1, 1, 1]} : vector<2x8x32xbf16> to vector<2x8x8xbf16>
    %76 = vector.extract_strided_slice %27 {offsets = [0, 0, 16], sizes = [2, 16, 8], strides = [1, 1, 1]} : vector<2x16x32xbf16> to vector<2x16x8xbf16>
    "tpu.trace_start"() <{level = 10 : i32, message = "bqd,bkd->bqk"}> : () -> ()
    %cst_41 = arith.constant dense<0.000000e+00> : vector<2x8x16xf32>
    %77 = tpu.matmul %75, %76, %cst_41 {dimension_numbers = #tpu.dot_dimension_numbers<[2], [2], [1], [1], [0, 0, 0, 1, 1, 1], [0], [0]>} : vector<2x8x8xbf16>, vector<2x16x8xbf16>, vector<2x8x16xf32> -> vector<2x8x16xf32>
    "tpu.trace_stop"() : () -> ()
    %cst_42 = arith.constant dense<0xFF800000> : vector<2x8xf32>
    %78 = vector.multi_reduction <maximumf>, %77, %cst_42 [2] : vector<2x8x16xf32> to vector<2x8xf32>
    %79 = vector.shape_cast %78 : vector<2x8xf32> to vector<2x8x1xf32>
    %80 = vector.broadcast %79 : vector<2x8x1xf32> to vector<2x8x16xf32>
    %81 = arith.subf %77, %80 : vector<2x8x16xf32>
    %82 = math.exp %81 : vector<2x8x16xf32>
    %cst_43 = arith.constant dense<0.000000e+00> : vector<2x8xf32>
    %83 = vector.multi_reduction <add>, %82, %cst_43 [2] : vector<2x8x16xf32> to vector<2x8xf32>
    %84 = vector.shape_cast %83 : vector<2x8xf32> to vector<2x8x1xf32>
    %85 = arith.truncf %82 : vector<2x8x16xf32> to vector<2x8x16xbf16>
    %86 = vector.extract_strided_slice %29 {offsets = [0, 0, 16], sizes = [2, 16, 8], strides = [1, 1, 1]} : vector<2x16x32xbf16> to vector<2x16x8xbf16>
    "tpu.trace_start"() <{level = 10 : i32, message = "bqk,bkd->bqd"}> : () -> ()
    %cst_44 = arith.constant dense<0.000000e+00> : vector<2x8x8xf32>
    %87 = tpu.matmul %85, %86, %cst_44 {dimension_numbers = #tpu.dot_dimension_numbers<[2], [1], [1], [2], [0, 0, 0, 1, 1, 2], [0], [0]>} : vector<2x8x16xbf16>, vector<2x16x8xbf16>, vector<2x8x8xf32> -> vector<2x8x8xf32>
    "tpu.trace_stop"() : () -> ()
    %88 = tpu.reciprocal %84 : vector<2x8x1xf32> -> vector<2x8x1xf32>
    %89 = vector.broadcast %88 : vector<2x8x1xf32> to vector<2x8x8xf32>
    %90 = arith.mulf %87, %89 : vector<2x8x8xf32>
    %91 = vector.shape_cast %90 : vector<2x8x8xf32> to vector<16x8xf32>
    %92 = arith.truncf %91 : vector<16x8xf32> to vector<16x8xbf16>
    %c2 = arith.constant 2 : index
    %c0_45 = arith.constant 0 : index
    %c0_46 = arith.constant 0 : index
    %93 = vector.load %arg11[%c2, %c0_45, %c0_46] : memref<4x8x32xbf16, #tpu.memory_space<vmem>>, vector<1x8x32xbf16>
    %94 = vector.shape_cast %93 : vector<1x8x32xbf16> to vector<8x32xbf16>
    %cst_47 = arith.constant dense<0.000000e+00> : vector<16x32xf32>
    %95 = tpu.matmul %92, %94, %cst_47 {dimension_numbers = #tpu.dot_dimension_numbers<[1], [0], [0], [1], [0, 0, 1, 1], [], []>} : vector<16x8xbf16>, vector<8x32xbf16>, vector<16x32xf32> -> vector<16x32xf32>
    %96 = arith.addf %74, %95 : vector<16x32xf32>
    %97 = vector.extract_strided_slice %25 {offsets = [0, 0, 24], sizes = [2, 8, 8], strides = [1, 1, 1]} : vector<2x8x32xbf16> to vector<2x8x8xbf16>
    %98 = vector.extract_strided_slice %27 {offsets = [0, 0, 24], sizes = [2, 16, 8], strides = [1, 1, 1]} : vector<2x16x32xbf16> to vector<2x16x8xbf16>
    "tpu.trace_start"() <{level = 10 : i32, message = "bqd,bkd->bqk"}> : () -> ()
    %cst_48 = arith.constant dense<0.000000e+00> : vector<2x8x16xf32>
    %99 = tpu.matmul %97, %98, %cst_48 {dimension_numbers = #tpu.dot_dimension_numbers<[2], [2], [1], [1], [0, 0, 0, 1, 1, 1], [0], [0]>} : vector<2x8x8xbf16>, vector<2x16x8xbf16>, vector<2x8x16xf32> -> vector<2x8x16xf32>
    "tpu.trace_stop"() : () -> ()
    %cst_49 = arith.constant dense<0xFF800000> : vector<2x8xf32>
    %100 = vector.multi_reduction <maximumf>, %99, %cst_49 [2] : vector<2x8x16xf32> to vector<2x8xf32>
    %101 = vector.shape_cast %100 : vector<2x8xf32> to vector<2x8x1xf32>
    %102 = vector.broadcast %101 : vector<2x8x1xf32> to vector<2x8x16xf32>
    %103 = arith.subf %99, %102 : vector<2x8x16xf32>
    %104 = math.exp %103 : vector<2x8x16xf32>
    %cst_50 = arith.constant dense<0.000000e+00> : vector<2x8xf32>
    %105 = vector.multi_reduction <add>, %104, %cst_50 [2] : vector<2x8x16xf32> to vector<2x8xf32>
    %106 = vector.shape_cast %105 : vector<2x8xf32> to vector<2x8x1xf32>
    %107 = arith.truncf %104 : vector<2x8x16xf32> to vector<2x8x16xbf16>
    %108 = vector.extract_strided_slice %29 {offsets = [0, 0, 24], sizes = [2, 16, 8], strides = [1, 1, 1]} : vector<2x16x32xbf16> to vector<2x16x8xbf16>
    "tpu.trace_start"() <{level = 10 : i32, message = "bqk,bkd->bqd"}> : () -> ()
    %cst_51 = arith.constant dense<0.000000e+00> : vector<2x8x8xf32>
    %109 = tpu.matmul %107, %108, %cst_51 {dimension_numbers = #tpu.dot_dimension_numbers<[2], [1], [1], [2], [0, 0, 0, 1, 1, 2], [0], [0]>} : vector<2x8x16xbf16>, vector<2x16x8xbf16>, vector<2x8x8xf32> -> vector<2x8x8xf32>
    "tpu.trace_stop"() : () -> ()
    %110 = tpu.reciprocal %106 : vector<2x8x1xf32> -> vector<2x8x1xf32>
    %111 = vector.broadcast %110 : vector<2x8x1xf32> to vector<2x8x8xf32>
    %112 = arith.mulf %109, %111 : vector<2x8x8xf32>
    %113 = vector.shape_cast %112 : vector<2x8x8xf32> to vector<16x8xf32>
    %114 = arith.truncf %113 : vector<16x8xf32> to vector<16x8xbf16>
    %c3 = arith.constant 3 : index
    %c0_52 = arith.constant 0 : index
    %c0_53 = arith.constant 0 : index
    %115 = vector.load %arg11[%c3, %c0_52, %c0_53] : memref<4x8x32xbf16, #tpu.memory_space<vmem>>, vector<1x8x32xbf16>
    %116 = vector.shape_cast %115 : vector<1x8x32xbf16> to vector<8x32xbf16>
    %cst_54 = arith.constant dense<0.000000e+00> : vector<16x32xf32>
    %117 = tpu.matmul %114, %116, %cst_54 {dimension_numbers = #tpu.dot_dimension_numbers<[1], [0], [0], [1], [0, 0, 1, 1], [], []>} : vector<16x8xbf16>, vector<8x32xbf16>, vector<16x32xf32> -> vector<16x32xf32>
    %118 = arith.addf %96, %117 : vector<16x32xf32>
    %c0_55 = arith.constant 0 : index
    %c0_56 = arith.constant 0 : index
    %119 = vector.load %arg12[%c0_55, %c0_56] : memref<1x32xf32, #tpu.memory_space<vmem>>, vector<1x32xf32>
    %120 = vector.broadcast %119 : vector<1x32xf32> to vector<16x32xf32>
    %121 = arith.addf %118, %120 : vector<16x32xf32>
    %122 = arith.extf %0 : vector<2x8x32xbf16> to vector<2x8x32xf32>
    %123 = vector.shape_cast %122 : vector<2x8x32xf32> to vector<16x32xf32>
    %124 = arith.addf %123, %121 : vector<16x32xf32>
    %cst_57 = arith.constant dense<0.000000e+00> : vector<16xf32>
    %125 = vector.multi_reduction <add>, %124, %cst_57 [1] : vector<16x32xf32> to vector<16xf32>
    %126 = vector.shape_cast %125 : vector<16xf32> to vector<16x1xf32>
    %cst_58 = arith.constant 3.200000e+01 : f32
    %127 = vector.broadcast %cst_58 : f32 to vector<16x1xf32>
    %128 = arith.divf %126, %127 : vector<16x1xf32>
    %129 = vector.broadcast %128 : vector<16x1xf32> to vector<16x32xf32>
    %130 = arith.subf %124, %129 : vector<16x32xf32>
    %131 = arith.mulf %130, %130 : vector<16x32xf32>
    %cst_59 = arith.constant dense<0.000000e+00> : vector<16xf32>
    %132 = vector.multi_reduction <add>, %131, %cst_59 [1] : vector<16x32xf32> to vector<16xf32>
    %133 = vector.shape_cast %132 : vector<16xf32> to vector<16x1xf32>
    %cst_60 = arith.constant 3.200000e+01 : f32
    %134 = vector.broadcast %cst_60 : f32 to vector<16x1xf32>
    %135 = arith.divf %133, %134 : vector<16x1xf32>
    %136 = vector.broadcast %128 : vector<16x1xf32> to vector<16x32xf32>
    %137 = arith.subf %124, %136 : vector<16x32xf32>
    %cst_61 = arith.constant 9.99999974E-6 : f32
    %138 = vector.broadcast %cst_61 : f32 to vector<16x1xf32>
    %139 = arith.addf %135, %138 : vector<16x1xf32>
    %140 = math.rsqrt %139 : vector<16x1xf32>
    %141 = vector.broadcast %140 : vector<16x1xf32> to vector<16x32xf32>
    %142 = arith.mulf %137, %141 : vector<16x32xf32>
    %c0_62 = arith.constant 0 : index
    %c0_63 = arith.constant 0 : index
    %143 = vector.load %arg13[%c0_62, %c0_63] : memref<1x32xf32, #tpu.memory_space<vmem>>, vector<1x32xf32>
    %144 = vector.broadcast %143 : vector<1x32xf32> to vector<16x32xf32>
    %145 = arith.mulf %142, %144 : vector<16x32xf32>
    %c0_64 = arith.constant 0 : index
    %c0_65 = arith.constant 0 : index
    %146 = vector.load %arg14[%c0_64, %c0_65] : memref<1x32xf32, #tpu.memory_space<vmem>>, vector<1x32xf32>
    %147 = vector.broadcast %146 : vector<1x32xf32> to vector<16x32xf32>
    %148 = arith.addf %145, %147 : vector<16x32xf32>
    %149 = vector.shape_cast %148 : vector<16x32xf32> to vector<2x8x32xf32>
    %c0_66 = arith.constant 0 : index
    %c0_67 = arith.constant 0 : index
    %c0_68 = arith.constant 0 : index
    %150 = vector.load %arg15[%c0_66, %c0_67, %c0_68] : memref<2x8x32xf32, #tpu.memory_space<vmem>>, vector<2x8x32xf32>
    tpu.vector_store %arg15[%c0_66, %c0_67, %c0_68], %149 {strides = array<i32>} : memref<2x8x32xf32, #tpu.memory_space<vmem>>, vector<2x8x32xf32>,
    return
  }
  func.func @transform_0(%arg0: i32) -> (i32, i32, i32) {
    %c0_i32 = arith.constant 0 : i32
    %c0_i32_0 = arith.constant 0 : i32
    %c0_i32_1 = arith.constant 0 : i32
    return %arg0, %c0_i32, %c0_i32_0 : i32, i32, i32
  }
  func.func @transform_1(%arg0: i32) -> (i32, i32, i32) {
    %c0_i32 = arith.constant 0 : i32
    %c0_i32_0 = arith.constant 0 : i32
    %c0_i32_1 = arith.constant 0 : i32
    return %arg0, %c0_i32, %c0_i32_0 : i32, i32, i32
  }
  func.func @transform_2(%arg0: i32) -> (i32, i32, i32) {
    %c0_i32 = arith.constant 0 : i32
    %c0_i32_0 = arith.constant 0 : i32
    %c0_i32_1 = arith.constant 0 : i32
    return %arg0, %c0_i32, %c0_i32_0 : i32, i32, i32
  }
  func.func @transform_3(%arg0: i32) -> (i32, i32, i32) {
    %c0_i32 = arith.constant 0 : i32
    %c0_i32_0 = arith.constant 0 : i32
    %c0_i32_1 = arith.constant 0 : i32
    return %arg0, %c0_i32, %c0_i32_0 : i32, i32, i32
  }
  func.func @transform_4(%arg0: i32) -> (i32, i32) {
    %c0_i32 = arith.constant 0 : i32
    %c0_i32_0 = arith.constant 0 : i32
    %c0_i32_1 = arith.constant 0 : i32
    return %c0_i32, %c0_i32_0 : i32, i32
  }
  func.func @transform_5(%arg0: i32) -> (i32, i32) {
    %c0_i32 = arith.constant 0 : i32
    %c0_i32_0 = arith.constant 0 : i32
    %c0_i32_1 = arith.constant 0 : i32
    return %c0_i32, %c0_i32_0 : i32, i32
  }
  func.func @transform_6(%arg0: i32) -> (i32, i32) {
    %c0_i32 = arith.constant 0 : i32
    %c0_i32_0 = arith.constant 0 : i32
    %c0_i32_1 = arith.constant 0 : i32
    return %c0_i32, %c0_i32_0 : i32, i32
  }
  func.func @transform_7(%arg0: i32) -> (i32, i32) {
    %c0_i32 = arith.constant 0 : i32
    %c0_i32_0 = arith.constant 0 : i32
    %c0_i32_1 = arith.constant 0 : i32
    return %c0_i32, %c0_i32_0 : i32, i32
  }
  func.func @transform_8(%arg0: i32) -> (i32, i32) {
    %c0_i32 = arith.constant 0 : i32
    %c0_i32_0 = arith.constant 0 : i32
    %c0_i32_1 = arith.constant 0 : i32
    return %c0_i32, %c0_i32_0 : i32, i32
  }
  func.func @transform_9(%arg0: i32) -> (i32, i32) {
    %c0_i32 = arith.constant 0 : i32
    %c0_i32_0 = arith.constant 0 : i32
    %c0_i32_1 = arith.constant 0 : i32
    return %c0_i32, %c0_i32_0 : i32, i32
  }
  func.func @transform_10(%arg0: i32) -> (i32, i32, i32) {
    %c0_i32 = arith.constant 0 : i32
    %c0_i32_0 = arith.constant 0 : i32
    %c0_i32_1 = arith.constant 0 : i32
    %c0_i32_2 = arith.constant 0 : i32
    return %c0_i32, %c0_i32_0, %c0_i32_1 : i32, i32, i32
  }
  func.func @transform_11(%arg0: i32) -> (i32, i32) {
    %c0_i32 = arith.constant 0 : i32
    %c0_i32_0 = arith.constant 0 : i32
    %c0_i32_1 = arith.constant 0 : i32
    return %c0_i32, %c0_i32_0 : i32, i32
  }
  func.func @transform_12(%arg0: i32) -> (i32, i32) {
    %c0_i32 = arith.constant 0 : i32
    %c0_i32_0 = arith.constant 0 : i32
    %c0_i32_1 = arith.constant 0 : i32
    return %c0_i32, %c0_i32_0 : i32, i32
  }
  func.func @transform_13(%arg0: i32) -> (i32, i32) {
    %c0_i32 = arith.constant 0 : i32
    %c0_i32_0 = arith.constant 0 : i32
    %c0_i32_1 = arith.constant 0 : i32
    return %c0_i32, %c0_i32_0 : i32, i32
  }
  func.func @transform_14(%arg0: i32) -> (i32, i32, i32) {
    %c0_i32 = arith.constant 0 : i32
    %c0_i32_0 = arith.constant 0 : i32
    %c0_i32_1 = arith.constant 0 : i32
    return %arg0, %c0_i32, %c0_i32_0 : i32, i32, i32
  }
}

module attributes {stable_mosaic.version = 11 : i64} {
  func.func @cross_attention_kernel(%arg0: i32, %arg1: memref<2x8x32xbf16, #tpu.memory_space<vmem>>, %arg2: memref<2x8x32xbf16, #tpu.memory_space<vmem>>, %arg3: memref<2x16x32xbf16, #tpu.memory_space<vmem>>, %arg4: memref<2x16x32xbf16, #tpu.memory_space<vmem>>, %arg5: memref<32x32xbf16, #tpu.memory_space<vmem>>, %arg6: memref<32x32xbf16, #tpu.memory_space<vmem>>, %arg7: memref<32x32xbf16, #tpu.memory_space<vmem>>, %arg8: memref<1x32xf32, #tpu.memory_space<vmem>>, %arg9: memref<1x32xf32, #tpu.memory_space<vmem>>, %arg10: memref<1x32xf32, #tpu.memory_space<vmem>>, %arg11: memref<4x8x32xbf16, #tpu.memory_space<vmem>>, %arg12: memref<1x32xf32, #tpu.memory_space<vmem>>, %arg13: memref<1x32xf32, #tpu.memory_space<vmem>>, %arg14: memref<1x32xf32, #tpu.memory_space<vmem>>, %arg15: memref<2x8x32xf32, #tpu.memory_space<vmem>>) attributes {dimension_semantics = [#tpu.dimension_semantics<parallel>], iteration_bounds = array<i64: 1>, scalar_prefetch = 0 : i64, scratch_operands = 0 : i64, tpu.core_type = #tpu.core_type<tc>, window_params = [{transform_indices = @transform_0, window_bounds = array<i64: 2, 8, 32>}, {transform_indices = @transform_1, window_bounds = array<i64: 2, 8, 32>}, {transform_indices = @transform_2, window_bounds = array<i64: 2, 16, 32>}, {transform_indices = @transform_3, window_bounds = array<i64: 2, 16, 32>}, {pipeline_mode = #tpu.pipeline_mode<synchronous>, transform_indices = @transform_4, window_bounds = array<i64: 32, 32>}, {pipeline_mode = #tpu.pipeline_mode<synchronous>, transform_indices = @transform_5, window_bounds = array<i64: 32, 32>}, {pipeline_mode = #tpu.pipeline_mode<synchronous>, transform_indices = @transform_6, window_bounds = array<i64: 32, 32>}, {pipeline_mode = #tpu.pipeline_mode<synchronous>, transform_indices = @transform_7, window_bounds = array<i64: 1, 32>}, {pipeline_mode = #tpu.pipeline_mode<synchronous>, transform_indices = @transform_8, window_bounds = array<i64: 1, 32>}, {pipeline_mode = #tpu.pipeline_mode<synchronous>, transform_indices = @transform_9, window_bounds = array<i64: 1, 32>}, {pipeline_mode = #tpu.pipeline_mode<synchronous>, transform_indices = @transform_10, window_bounds = array<i64: 4, 8, 32>}, {pipeline_mode = #tpu.pipeline_mode<synchronous>, transform_indices = @transform_11, window_bounds = array<i64: 1, 32>}, {pipeline_mode = #tpu.pipeline_mode<synchronous>, transform_indices = @transform_12, window_bounds = array<i64: 1, 32>}, {pipeline_mode = #tpu.pipeline_mode<synchronous>, transform_indices = @transform_13, window_bounds = array<i64: 1, 32>}, {transform_indices = @transform_14, window_bounds = array<i64: 2, 8, 32>}]} {
    %c0 = arith.constant 0 : index
    %c0_0 = arith.constant 0 : index
    %c0_1 = arith.constant 0 : index
    %0 = vector.load %arg1[%c0, %c0_0, %c0_1] : memref<2x8x32xbf16, #tpu.memory_space<vmem>>, vector<2x8x32xbf16>
    %c0_2 = arith.constant 0 : index
    %c0_3 = arith.constant 0 : index
    %c0_4 = arith.constant 0 : index
    %1 = vector.load %arg2[%c0_2, %c0_3, %c0_4] : memref<2x8x32xbf16, #tpu.memory_space<vmem>>, vector<2x8x32xbf16>
    %2 = arith.addf %0, %1 : vector<2x8x32xbf16>
    %3 = vector.shape_cast %2 : vector<2x8x32xbf16> to vector<16x32xbf16>
    %c0_5 = arith.constant 0 : index
    %c0_6 = arith.constant 0 : index
    %c0_7 = arith.constant 0 : index
    %4 = vector.load %arg3[%c0_5, %c0_6, %c0_7] : memref<2x16x32xbf16, #tpu.memory_space<vmem>>, vector<2x16x32xbf16>
    %c0_8 = arith.constant 0 : index
    %c0_9 = arith.constant 0 : index
    %c0_10 = arith.constant 0 : index
    %5 = vector.load %arg4[%c0_8, %c0_9, %c0_10] : memref<2x16x32xbf16, #tpu.memory_space<vmem>>, vector<2x16x32xbf16>
    %6 = arith.addf %4, %5 : vector<2x16x32xbf16>
    %7 = vector.shape_cast %6 : vector<2x16x32xbf16> to vector<32x32xbf16>
    %8 = vector.shape_cast %4 : vector<2x16x32xbf16> to vector<32x32xbf16>
    %c0_11 = arith.constant 0 : index
    %c0_12 = arith.constant 0 : index
    %9 = vector.load %arg5[%c0_11, %c0_12] : memref<32x32xbf16, #tpu.memory_space<vmem>>, vector<32x32xbf16>
    %cst = arith.constant dense<0.000000e+00> : vector<16x32xf32>
    %10 = tpu.matmul %3, %9, %cst {dimension_numbers = #tpu.dot_dimension_numbers<[1], [0], [0], [1], [0, 0, 1, 1], [], []>} : vector<16x32xbf16>, vector<32x32xbf16>, vector<16x32xf32> -> vector<16x32xf32>
    %c0_13 = arith.constant 0 : index
    %c0_14 = arith.constant 0 : index
    %11 = vector.load %arg8[%c0_13, %c0_14] : memref<1x32xf32, #tpu.memory_space<vmem>>, vector<1x32xf32>
    %12 = vector.broadcast %11 : vector<1x32xf32> to vector<16x32xf32>
    %13 = arith.addf %10, %12 : vector<16x32xf32>
    %c0_15 = arith.constant 0 : index
    %c0_16 = arith.constant 0 : index
    %14 = vector.load %arg6[%c0_15, %c0_16] : memref<32x32xbf16, #tpu.memory_space<vmem>>, vector<32x32xbf16>
    %cst_17 = arith.constant dense<0.000000e+00> : vector<32x32xf32>
    %15 = tpu.matmul %7, %14, %cst_17 {dimension_numbers = #tpu.dot_dimension_numbers<[1], [0], [0], [1], [0, 0, 1, 1], [], []>} : vector<32x32xbf16>, vector<32x32xbf16>, vector<32x32xf32> -> vector<32x32xf32>
    %c0_18 = arith.constant 0 : index
    %c0_19 = arith.constant 0 : index
    %16 = vector.load %arg9[%c0_18, %c0_19] : memref<1x32xf32, #tpu.memory_space<vmem>>, vector<1x32xf32>
    %17 = vector.broadcast %16 : vector<1x32xf32> to vector<32x32xf32>
    %18 = arith.addf %15, %17 : vector<32x32xf32>
    %c0_20 = arith.constant 0 : index
    %c0_21 = arith.constant 0 : index
    %19 = vector.load %arg7[%c0_20, %c0_21] : memref<32x32xbf16, #tpu.memory_space<vmem>>, vector<32x32xbf16>
    %cst_22 = arith.constant dense<0.000000e+00> : vector<32x32xf32>
    %20 = tpu.matmul %8, %19, %cst_22 {dimension_numbers = #tpu.dot_dimension_numbers<[1], [0], [0], [1], [0, 0, 1, 1], [], []>} : vector<32x32xbf16>, vector<32x32xbf16>, vector<32x32xf32> -> vector<32x32xf32>
    %c0_23 = arith.constant 0 : index
    %c0_24 = arith.constant 0 : index
    %21 = vector.load %arg10[%c0_23, %c0_24] : memref<1x32xf32, #tpu.memory_space<vmem>>, vector<1x32xf32>
    %22 = vector.broadcast %21 : vector<1x32xf32> to vector<32x32xf32>
    %23 = arith.addf %20, %22 : vector<32x32xf32>
    %24 = vector.shape_cast %13 : vector<16x32xf32> to vector<2x8x32xf32>
    %25 = arith.truncf %24 : vector<2x8x32xf32> to vector<2x8x32xbf16>
    %26 = vector.shape_cast %18 : vector<32x32xf32> to vector<2x16x32xf32>
    %27 = arith.truncf %26 : vector<2x16x32xf32> to vector<2x16x32xbf16>
    %28 = vector.shape_cast %23 : vector<32x32xf32> to vector<2x16x32xf32>
    %29 = arith.truncf %28 : vector<2x16x32xf32> to vector<2x16x32xbf16>
    %cst_25 = arith.constant 0.000000e+00 : f32
    %30 = vector.broadcast %cst_25 : f32 to vector<16x32xf32>
    %31 = vector.extract_strided_slice %25 {offsets = [0, 0, 0], sizes = [2, 8, 8], strides = [1, 1, 1]} : vector<2x8x32xbf16> to vector<2x8x8xbf16>
    %32 = vector.extract_strided_slice %27 {offsets = [0, 0, 0], sizes = [2, 16, 8], strides = [1, 1, 1]} : vector<2x16x32xbf16> to vector<2x16x8xbf16>
    "tpu.trace_start"() <{level = 10 : i32, message = "bqd,bkd->bqk"}> : () -> ()
    %cst_26 = arith.constant dense<0.000000e+00> : vector<2x8x16xf32>
    %33 = tpu.matmul %31, %32, %cst_26 {dimension_numbers = #tpu.dot_dimension_numbers<[2], [2], [1], [1], [0, 0, 0, 1, 1, 1], [0], [0]>} : vector<2x8x8xbf16>, vector<2x16x8xbf16>, vector<2x8x16xf32> -> vector<2x8x16xf32>
    "tpu.trace_stop"() : () -> ()
    %cst_27 = arith.constant dense<0xFF800000> : vector<2x8xf32>
    %34 = vector.multi_reduction <maximumf>, %33, %cst_27 [2] : vector<2x8x16xf32> to vector<2x8xf32>
    %35 = vector.shape_cast %34 : vector<2x8xf32> to vector<2x8x1xf32>
    %36 = vector.broadcast %35 : vector<2x8x1xf32> to vector<2x8x16xf32>
    %37 = arith.subf %33, %36 : vector<2x8x16xf32>
    %38 = math.exp %37 : vector<2x8x16xf32>
    %cst_28 = arith.constant dense<0.000000e+00> : vector<2x8xf32>
    %39 = vector.multi_reduction <add>, %38, %cst_28 [2] : vector<2x8x16xf32> to vector<2x8xf32>
    %40 = vector.shape_cast %39 : vector<2x8xf32> to vector<2x8x1xf32>
    %41 = arith.truncf %38 : vector<2x8x16xf32> to vector<2x8x16xbf16>
    %42 = vector.extract_strided_slice %29 {offsets = [0, 0, 0], sizes = [2, 16, 8], strides = [1, 1, 1]} : vector<2x16x32xbf16> to vector<2x16x8xbf16>
    "tpu.trace_start"() <{level = 10 : i32, message = "bqk,bkd->bqd"}> : () -> ()
    %cst_29 = arith.constant dense<0.000000e+00> : vector<2x8x8xf32>
    %43 = tpu.matmul %41, %42, %cst_29 {dimension_numbers = #tpu.dot_dimension_numbers<[2], [1], [1], [2], [0, 0, 0, 1, 1, 2], [0], [0]>} : vector<2x8x16xbf16>, vector<2x16x8xbf16>, vector<2x8x8xf32> -> vector<2x8x8xf32>
    "tpu.trace_stop"() : () -> ()
    %44 = tpu.reciprocal %40 : vector<2x8x1xf32> -> vector<2x8x1xf32>
    %45 = vector.broadcast %44 : vector<2x8x1xf32> to vector<2x8x8xf32>
    %46 = arith.mulf %43, %45 : vector<2x8x8xf32>
    %47 = vector.shape_cast %46 : vector<2x8x8xf32> to vector<16x8xf32>
    %48 = arith.truncf %47 : vector<16x8xf32> to vector<16x8xbf16>
    %c0_30 = arith.constant 0 : index
    %c0_31 = arith.constant 0 : index
    %c0_32 = arith.constant 0 : index
    %49 = vector.load %arg11[%c0_30, %c0_31, %c0_32] : memref<4x8x32xbf16, #tpu.memory_space<vmem>>, vector<1x8x32xbf16>
    %50 = vector.shape_cast %49 : vector<1x8x32xbf16> to vector<8x32xbf16>
    %cst_33 = arith.constant dense<0.000000e+00> : vector<16x32xf32>
    %51 = tpu.matmul %48, %50, %cst_33 {dimension_numbers = #tpu.dot_dimension_numbers<[1], [0], [0], [1], [0, 0, 1, 1], [], []>} : vector<16x8xbf16>, vector<8x32xbf16>, vector<16x32xf32> -> vector<16x32xf32>
    %52 = arith.addf %30, %51 : vector<16x32xf32>
    %53 = vector.extract_strided_slice %25 {offsets = [0, 0, 8], sizes = [2, 8, 8], strides = [1, 1, 1]} : vector<2x8x32xbf16> to vector<2x8x8xbf16>
    %54 = vector.extract_strided_slice %27 {offsets = [0, 0, 8], sizes = [2, 16, 8], strides = [1, 1, 1]} : vector<2x16x32xbf16> to vector<2x16x8xbf16>
    "tpu.trace_start"() <{level = 10 : i32, message = "bqd,bkd->bqk"}> : () -> ()
    %cst_34 = arith.constant dense<0.000000e+00> : vector<2x8x16xf32>
    %55 = tpu.matmul %53, %54, %cst_34 {dimension_numbers = #tpu.dot_dimension_numbers<[2], [2], [1], [1], [0, 0, 0, 1, 1, 1], [0], [0]>} : vector<2x8x8xbf16>, vector<2x16x8xbf16>, vector<2x8x16xf32> -> vector<2x8x16xf32>
    "tpu.trace_stop"() : () -> ()
    %cst_35 = arith.constant dense<0xFF800000> : vector<2x8xf32>
    %56 = vector.multi_reduction <maximumf>, %55, %cst_35 [2] : vector<2x8x16xf32> to vector<2x8xf32>
    %57 = vector.shape_cast %56 : vector<2x8xf32> to vector<2x8x1xf32>
    %58 = vector.broadcast %57 : vector<2x8x1xf32> to vector<2x8x16xf32>
    %59 = arith.subf %55, %58 : vector<2x8x16xf32>
    %60 = math.exp %59 : vector<2x8x16xf32>
    %cst_36 = arith.constant dense<0.000000e+00> : vector<2x8xf32>
    %61 = vector.multi_reduction <add>, %60, %cst_36 [2] : vector<2x8x16xf32> to vector<2x8xf32>
    %62 = vector.shape_cast %61 : vector<2x8xf32> to vector<2x8x1xf32>
    %63 = arith.truncf %60 : vector<2x8x16xf32> to vector<2x8x16xbf16>
    %64 = vector.extract_strided_slice %29 {offsets = [0, 0, 8], sizes = [2, 16, 8], strides = [1, 1, 1]} : vector<2x16x32xbf16> to vector<2x16x8xbf16>
    "tpu.trace_start"() <{level = 10 : i32, message = "bqk,bkd->bqd"}> : () -> ()
    %cst_37 = arith.constant dense<0.000000e+00> : vector<2x8x8xf32>
    %65 = tpu.matmul %63, %64, %cst_37 {dimension_numbers = #tpu.dot_dimension_numbers<[2], [1], [1], [2], [0, 0, 0, 1, 1, 2], [0], [0]>} : vector<2x8x16xbf16>, vector<2x16x8xbf16>, vector<2x8x8xf32> -> vector<2x8x8xf32>
    "tpu.trace_stop"() : () -> ()
    %66 = tpu.reciprocal %62 : vector<2x8x1xf32> -> vector<2x8x1xf32>
    %67 = vector.broadcast %66 : vector<2x8x1xf32> to vector<2x8x8xf32>
    %68 = arith.mulf %65, %67 : vector<2x8x8xf32>
    %69 = vector.shape_cast %68 : vector<2x8x8xf32> to vector<16x8xf32>
    %70 = arith.truncf %69 : vector<16x8xf32> to vector<16x8xbf16>
    %c1 = arith.constant 1 : index
    %c0_38 = arith.constant 0 : index
    %c0_39 = arith.constant 0 : index
    %71 = vector.load %arg11[%c1, %c0_38, %c0_39] : memref<4x8x32xbf16, #tpu.memory_space<vmem>>, vector<1x8x32xbf16>
    %72 = vector.shape_cast %71 : vector<1x8x32xbf16> to vector<8x32xbf16>
    %cst_40 = arith.constant dense<0.000000e+00> : vector<16x32xf32>
    %73 = tpu.matmul %70, %72, %cst_40 {dimension_numbers = #tpu.dot_dimension_numbers<[1], [0], [0], [1], [0, 0, 1, 1], [], []>} : vector<16x8xbf16>, vector<8x32xbf16>, vector<16x32xf32> -> vector<16x32xf32>
    %74 = arith.addf %52, %73 : vector<16x32xf32>
    %75 = vector.extract_strided_slice %25 {offsets = [0, 0, 16], sizes = [2, 8, 8], strides = [1, 1, 1]} : vector<2x8x32xbf16> to vector<2x8x8xbf16>
    %76 = vector.extract_strided_slice %27 {offsets = [0, 0, 16], sizes = [2, 16, 8], strides = [1, 1, 1]} : vector<2x16x32xbf16> to vector<2x16x8xbf16>
    "tpu.trace_start"() <{level = 10 : i32, message = "bqd,bkd->bqk"}> : () -> ()
    %cst_41 = arith.constant dense<0.000000e+00> : vector<2x8x16xf32>
    %77 = tpu.matmul %75, %76, %cst_41 {dimension_numbers = #tpu.dot_dimension_numbers<[2], [2], [1], [1], [0, 0, 0, 1, 1, 1], [0], [0]>} : vector<2x8x8xbf16>, vector<2x16x8xbf16>, vector<2x8x16xf32> -> vector<2x8x16xf32>
    "tpu.trace_stop"() : () -> ()
    %cst_42 = arith.constant dense<0xFF800000> : vector<2x8xf32>
    %78 = vector.multi_reduction <maximumf>, %77, %cst_42 [2] : vector<2x8x16xf32> to vector<2x8xf32>
    %79 = vector.shape_cast %78 : vector<2x8xf32> to vector<2x8x1xf32>
    %80 = vector.broadcast %79 : vector<2x8x1xf32> to vector<2x8x16xf32>
    %81 = arith.subf %77, %80 : vector<2x8x16xf32>
    %82 = math.exp %81 : vector<2x8x16xf32>
    %cst_43 = arith.constant dense<0.000000e+00> : vector<2x8xf32>
    %83 = vector.multi_reduction <add>, %82, %cst_43 [2] : vector<2x8x16xf32> to vector<2x8xf32>
    %84 = vector.shape_cast %83 : vector<2x8xf32> to vector<2x8x1xf32>
    %85 = arith.truncf %82 : vector<2x8x16xf32> to vector<2x8x16xbf16>
    %86 = vector.extract_strided_slice %29 {offsets = [0, 0, 16], sizes = [2, 16, 8], strides = [1, 1, 1]} : vector<2x16x32xbf16> to vector<2x16x8xbf16>
    "tpu.trace_start"() <{level = 10 : i32, message = "bqk,bkd->bqd"}> : () -> ()
    %cst_44 = arith.constant dense<0.000000e+00> : vector<2x8x8xf32>
    %87 = tpu.matmul %85, %86, %cst_44 {dimension_numbers = #tpu.dot_dimension_numbers<[2], [1], [1], [2], [0, 0, 0, 1, 1, 2], [0], [0]>} : vector<2x8x16xbf16>, vector<2x16x8xbf16>, vector<2x8x8xf32> -> vector<2x8x8xf32>
    "tpu.trace_stop"() : () -> ()
    %88 = tpu.reciprocal %84 : vector<2x8x1xf32> -> vector<2x8x1xf32>
    %89 = vector.broadcast %88 : vector<2x8x1xf32> to vector<2x8x8xf32>
    %90 = arith.mulf %87, %89 : vector<2x8x8xf32>
    %91 = vector.shape_cast %90 : vector<2x8x8xf32> to vector<16x8xf32>
    %92 = arith.truncf %91 : vector<16x8xf32> to vector<16x8xbf16>
    %c2 = arith.constant 2 : index
    %c0_45 = arith.constant 0 : index
    %c0_46 = arith.constant 0 : index
    %93 = vector.load %arg11[%c2, %c0_45, %c0_46] : memref<4x8x32xbf16, #tpu.memory_space<vmem>>, vector<1x8x32xbf16>
    %94 = vector.shape_cast %93 : vector<1x8x32xbf16> to vector<8x32xbf16>
    %cst_47 = arith.constant dense<0.000000e+00> : vector<16x32xf32>
    %95 = tpu.matmul %92, %94, %cst_47 {dimension_numbers = #tpu.dot_dimension_numbers<[1], [0], [0], [1], [0, 0, 1, 1], [], []>} : vector<16x8xbf16>, vector<8x32xbf16>, vector<16x32xf32> -> vector<16x32xf32>
    %96 = arith.addf %74, %95 : vector<16x32xf32>
    %97 = vector.extract_strided_slice %25 {offsets = [0, 0, 24], sizes = [2, 8, 8], strides = [1, 1, 1]} : vector<2x8x32xbf16> to vector<2x8x8xbf16>
    %98 = vector.extract_strided_slice %27 {offsets = [0, 0, 24], sizes = [2, 16, 8], strides = [1, 1, 1]} : vector<2x16x32xbf16> to vector<2x16x8xbf16>
    "tpu.trace_start"() <{level = 10 : i32, message = "bqd,bkd->bqk"}> : () -> ()
    %cst_48 = arith.constant dense<0.000000e+00> : vector<2x8x16xf32>
    %99 = tpu.matmul %97, %98, %cst_48 {dimension_numbers = #tpu.dot_dimension_numbers<[2], [2], [1], [1], [0, 0, 0, 1, 1, 1], [0], [0]>} : vector<2x8x8xbf16>, vector<2x16x8xbf16>, vector<2x8x16xf32> -> vector<2x8x16xf32>
    "tpu.trace_stop"() : () -> ()
    %cst_49 = arith.constant dense<0xFF800000> : vector<2x8xf32>
    %100 = vector.multi_reduction <maximumf>, %99, %cst_49 [2] : vector<2x8x16xf32> to vector<2x8xf32>
    %101 = vector.shape_cast %100 : vector<2x8xf32> to vector<2x8x1xf32>
    %102 = vector.broadcast %101 : vector<2x8x1xf32> to vector<2x8x16xf32>
    %103 = arith.subf %99, %102 : vector<2x8x16xf32>
    %104 = math.exp %103 : vector<2x8x16xf32>
    %cst_50 = arith.constant dense<0.000000e+00> : vector<2x8xf32>
    %105 = vector.multi_reduction <add>, %104, %cst_50 [2] : vector<2x8x16xf32> to vector<2x8xf32>
    %106 = vector.shape_cast %105 : vector<2x8xf32> to vector<2x8x1xf32>
    %107 = arith.truncf %104 : vector<2x8x16xf32> to vector<2x8x16xbf16>
    %108 = vector.extract_strided_slice %29 {offsets = [0, 0, 24], sizes = [2, 16, 8], strides = [1, 1, 1]} : vector<2x16x32xbf16> to vector<2x16x8xbf16>
    "tpu.trace_start"() <{level = 10 : i32, message = "bqk,bkd->bqd"}> : () -> ()
    %cst_51 = arith.constant dense<0.000000e+00> : vector<2x8x8xf32>
    %109 = tpu.matmul %107, %108, %cst_51 {dimension_numbers = #tpu.dot_dimension_numbers<[2], [1], [1], [2], [0, 0, 0, 1, 1, 2], [0], [0]>} : vector<2x8x16xbf16>, vector<2x16x8xbf16>, vector<2x8x8xf32> -> vector<2x8x8xf32>
    "tpu.trace_stop"() : () -> ()
    %110 = tpu.reciprocal %106 : vector<2x8x1xf32> -> vector<2x8x1xf32>
    %111 = vector.broadcast %110 : vector<2x8x1xf32> to vector<2x8x8xf32>
    %112 = arith.mulf %109, %111 : vector<2x8x8xf32>
    %113 = vector.shape_cast %112 : vector<2x8x8xf32> to vector<16x8xf32>
    %114 = arith.truncf %113 : vector<16x8xf32> to vector<16x8xbf16>
    %c3 = arith.constant 3 : index
    %c0_52 = arith.constant 0 : index
    %c0_53 = arith.constant 0 : index
    %115 = vector.load %arg11[%c3, %c0_52, %c0_53] : memref<4x8x32xbf16, #tpu.memory_space<vmem>>, vector<1x8x32xbf16>
    %116 = vector.shape_cast %115 : vector<1x8x32xbf16> to vector<8x32xbf16>
    %cst_54 = arith.constant dense<0.000000e+00> : vector<16x32xf32>
    %117 = tpu.matmul %114, %116, %cst_54 {dimension_numbers = #tpu.dot_dimension_numbers<[1], [0], [0], [1], [0, 0, 1, 1], [], []>} : vector<16x8xbf16>, vector<8x32xbf16>, vector<16x32xf32> -> vector<16x32xf32>
    %118 = arith.addf %96, %117 : vector<16x32xf32>
    %c0_55 = arith.constant 0 : index
    %c0_56 = arith.constant 0 : index
    %119 = vector.load %arg12[%c0_55, %c0_56] : memref<1x32xf32, #tpu.memory_space<vmem>>, vector<1x32xf32>
    %120 = vector.broadcast %119 : vector<1x32xf32> to vector<16x32xf32>
    %121 = arith.addf %118, %120 : vector<16x32xf32>
    %122 = arith.extf %0 : vector<2x8x32xbf16> to vector<2x8x32xf32>
    %123 = vector.shape_cast %122 : vector<2x8x32xf32> to vector<16x32xf32>
    %124 = arith.addf %123, %121 : vector<16x32xf32>
    %cst_57 = arith.constant dense<0.000000e+00> : vector<16xf32>
    %125 = vector.multi_reduction <add>, %124, %cst_57 [1] : vector<16x32xf32> to vector<16xf32>
    %126 = vector.shape_cast %125 : vector<16xf32> to vector<16x1xf32>
    %cst_58 = arith.constant 3.200000e+01 : f32
    %127 = vector.broadcast %cst_58 : f32 to vector<16x1xf32>
    %128 = arith.divf %126, %127 : vector<16x1xf32>
    %129 = vector.broadcast %128 : vector<16x1xf32> to vector<16x32xf32>
    %130 = arith.subf %124, %129 : vector<16x32xf32>
    %131 = arith.mulf %130, %130 : vector<16x32xf32>
    %cst_59 = arith.constant dense<0.000000e+00> : vector<16xf32>
    %132 = vector.multi_reduction <add>, %131, %cst_59 [1] : vector<16x32xf32> to vector<16xf32>
    %133 = vector.shape_cast %132 : vector<16xf32> to vector<16x1xf32>
    %cst_60 = arith.constant 3.200000e+01 : f32
    %134 = vector.broadcast %cst_60 : f32 to vector<16x1xf32>
    %135 = arith.divf %133, %134 : vector<16x1xf32>
    %136 = vector.broadcast %128 : vector<16x1xf32> to vector<16x32xf32>
    %137 = arith.subf %124, %136 : vector<16x32xf32>
    %cst_61 = arith.constant 9.99999974E-6 : f32
    %138 = vector.broadcast %cst_61 : f32 to vector<16x1xf32>
    %139 = arith.addf %135, %138 : vector<16x1xf32>
    %140 = math.rsqrt %139 : vector<16x1xf32>
    %141 = vector.broadcast %140 : vector<16x1xf32> to vector<16x32xf32>
    %142 = arith.mulf %137, %141 : vector<16x32xf32>
    %c0_62 = arith.constant 0 : index
    %c0_63 = arith.constant 0 : index
    %143 = vector.load %arg13[%c0_62, %c0_63] : memref<1x32xf32, #tpu.memory_space<vmem>>, vector<1x32xf32>
    %144 = vector.broadcast %143 : vector<1x32xf32> to vector<16x32xf32>
    %145 = arith.mulf %142, %144 : vector<16x32xf32>
    %c0_64 = arith.constant 0 : index
    %c0_65 = arith.constant 0 : index
    %146 = vector.load %arg14[%c0_64, %c0_65] : memref<1x32xf32, #tpu.memory_space<vmem>>, vector<1x32xf32>
    %147 = vector.broadcast %146 : vector<1x32xf32> to vector<16x32xf32>
    %148 = arith.addf %145, %147 : vector<16x32xf32>
    %149 = vector.shape_cast %148 : vector<16x32xf32> to vector<2x8x32xf32>
    %c0_66 = arith.constant 0 : index
    %c0_67 = arith.constant 0 : index
    %c0_68 = arith.constant 0 : index
    %150 = vector.load %arg15[%c0_66, %c0_67, %c0_68] : memref<2x8x32xf32, #tpu.memory_space<vmem>>, vector<2x8x32xf32>
    tpu.vector_store %arg15[%c0_66, %c0_67, %c0_68], %149 {strides = array<i32>} : memref<2x8x32xf32, #tpu.memory_space<vmem>>, vector<2x8x32xf32>,
    return
  }
  func.func @transform_0(%arg0: i32) -> (i32, i32, i32) {
    %c0_i32 = arith.constant 0 : i32
    %c0_i32_0 = arith.constant 0 : i32
    %c0_i32_1 = arith.constant 0 : i32
    return %arg0, %c0_i32, %c0_i32_0 : i32, i32, i32
  }
  func.func @transform_1(%arg0: i32) -> (i32, i32, i32) {
    %c0_i32 = arith.constant 0 : i32
    %c0_i32_0 = arith.constant 0 : i32
    %c0_i32_1 = arith.constant 0 : i32
    return %arg0, %c0_i32, %c0_i32_0 : i32, i32, i32
  }
  func.func @transform_2(%arg0: i32) -> (i32, i32, i32) {
    %c0_i32 = arith.constant 0 : i32
    %c0_i32_0 = arith.constant 0 : i32
    %c0_i32_1 = arith.constant 0 : i32
    return %arg0, %c0_i32, %c0_i32_0 : i32, i32, i32
  }
  func.func @transform_3(%arg0: i32) -> (i32, i32, i32) {
    %c0_i32 = arith.constant 0 : i32
    %c0_i32_0 = arith.constant 0 : i32
    %c0_i32_1 = arith.constant 0 : i32
    return %arg0, %c0_i32, %c0_i32_0 : i32, i32, i32
  }
  func.func @transform_4(%arg0: i32) -> (i32, i32) {
    %c0_i32 = arith.constant 0 : i32
    %c0_i32_0 = arith.constant 0 : i32
    %c0_i32_1 = arith.constant 0 : i32
    return %c0_i32, %c0_i32_0 : i32, i32
  }
  func.func @transform_5(%arg0: i32) -> (i32, i32) {
    %c0_i32 = arith.constant 0 : i32
    %c0_i32_0 = arith.constant 0 : i32
    %c0_i32_1 = arith.constant 0 : i32
    return %c0_i32, %c0_i32_0 : i32, i32
  }
  func.func @transform_6(%arg0: i32) -> (i32, i32) {
    %c0_i32 = arith.constant 0 : i32
    %c0_i32_0 = arith.constant 0 : i32
    %c0_i32_1 = arith.constant 0 : i32
    return %c0_i32, %c0_i32_0 : i32, i32
  }
  func.func @transform_7(%arg0: i32) -> (i32, i32) {
    %c0_i32 = arith.constant 0 : i32
    %c0_i32_0 = arith.constant 0 : i32
    %c0_i32_1 = arith.constant 0 : i32
    return %c0_i32, %c0_i32_0 : i32, i32
  }
  func.func @transform_8(%arg0: i32) -> (i32, i32) {
    %c0_i32 = arith.constant 0 : i32
    %c0_i32_0 = arith.constant 0 : i32
    %c0_i32_1 = arith.constant 0 : i32
    return %c0_i32, %c0_i32_0 : i32, i32
  }
  func.func @transform_9(%arg0: i32) -> (i32, i32) {
    %c0_i32 = arith.constant 0 : i32
    %c0_i32_0 = arith.constant 0 : i32
    %c0_i32_1 = arith.constant 0 : i32
    return %c0_i32, %c0_i32_0 : i32, i32
  }
  func.func @transform_10(%arg0: i32) -> (i32, i32, i32) {
    %c0_i32 = arith.constant 0 : i32
    %c0_i32_0 = arith.constant 0 : i32
    %c0_i32_1 = arith.constant 0 : i32
    %c0_i32_2 = arith.constant 0 : i32
    return %c0_i32, %c0_i32_0, %c0_i32_1 : i32, i32, i32
  }
  func.func @transform_11(%arg0: i32) -> (i32, i32) {
    %c0_i32 = arith.constant 0 : i32
    %c0_i32_0 = arith.constant 0 : i32
    %c0_i32_1 = arith.constant 0 : i32
    return %c0_i32, %c0_i32_0 : i32, i32
  }
  func.func @transform_12(%arg0: i32) -> (i32, i32) {
    %c0_i32 = arith.constant 0 : i32
    %c0_i32_0 = arith.constant 0 : i32
    %c0_i32_1 = arith.constant 0 : i32
    return %c0_i32, %c0_i32_0 : i32, i32
  }
  func.func @transform_13(%arg0: i32) -> (i32, i32) {
    %c0_i32 = arith.constant 0 : i32
    %c0_i32_0 = arith.constant 0 : i32
    %c0_i32_1 = arith.constant 0 : i32
    return %c0_i32, %c0_i32_0 : i32, i32
  }
  func.func @transform_14(%arg0: i32) -> (i32, i32, i32) {
    %c0_i32 = arith.constant 0 : i32
    %c0_i32_0 = arith.constant 0 : i32
    %c0_i32_1 = arith.constant 0 : i32
    return %arg0, %c0_i32, %c0_i32_0 : i32, i32, i32
  }
}

</mosaic_0001>

<bundles_post_ra>
// kernel: tpu_custom_call.1
= control target key start
LH: loop header
LB: loop body
LE: loop exit
PB: predicated region body
PF: predicated region fallthrough
CT: control target
= control target key end

     0   :  { %19 = vsyncpa [#allocation3], 0  ;;  %s2501_s0 = inlined_call_operand.hbm [shape: bf16[2,8,32], index: 0, kind: input, shape index: {}]   ;;  %s2502_s1 = inlined_call_operand.hbm [shape: bf16[2,8,32], index: 1, kind: input, shape index: {}]   ;;  %s2503_s2 = inlined_call_operand.hbm [shape: bf16[2,16,32], index: 2, kind: input, shape index: {}]   ;;  %s2504_s3 = inlined_call_operand.hbm [shape: bf16[2,16,32], index: 3, kind: input, shape index: {}]   ;;  %s2505_s4 = inlined_call_operand.hbm [shape: bf16[32,32], index: 4, kind: input, shape index: {}]   ;;  %s2506_s5 = inlined_call_operand.vmem [shape: bf16[32,32], index: 5, kind: input, shape index: {}]   ;;  %s2507_s6 = inlined_call_operand.hbm [shape: bf16[32,32], index: 6, kind: input, shape index: {}]   ;;  %s2508_s7 = inlined_call_operand.vmem [shape: f32[1,32], index: 7, kind: input, shape index: {}]   ;;  %s2509_s8 = inlined_call_operand.vmem [shape: f32[1,32], index: 8, kind: input, shape index: {}]   ;;  %s2510_s9 = inlined_call_operand.hbm [shape: f32[1,32], index: 9, kind: input, shape index: {}]   ;;  %s2511_s10 = inlined_call_operand.vmem [shape: bf16[4,8,32], index: 10, kind: input, shape index: {}]   ;;  %s2512_s11 = inlined_call_operand.vmem [shape: f32[1,32], index: 11, kind: input, shape index: {}]   ;;  %s2513_s12 = inlined_call_operand.vmem [shape: f32[1,32], index: 12, kind: input, shape index: {}]   ;;  %s2514_s13 = inlined_call_operand.vmem [shape: f32[1,32], index: 13, kind: input, shape index: {}]   ;;  %s2515_s14 = inlined_call_operand.hbm [shape: f32[2,8,32], index: 14, kind: output, shape index: {}]  }
   0x1   :  { %20 = vsyncpa [#allocation6], 0 }
   0x2   :  { %21 = vsyncpa [#allocation9], 0 }
   0x3   :  { %22 = vsyncpa [#allocation12], 0 }
   0x4   :  { %23 = vsyncpa [#allocation4], 0  ;;  %s2044_s29 = smov [#allocation5]   ;;  %s2045_s15 = smov [#allocation8]  }
   0x5   :  { %s41_s30 = sshll.u32 %s2044_s29, 4  ;;  %s65_s16 = sshll.u32 %s2045_s15, 4  ;;  %s42_s30 = int_to_ptr.vmem [resolvable:$true] %s41_s30  ;;  %s2136_s16 = int_to_ptr.vmem [resolvable:$true] %s65_s16 }
   0x6   :  { %s1858_s19 = scalar_lea.hbm %s2502_s1, 128 }
   0x7   :  { %p1859_p0 = scmp.ne.s32.totalorder %s2502_s1, %s1858_s19  ;;  %p1862_p1 = scmp.lt.u32.totalorder %s1858_s19, %s2502_s1 }
   0x9   :  { %p1864_p2 = pnand %p1862_p1, %p1859_p0 }
   0xb   :  { %1867 = shalt.err (!%p1864_p2)
}
   0xc   :  { %s1868_s24 = scalar_lea.vmem %s42_s30, 128  ;;  %p1873_p4 = scmp.lt.s32.totalorder %s42_s30, %s42_s30 }
   0xd   :  { %p1869_p3 = scmp.ne.s32.totalorder %s42_s30, %s1868_s24  ;;  %p1874_p5 = scmp.lt.s32.totalorder %s1868_s24, %s1868_s24 }
   0xf   :  { %p1875_p6 = por %p1874_p5, %p1873_p4 }
  0x11   :  { %p1876_p7 = pnand %p1875_p6, %p1869_p3 }
  0x13   :  { %1879 = shalt.err (!%p1876_p7)
}
  0x14   :  { %s2046_s25 = smov 64   ;;  %s2047_s26 = smov 4  }
  0x15   :  { %47 = dma.hbm_to_vmem [thread:$0]  %s2502_s1, 128, %s42_s30, [#allocation6], %s2046_s25, %s2046_s25, %s2047_s26  }
  0x16   :  { %s1880_s17 = scalar_lea.hbm %s2504_s3, 256 }
  0x17   :  { %p1881_p8 = scmp.ne.s32.totalorder %s2504_s3, %s1880_s17  ;;  %p1884_p9 = scmp.lt.u32.totalorder %s1880_s17, %s2504_s3 }
  0x19   :  { %p1886_p10 = pnand %p1884_p9, %p1881_p8 }
  0x1b   :  { %1889 = shalt.err (!%p1886_p10)
}
  0x1c   :  { %s1890_s22 = scalar_lea.vmem %s2136_s16, 256  ;;  %p1895_p12 = scmp.lt.s32.totalorder %s2136_s16, %s2136_s16 }
  0x1d   :  { %p1891_p11 = scmp.ne.s32.totalorder %s2136_s16, %s1890_s22  ;;  %p1896_p13 = scmp.lt.s32.totalorder %s1890_s22, %s1890_s22 }
  0x1f   :  { %p1897_p0 = por %p1896_p13, %p1895_p12 }
  0x21   :  { %p1898_p1 = pnand %p1897_p0, %p1891_p11 }
  0x23   :  { %1901 = shalt.err (!%p1898_p1)
}
  0x24   :  { %71 = dma.hbm_to_vmem [thread:$0]  %s2504_s3, 256, %s2136_s16, [#allocation9], %s2046_s25, %s2046_s25, %s2047_s26  }
  0x25   :  { %s2048_s23 = smov [#allocation11]   ;;  %s2049_s27 = smov [#allocation2]  }
  0x26   :  { %s91_s24 = sshll.u32 %s2048_s23, 4  ;;  %s29_s28 = sshll.u32 %s2049_s27, 4  ;;  %s92_s24 = int_to_ptr.vmem [resolvable:$true] %s91_s24  ;;  %s2173_s28 = int_to_ptr.vmem [resolvable:$true] %s29_s28 }
  0x27   :  { %s1902_s17 = scalar_lea.hbm %s2507_s6, 256 }
  0x28   :  { %p1903_p2 = scmp.ne.s32.totalorder %s2507_s6, %s1902_s17  ;;  %p1906_p3 = scmp.lt.u32.totalorder %s1902_s17, %s2507_s6 }
  0x2a   :  { %p1908_p4 = pnand %p1906_p3, %p1903_p2 }
  0x2c   :  { %1911 = shalt.err (!%p1908_p4)
}
  0x2d   :  { %s1912_s3 = scalar_lea.vmem %s92_s24, 256  ;;  %p1917_p6 = scmp.lt.s32.totalorder %s92_s24, %s92_s24 }
  0x2e   :  { %p1913_p5 = scmp.ne.s32.totalorder %s92_s24, %s1912_s3  ;;  %p1918_p7 = scmp.lt.s32.totalorder %s1912_s3, %s1912_s3 }
  0x30   :  { %p1919_p8 = por %p1918_p7, %p1917_p6 }
  0x32   :  { %p1920_p9 = pnand %p1919_p8, %p1913_p5 }
  0x34   :  { %1923 = shalt.err (!%p1920_p9)
}
  0x35   :  { %97 = dma.hbm_to_vmem [thread:$0]  %s2507_s6, 256, %s92_s24, [#allocation12], %s2046_s25, %s2046_s25, %s2047_s26  }
  0x36   :  { %s1924_s23 = scalar_lea.hbm %s2501_s0, 128 }
  0x37   :  { %p1925_p10 = scmp.ne.s32.totalorder %s2501_s0, %s1924_s23  ;;  %p1928_p11 = scmp.lt.u32.totalorder %s1924_s23, %s2501_s0 }
  0x39   :  { %p1930_p12 = pnand %p1928_p11, %p1925_p10 }
  0x3b   :  { %1933 = shalt.err (!%p1930_p12)
}
  0x3c   :  { %s1934_s18 = scalar_lea.vmem %s2173_s28, 128  ;;  %p1939_p0 = scmp.lt.s32.totalorder %s2173_s28, %s2173_s28 }
  0x3d   :  { %p1935_p13 = scmp.ne.s32.totalorder %s2173_s28, %s1934_s18  ;;  %p1940_p1 = scmp.lt.s32.totalorder %s1934_s18, %s1934_s18 }
  0x3f   :  { %p1941_p2 = por %p1940_p1, %p1939_p0 }
  0x41   :  { %p1942_p3 = pnand %p1941_p2, %p1935_p13 }
  0x43   :  { %1945 = shalt.err (!%p1942_p3)
}
  0x44   :  { %35 = dma.hbm_to_vmem [thread:$0]  %s2501_s0, 128, %s2173_s28, [#allocation3], %s2046_s25, %s2046_s25, %s2047_s26  }
  0x45   :  { %s2050_s19 = smov [#allocation7]   ;;  %s2051_s21 = smov [#allocation10]  }
  0x46   :  { %s53_s20 = sshll.u32 %s2050_s19, 4  ;;  %s77_s3 = sshll.u32 %s2051_s21, 4  ;;  %s54_s20 = int_to_ptr.vmem [resolvable:$true] %s53_s20  ;;  %s2210_s3 = int_to_ptr.vmem [resolvable:$true] %s77_s3 }
  0x47   :  { %s1946_s1 = scalar_lea.hbm %s2503_s2, 256 }
  0x48   :  { %p1947_p4 = scmp.ne.s32.totalorder %s2503_s2, %s1946_s1  ;;  %p1950_p5 = scmp.lt.u32.totalorder %s1946_s1, %s2503_s2 }
  0x4a   :  { %p1952_p6 = pnand %p1950_p5, %p1947_p4 }
  0x4c   :  { %1955 = shalt.err (!%p1952_p6)
}
  0x4d   :  { %s1956_s0 = scalar_lea.vmem %s54_s20, 256  ;;  %p1961_p8 = scmp.lt.s32.totalorder %s54_s20, %s54_s20 }
  0x4e   :  { %p1957_p7 = scmp.ne.s32.totalorder %s54_s20, %s1956_s0  ;;  %p1962_p9 = scmp.lt.s32.totalorder %s1956_s0, %s1956_s0 }
  0x50   :  { %p1963_p10 = por %p1962_p9, %p1961_p8 }
  0x52   :  { %p1964_p11 = pnand %p1963_p10, %p1957_p7 }
  0x54   :  { %1967 = shalt.err (!%p1964_p11)
}
  0x55   :  { %59 = dma.hbm_to_vmem [thread:$0]  %s2503_s2, 256, %s54_s20, [#allocation6], %s2046_s25, %s2046_s25, %s2047_s26  }
  0x56   :  { %s1968_s6 = scalar_lea.hbm %s2505_s4, 256 }
  0x57   :  { %p1969_p12 = scmp.ne.s32.totalorder %s2505_s4, %s1968_s6  ;;  %p1972_p13 = scmp.lt.u32.totalorder %s1968_s6, %s2505_s4 }
  0x59   :  { %p1974_p0 = pnand %p1972_p13, %p1969_p12 }
  0x5b   :  { %1977 = shalt.err (!%p1974_p0)
}
  0x5c   :  { %s1978_s22 = scalar_lea.vmem %s2210_s3, 256  ;;  %p1983_p2 = scmp.lt.s32.totalorder %s2210_s3, %s2210_s3 }
  0x5d   :  { %p1979_p1 = scmp.ne.s32.totalorder %s2210_s3, %s1978_s22  ;;  %p1984_p3 = scmp.lt.s32.totalorder %s1978_s22, %s1978_s22 }
  0x5f   :  { %p1985_p4 = por %p1984_p3, %p1983_p2 }
  0x61   :  { %p1986_p5 = pnand %p1985_p4, %p1979_p1 }
  0x63   :  { %1989 = shalt.err (!%p1986_p5)
}
  0x64   :  { %83 = dma.hbm_to_vmem [thread:$0]  %s2505_s4, 256, %s2210_s3, [#allocation9], %s2046_s25, %s2046_s25, %s2047_s26  }
  0x65   :  { %s2052_s1 = smov [#allocation13]   ;;  %s1990_s29 = scalar_lea.hbm %s2510_s9, 16 }
  0x66   :  { %s108_s30 = sshll.u32 %s2052_s1, 4  ;;  %p1991_p6 = scmp.ne.s32.totalorder %s2510_s9, %s1990_s29  ;;  %s109_s30 = int_to_ptr.vmem [resolvable:$true] %s108_s30 }
  0x67   :  { %p1994_p7 = scmp.lt.u32.totalorder %s1990_s29, %s2510_s9 }
  0x69   :  { %p1996_p8 = pnand %p1994_p7, %p1991_p6 }
  0x6b   :  { %1999 = shalt.err (!%p1996_p8)
}
  0x6c   :  { %s2000_s18 = scalar_lea.vmem %s109_s30, 16  ;;  %s2004_s4 = scalar_lea.vmem %s109_s30, 32 }
  0x6d   :  { %p2001_p9 = scmp.ne.s32.totalorder %s109_s30, %s2000_s18  ;;  %p2005_p10 = scmp.lt.s32.totalorder %s109_s30, %s109_s30 }
  0x6e   :  { %p2006_p11 = scmp.lt.s32.totalorder %s2004_s4, %s2000_s18 }
  0x70   :  { %p2007_p12 = por %p2006_p11, %p2005_p10 }
  0x72   :  { %p2008_p13 = pnand %p2007_p12, %p2001_p9 }
  0x74   :  { %2011 = shalt.err (!%p2008_p13)
}
  0x75   :  { %111 = dma.hbm_to_vmem [thread:$0]  %s2510_s9, 16, %s109_s30, [#allocation12]  }
  0x76   :  { %2034 = dma.done.wait [#allocation3], 128  }
  0x77   :  { %2035 = vsyncadd [#allocation3], 4294967168 }
  0x78   :  { %2036 = dma.done.wait [#allocation6], 384  }
  0x79   :  { %2037 = vsyncadd [#allocation6], 4294966912 }
  0x7a   :  { %2038 = dma.done.wait [#allocation9], 512  }
  0x7b   :  { %2039 = vsyncadd [#allocation9], 4294966784 }
  0x7c   :  { %2040 = dma.done.wait [#allocation12], 272  }
  0x7d   :  { %2041 = vsyncadd [#allocation12], 4294967024  ;;  %v2053_v0 = vmov 0.0   ;;  %vm2054_vm0 = vmmov 0   ;;  %v1814_v1 = vld [vmem:[%s2506_s5] sm:$0xff]   ;;  %v1815_v2 = vld [vmem:[%s2506_s5 + $0x8] sm:$0xff]  }
  0x7e   :  { %1653 = vmatprep.subr.bf16.mxu0 %v2053_v0  ;;  %1657 = vmatprep.mubr.msk.bf16.mxu0 %vm2054_vm0, %v2053_v0  ;;  %v148_v3 = vld [vmem:[#allocation7] sm:$0xf]  ;;  %v149_v4 = vld [vmem:[#allocation7 + $0x4] sm:$0xf]  ;;  %v152_v5 = vld [vmem:[#allocation8] sm:$0xf] }
  0x7f   :  { %1661 = vmatprep.subr.bf16.mxu1 %v1814_v1  ;;  %v153_v6 = vld [vmem:[#allocation8 + $0x4] sm:$0xf]  ;;  %v156_v7 = vadd.bf16 %v152_v5, %v148_v3  ;;  %v150_v8 = vld [vmem:[#allocation7 + $0x8] sm:$0xf]  ;;  %v151_v9 = vld [vmem:[#allocation7 + $0xc] sm:$0xf]  ;;  %v1570_v27 = vcombine.low %v148_v3, %v149_v4 }
  0x80   :  { %1662 = vmatpush3.bf16.msra.mxu1 %v1814_v1  ;;  %v157_v10 = vadd.bf16 %v153_v6, %v149_v4  ;;  %v154_v11 = vld [vmem:[#allocation8 + $0x8] sm:$0xf]  ;;  %v155_v12 = vld [vmem:[#allocation8 + $0xc] sm:$0xf]  ;;  %vm188_vm1 = vcmask 261120   ;;  %v1818_v15 = vld [vmem:[#allocation10] sm:$0xff]   ;;  %v1571_v29 = vcombine.low %v150_v8, %v151_v9 }
  0x81   :  { %1663 = vmatprep.subr.bf16.mxu1 %v1815_v2  ;;  %v158_v13 = vadd.bf16 %v154_v11, %v150_v8  ;;  %v159_v14 = vadd.bf16 %v155_v12, %v151_v9  ;;  %v1819_v17 = vld [vmem:[#allocation10 + $0x8] sm:$0xff]   ;;  %v2268_v18 = vld [vmem:[#allocation2] sm:$0xf]  ;;  %1654 = vmatpush3.bf16.msra.mxu0 %v1818_v15  ;;  %v2270_v20 = vld [vmem:[#allocation2 + $0x4] sm:$0xf]  ;;  %vm415_vm2 = vcmask 64512  }
  0x82   :  { %v1563_v16 = vcombine.low %v156_v7, %v157_v10  ;;  %v144_v21 = vld [vmem:[#allocation5] sm:$0xf]  ;;  %v145_v22 = vld [vmem:[#allocation5 + $0x4] sm:$0xf]  ;;  %1655 = vmatprep.subr.bf16.mxu0 %v2053_v0  ;;  %v1820_v25 = vld [vmem:[#allocation11] sm:$0xff]   ;;  %vm508_vm3 = vcmask 130048  }
  0x83   :  { %v1564_v19 = vcombine.low %v158_v13, %v159_v14  ;;  %v146_v23 = vadd.bf16 %v144_v21, %v2268_v18  ;;  %v147_v24 = vadd.bf16 %v145_v22, %v2270_v20  ;;  %v1821_v28 = vld [vmem:[#allocation11 + $0x8] sm:$0xff]   ;;  %v1562_v31 = vld [vmem:[%s2509_s8] ss:$0 sm:$0xff]  ;;  %s2055_s8 = smov 120   ;;  %v1569_v50 = vld [vmem:[#allocation13] ss:$0 sm:$0xff] }
  0x84   :  { %1664 = vmatpush3.bf16.msra.mxu1 %v1815_v2  ;;  %1665 = vmatprep.mubr.msk.bf16.mxu1 %vm188_vm1, %v1563_v16  ;;  %v1557_v39 = vld [vmem:[%s2508_s7] ss:$0 sm:$0xff]  ;;  %s2056_s7 = smov 112   ;;  %vm849_vm4 = vcmask 1043456   ;;  %s2057_s30 = smov 104  }
  0x85   :  { %1677 = vmatprep.subr.bf16.mxu1 %v2053_v0  ;;  %v1558_v26 = vcombine.low %v146_v23, %v147_v24  ;;  %1656 = vmatpush3.bf16.msra.mxu0 %v1819_v17  ;;  %s2058_s4 = smov [#allocation14]  }
  0x86   :  { %1669 = vmatprep.subr.bf16.mxu0 %v1820_v25  ;;  %s1542_s25 = sshll.u32 %s2058_s4, 4  ;;  %s1543_s25 = int_to_ptr.vmem [resolvable:$true] %s1542_s25 }
  0x87   :  { %1666 = vmatmul.mubr.msk.bf16.vlgmr.msra.gmra.mrb[0].mxu1 %vm188_vm1, %v1564_v19  ;;  %s2012_s26 = scalar_lea.vmem %s1543_s25, 256  ;;  %p2017_p1 = scmp.lt.s32.totalorder %s1543_s25, %s1543_s25 }
  0x88   :  { %1679 = vmatprep.mubr.msk.bf16.mxu1 %vm2054_vm0, %v2053_v0  ;;  %1658 = vmatmul.mubr.msk.bf16.vlgmr.msra.gmra.mrb[0].mxu0 %vm188_vm1, %v1558_v26  ;;  %p2013_p0 = scmp.ne.s32.totalorder %s1543_s25, %s2012_s26  ;;  %p2018_p2 = scmp.lt.s32.totalorder %s2012_s26, %s2012_s26 }
  0x89   :  { %1670 = vmatpush3.bf16.msra.mxu0 %v1820_v25  ;;  %1673 = vmatprep.mubr.msk.bf16.mxu0 %vm188_vm1, %v1570_v27 }
  0x8a   :  { %1671 = vmatprep.subr.bf16.mxu0 %v1821_v28  ;;  %p2019_p3 = por %p2018_p2, %p2017_p1 }
  0x8c   :  { %p2020_p4 = pnand %p2019_p3, %p2013_p0 }
  0x8d   :  { %1672 = vmatpush3.bf16.msra.mxu0 %v1821_v28 }
  0x8e   :  { %1683 = vmatprep.subr.bf16.mxu0 %v2053_v0 }
  0x90   :  { %1674 = vmatmul.mubr.msk.bf16.vlgmr.msra.gmra.mrb[4].mxu0 %vm188_vm1, %v1571_v29 }
  0x91   :  { %1685 = vmatprep.mubr.msk.bf16.mxu0 %vm2054_vm0, %v2053_v0 }
 0x15a   :  { %v1667_v30 = vpop.f32.mrb[0].mxu1 }
 0x15b   :  { %v306_v32 = vpop.f32.mrb[1].mxu1  ;;  %v315_v34 = vadd.f32 %v1667_v30, %v1562_v31  ;;  %v226_v40 = vpop.f32.mrb[0].mxu0 }
 0x15c   :  { %v1668_v33 = vpop.f32.mrb[2].mxu1  ;;  %v307_v37 = vadd.f32 %v1562_v31, %v306_v32  ;;  %v1659_v42 = vpop.f32.mrb[1].mxu0  ;;  %v227_v48 = vadd.f32 %v1557_v39, %v226_v40 }
 0x15d   :  { %v318_v35 = vadd.f32 %v1668_v33, %v1562_v31  ;;  %v309_v36 = vpop.f32.mrb[3].mxu1  ;;  %v229_v44 = vpop.f32.mrb[2].mxu0 }
 0x15e   :  { %v310_v38 = vadd.f32 %v1562_v31, %v309_v36  ;;  %v230_v46 = vadd.f32 %v1557_v39, %v229_v44  ;;  %v1660_v47 = vpop.f32.mrb[3].mxu0  ;;  %v2306_v52 = vpack.c.bf16 %v227_v48, %v227_v48 }
 0x15f   :  { %v2292_v41 = vpack.c.bf16 %v318_v35, %v315_v34 }
 0x160   :  { %v2294_v43 = vpack.c.bf16 %v310_v38, %v307_v37  ;;  %v2304_v51 = vpack.c.bf16 %v230_v46, %v230_v46 }
 0x161   :  { %v466_v45 = vsel %vm415_vm2, %v2292_v41, 0 }
 0x162   :  { %625 = vrot.lane.b32.xlu1 %v2294_v43, %s2055_s8  ;;  %1684 = vmatpush3.bf16.xpose.msra.mxu0 %v466_v45  ;;  %v420_v49 = vsel %vm415_vm2, %v2294_v43, 0 }
 0x163   :  { %1678 = vmatpush3.bf16.xpose.msra.mxu1 %v420_v49  ;;  %1695 = vmatprep.subr.bf16.mxu0 %v2053_v0  ;;  %v1675_v53 = vpop.f32.mrb[4].mxu0 }
 0x164   :  { %1689 = vmatprep.subr.bf16.mxu1 %v2053_v0  ;;  %v403_v54 = vadd.f32 %v1675_v53, %v1569_v50  ;;  %v394_v55 = vpop.f32.mrb[5].mxu0 }
 0x165   :  { %v395_v56 = vadd.f32 %v1569_v50, %v394_v55  ;;  %v1676_v57 = vpop.f32.mrb[6].mxu0 }
 0x166   :  { %677 = vrot.lane.b32.xlu1 %v2292_v41, %s2055_s8  ;;  %v406_v58 = vadd.f32 %v1676_v57, %v1569_v50  ;;  %v397_v59 = vpop.f32.mrb[7].mxu0 }
 0x167   :  { %v398_v60 = vadd.f32 %v1569_v50, %v397_v59 }
 0x168   :  { %v2316_v61 = vpack.c.bf16 %v406_v58, %v403_v54 }
 0x169   :  { %1686 = vmatmul.mubr.msk.bf16.vlgmr.msra.gmra.mrb[8].mxu0 %vm415_vm2, %v2304_v51  ;;  %v2322_v62 = vpack.c.bf16 %v398_v60, %v395_v56 }
 0x16a   :  { %1680 = vmatmul.mubr.msk.bf16.vlgmr.msra.gmra.mrb[4].mxu1 %vm415_vm2, %v2306_v52  ;;  %674 = vrot.lane.b32.xlu1 %v2304_v51, %s2055_s8 }
 0x16b   :  { %1691 = vmatprep.mubr.msk.bf16.mxu1 %vm2054_vm0, %v2053_v0  ;;  %1697 = vmatprep.mubr.msk.bf16.mxu0 %vm2054_vm0, %v2053_v0 }
 0x16c   :  { %1696 = vmatpush3.bf16.msra.mxu0 %v2316_v61  ;;  %1690 = vmatpush3.bf16.msra.mxu1 %v2322_v62 }
 0x16d   :  { %1707 = vmatprep.subr.bf16.mxu0 %v2053_v0  ;;  %1701 = vmatprep.subr.bf16.mxu1 %v2053_v0 }
 0x1d4   :  { %v626_v16 = vpop.permute.xlu1 %625 }
 0x1d5   :  { %v631_v21 = vsel %vm415_vm2, %v626_v16, 0  ;;  %v1584_v16 = vld [vmem:[%s2511_s10 + $0x4] sm:$0xf] }
 0x1d8   :  { %v678_v23 = vpop.permute.xlu1 %677 }
 0x1d9   :  { %v683_v25 = vsel %vm415_vm2, %v678_v23, 0 }
 0x1dc   :  { %v675_v27 = vpop.permute.xlu1 %674 }
 0x23c   :  { %v502_v63 = vpop.f32.mrb[8].mxu0 }
 0x23d   :  { %v456_v1 = vpop.f32.mrb[4].mxu1  ;;  %v1687_v2 = vpop.f32.mrb[9].mxu0  ;;  %v512_v9 = vsel %vm508_vm3, %v502_v63, -inf }
 0x23e   :  { %v1681_v3 = vpop.f32.mrb[5].mxu1  ;;  %v505_v4 = vpop.f32.mrb[10].mxu0  ;;  %v509_v5 = vsel %vm508_vm3, %v456_v1, -inf }
 0x23f   :  { %510 = vmax.xlane.f32.xlu0 %v509_v5  ;;  %v459_v6 = vpop.f32.mrb[6].mxu1  ;;  %v1688_v7 = vpop.f32.mrb[11].mxu0 }
 0x240   :  { %v1682_v8 = vpop.f32.mrb[7].mxu1 }
 0x243   :  { %513 = vmax.xlane.f32.xlu0 %v512_v9 }
 0x259   :  { %622 = vrot.lane.b32.xlu0 %v2306_v52, %s2055_s8 }
 0x2cc   :  { %v511_v10 = vpop.xlane.xlu0 %510 }
 0x2cd   :  { %v515_v11 = vsub.f32 %v456_v1, %v511_v10  ;;  %v620_v1 = vld [vmem:[%s2511_s10] sm:$0xf] }
 0x2ce   :  { %v898_v5 = vsel %vm849_vm4, %v620_v1, 0 }
 0x2cf   :  { %v517_v12 = vmul.f32 1.442695, %v515_v11 }
 0x2d0   :  { %v514_v13 = vpop.xlane.xlu0 %513 }
 0x2d1   :  { %1822 = vpow2.f32 %v517_v12  ;;  %v516_v14 = vsub.f32 %v502_v63, %v514_v13 }
 0x2d3   :  { %v519_v15 = vmul.f32 1.442695, %v516_v14 }
 0x2d4   :  { %v623_v26 = vpop.permute.xlu0 %622 }
 0x2d5   :  { %1824 = vpow2.f32 %v519_v15 }
 0x2db   :  { %v1823_v17 = vpop.eup %1822 }
 0x2dc   :  { %v527_v19 = vpack.c.bf16 %v1823_v17, %v1823_v17  ;;  %v521_v48 = vsel %vm508_vm3, %v1823_v17, 0.0  ;;  %v851_v17 = vsel %vm849_vm4, %v1584_v16, 0 }
 0x2de   :  { %1692 = vmatmul.mubr.msk.bf16.vlgmr.msra.gmra.mrb[8].mxu1 %vm508_vm3, %v527_v19 }
 0x2df   :  { %v1825_v22 = vpop.eup %1824  ;;  %1702 = vmatpush3.bf16.xpose.msra.mxu1 %v631_v21  ;;  %1703 = vmatprep.mubr.msk.bf16.mxu1 %vm2054_vm0, %v2053_v0 }
 0x2e0   :  { %v528_v24 = vpack.c.bf16 %v1825_v22, %v1825_v22  ;;  %1713 = vmatprep.subr.bf16.mxu1 %v2053_v0  ;;  %v524_v49 = vsel %vm508_vm3, %v1825_v22, 0.0 }
 0x2e2   :  { %1698 = vmatmul.mubr.msk.bf16.vlgmr.msra.gmra.mrb[12].mxu0 %vm508_vm3, %v528_v24 }
 0x2e3   :  { %1708 = vmatpush3.bf16.xpose.msra.mxu0 %v683_v25  ;;  %1709 = vmatprep.mubr.msk.bf16.mxu0 %vm2054_vm0, %v2053_v0 }
 0x2e4   :  { %1719 = vmatprep.subr.bf16.mxu0 %v2053_v0 }
 0x2e6   :  { %1704 = vmatmul.mubr.msk.bf16.vlgmr.msra.gmra.mrb[12].mxu1 %vm415_vm2, %v623_v26 }
 0x2e7   :  { %1715 = vmatprep.mubr.msk.bf16.mxu1 %vm2054_vm0, %v2053_v0 }
 0x2ea   :  { %1710 = vmatmul.mubr.msk.bf16.vlgmr.msra.gmra.mrb[16].mxu0 %vm415_vm2, %v675_v27 }
 0x2eb   :  { %1721 = vmatprep.mubr.msk.bf16.mxu0 %vm2054_vm0, %v2053_v0 }
 0x3b1   :  { %v2348_v28 = vpop.f32.mrb[8].mxu1 }
 0x3b2   :  { %v1693_v29 = vpop.f32.mrb[9].mxu1 }
 0x3b3   :  { %v569_v30 = vpop.f32.mrb[10].mxu1 }
 0x3b4   :  { %v1694_v31 = vpop.f32.mrb[11].mxu1 }
 0x3b5   :  { %v2350_v32 = vpop.f32.mrb[12].mxu0 }
 0x3b6   :  { %v1699_v33 = vpop.f32.mrb[13].mxu0 }
 0x3b7   :  { %v612_v34 = vpop.f32.mrb[14].mxu0 }
 0x3b8   :  { %v1700_v35 = vpop.f32.mrb[15].mxu0 }
 0x3b9   :  { %v667_v36 = vpop.f32.mrb[12].mxu1 }
 0x3ba   :  { %v1705_v37 = vpop.f32.mrb[13].mxu1  ;;  %v725_v38 = vsel %vm508_vm3, %v667_v36, -inf }
 0x3bb   :  { %726 = vmax.xlane.f32.xlu1 %v725_v38  ;;  %v670_v39 = vpop.f32.mrb[14].mxu1 }
 0x3bc   :  { %v1706_v40 = vpop.f32.mrb[15].mxu1 }
 0x3bd   :  { %v719_v42 = vpop.f32.mrb[16].mxu0 }
 0x3be   :  { %v1711_v44 = vpop.f32.mrb[17].mxu0  ;;  %v728_v45 = vsel %vm508_vm3, %v719_v42, -inf }
 0x3bf   :  { %729 = vmax.xlane.f32.xlu0 %v728_v45  ;;  %v722_v46 = vpop.f32.mrb[18].mxu0 }
 0x3c0   :  { %v1712_v47 = vpop.f32.mrb[19].mxu0 }
 0x3cc   :  { %746 = vrot.lane.b32.xlu1 %v2322_v62, %s2055_s8 }
 0x3d5   :  { %793 = vrot.lane.b32.xlu0 %v2316_v61, %s2055_s8 }
 0x3f0   :  { %522 = vadd.xlane.f32.xlu1 %v521_v48 }
 0x3f4   :  { %525 = vadd.xlane.f32.xlu0 %v524_v49 }
 0x401   :  { %943 = vrot.lane.b32.xlu1 %v2294_v43, %s2056_s7 }
 0x40a   :  { %993 = vrot.lane.b32.xlu0 %v2292_v41, %s2056_s7 }
 0x448   :  { %v727_v50 = vpop.xlane.xlu1 %726 }
 0x449   :  { %v731_v53 = vsub.f32 %v667_v36, %v727_v50 }
 0x44b   :  { %v733_v54 = vmul.f32 1.442695, %v731_v53 }
 0x44c   :  { %v730_v55 = vpop.xlane.xlu0 %729  ;;  %v747_v56 = vpop.permute.xlu1 %746 }
 0x44d   :  { %1826 = vpow2.f32 %v733_v54  ;;  %v732_v57 = vsub.f32 %v719_v42, %v730_v55  ;;  %1714 = vmatpush3.bf16.msra.mxu1 %v747_v56 }
 0x44e   :  { %1725 = vmatprep.subr.bf16.mxu1 %v2053_v0 }
 0x44f   :  { %v735_v58 = vmul.f32 1.442695, %v732_v57 }
 0x450   :  { %v794_v59 = vpop.permute.xlu0 %793 }
 0x451   :  { %1828 = vpow2.f32 %v735_v58  ;;  %1720 = vmatpush3.bf16.msra.mxu0 %v794_v59 }
 0x452   :  { %1731 = vmatprep.subr.bf16.mxu0 %v2053_v0 }
 0x457   :  { %v1827_v60 = vpop.eup %1826 }
 0x458   :  { %v743_v63 = vpack.c.bf16 %v1827_v60, %v1827_v60  ;;  %v737_v6 = vsel %vm508_vm3, %v1827_v60, 0.0 }
 0x45a   :  { %1716 = vmatmul.mubr.msk.bf16.vlgmr.msra.gmra.mrb[16].mxu1 %vm508_vm3, %v743_v63 }
 0x45b   :  { %v1829_v2 = vpop.eup %1828  ;;  %1727 = vmatprep.mubr.msk.bf16.mxu1 %vm2054_vm0, %v2053_v0  ;;  %1726 = vmatpush3.bf16.msra.mxu1 %v851_v17  ;;  %v1591_v17 = vld [vmem:[%s2511_s10 + $0x8] sm:$0xf] }
 0x45c   :  { %v740_v3 = vsel %vm508_vm3, %v1829_v2, 0.0  ;;  %v744_v4 = vpack.c.bf16 %v1829_v2, %v1829_v2  ;;  %1737 = vmatprep.subr.bf16.mxu1 %v2053_v0 }
 0x45d   :  { %741 = vadd.xlane.f32.xlu1 %v740_v3 }
 0x45e   :  { %1722 = vmatmul.mubr.msk.bf16.vlgmr.msra.gmra.mrb[20].mxu0 %vm508_vm3, %v744_v4 }
 0x45f   :  { %1732 = vmatpush3.bf16.msra.mxu0 %v898_v5  ;;  %1733 = vmatprep.mubr.msk.bf16.mxu0 %vm2054_vm0, %v2053_v0 }
 0x460   :  { %1743 = vmatprep.subr.bf16.mxu0 %v2053_v0 }
 0x461   :  { %738 = vadd.xlane.f32.xlu1 %v737_v6 }
 0x472   :  { %941 = vrot.lane.b32.xlu1 %v2306_v52, %s2056_s7 }
 0x476   :  { %991 = vrot.lane.b32.xlu1 %v2304_v51, %s2056_s7 }
 0x47d   :  { %v523_v7 = vpop.xlane.xlu1 %522 }
 0x47e   :  { %1830 = vrcp.f32 %v523_v7 }
 0x481   :  { %v526_v8 = vpop.xlane.xlu0 %525  ;;  %v944_v19 = vpop.permute.xlu1 %943 }
 0x482   :  { %1832 = vrcp.f32 %v526_v8  ;;  %v949_v38 = vsel %vm415_vm2, %v944_v19, 0  ;;  %v1164_v19 = vsel %vm849_vm4, %v1591_v17, 0 }
 0x485   :  { %v994_v13 = vpop.permute.xlu0 %993 }
 0x486   :  { %v999_v15 = vsel %vm415_vm2, %v994_v13, 0 }
 0x488   :  { %v1831_v9 = vpop.eup %1830 }
 0x489   :  { %v617_v11 = vmul.f32 %v1831_v9, %v2348_v28 }
 0x48c   :  { %v1833_v10 = vpop.eup %1832 }
 0x48d   :  { %v618_v12 = vmul.f32 %v1833_v10, %v2350_v32 }
 0x48f   :  { %v619_v14 = vpack.c.bf16 %v618_v12, %v617_v11 }
 0x491   :  { %1734 = vmatmul.mubr.msk.bf16.vlgmr.msra.gmra.mrb[24].mxu0 %vm415_vm2, %v619_v14 }
 0x492   :  { %1744 = vmatpush3.bf16.xpose.msra.mxu0 %v999_v15  ;;  %1745 = vmatprep.mubr.msk.bf16.mxu0 %vm2054_vm0, %v2053_v0 }
 0x493   :  { %1755 = vmatprep.subr.bf16.mxu0 %v2053_v0 }
 0x4ea   :  { %v742_v21 = vpop.xlane.xlu1 %741 }
 0x4eb   :  { %1834 = vrcp.f32 %v742_v21 }
 0x4ee   :  { %v739_v22 = vpop.xlane.xlu1 %738 }
 0x4ef   :  { %1836 = vrcp.f32 %v739_v22 }
 0x4f2   :  { %v942_v23 = vpop.permute.xlu1 %941 }
 0x4f5   :  { %v1835_v28 = vpop.eup %1834 }
 0x4f6   :  { %v992_v24 = vpop.permute.xlu1 %991 }
 0x4f7   :  { %1746 = vmatmul.mubr.msk.bf16.vlgmr.msra.gmra.mrb[28].mxu0 %vm415_vm2, %v992_v24 }
 0x4f8   :  { %1757 = vmatprep.mubr.msk.bf16.mxu0 %vm2054_vm0, %v2053_v0 }
 0x4f9   :  { %v1837_v30 = vpop.eup %1836 }
 0x52d   :  { %v786_v25 = vpop.f32.mrb[16].mxu1 }
 0x52e   :  { %v1717_v26 = vpop.f32.mrb[17].mxu1  ;;  %v841_v32 = vmul.f32 %v1837_v30, %v786_v25 }
 0x52f   :  { %v789_v27 = vpop.f32.mrb[18].mxu1 }
 0x530   :  { %v1718_v29 = vpop.f32.mrb[19].mxu1 }
 0x531   :  { %v833_v31 = vpop.f32.mrb[20].mxu0 }
 0x532   :  { %v842_v33 = vmul.f32 %v1835_v28, %v833_v31  ;;  %v1723_v34 = vpop.f32.mrb[21].mxu0 }
 0x533   :  { %v836_v35 = vpop.f32.mrb[22].mxu0 }
 0x534   :  { %v843_v36 = vpack.c.bf16 %v842_v33, %v841_v32  ;;  %v1724_v37 = vpop.f32.mrb[23].mxu0 }
 0x536   :  { %1728 = vmatmul.mubr.msk.bf16.vlgmr.msra.gmra.mrb[20].mxu1 %vm415_vm2, %v843_v36 }
 0x537   :  { %1738 = vmatpush3.bf16.xpose.msra.mxu1 %v949_v38  ;;  %1739 = vmatprep.mubr.msk.bf16.mxu1 %vm2054_vm0, %v2053_v0 }
 0x538   :  { %1749 = vmatprep.subr.bf16.mxu1 %v2053_v0 }
 0x53e   :  { %1740 = vmatmul.mubr.msk.bf16.vlgmr.msra.gmra.mrb[24].mxu1 %vm415_vm2, %v942_v23 }
 0x53f   :  { %1751 = vmatprep.mubr.msk.bf16.mxu1 %vm2054_vm0, %v2053_v0 }
 0x564   :  { %v934_v39 = vpop.f32.mrb[24].mxu0 }
 0x565   :  { %v1735_v40 = vpop.f32.mrb[25].mxu0 }
 0x566   :  { %v937_v42 = vpop.f32.mrb[26].mxu0 }
 0x567   :  { %v1736_v44 = vpop.f32.mrb[27].mxu0 }
 0x5ca   :  { %v1035_v45 = vpop.f32.mrb[28].mxu0 }
 0x5cb   :  { %v1747_v46 = vpop.f32.mrb[29].mxu0  ;;  %v1044_v47 = vsel %vm508_vm3, %v1035_v45, -inf }
 0x5cc   :  { %1045 = vmax.xlane.f32.xlu0 %v1044_v47  ;;  %v1038_v48 = vpop.f32.mrb[30].mxu0 }
 0x5cd   :  { %v1748_v49 = vpop.f32.mrb[31].mxu0 }
 0x5e2   :  { %1061 = vrot.lane.b32.xlu0 %v2322_v62, %s2056_s7 }
 0x609   :  { %v887_v50 = vpop.f32.mrb[20].mxu1 }
 0x60a   :  { %v2409_v53 = vadd.f32 %v934_v39, %v887_v50  ;;  %v1729_v54 = vpop.f32.mrb[21].mxu1 }
 0x60b   :  { %v890_v55 = vpop.f32.mrb[22].mxu1 }
 0x60c   :  { %v2411_v56 = vadd.f32 %v937_v42, %v890_v55  ;;  %v1730_v57 = vpop.f32.mrb[23].mxu1 }
 0x611   :  { %v985_v58 = vpop.f32.mrb[24].mxu1 }
 0x612   :  { %v1741_v59 = vpop.f32.mrb[25].mxu1  ;;  %v1041_v60 = vsel %vm508_vm3, %v985_v58, -inf }
 0x613   :  { %1042 = vmax.xlane.f32.xlu1 %v1041_v60  ;;  %v988_v63 = vpop.f32.mrb[26].mxu1 }
 0x614   :  { %v1742_v1 = vpop.f32.mrb[27].mxu1 }
 0x624   :  { %1107 = vrot.lane.b32.xlu1 %v2316_v61, %s2056_s7 }
 0x659   :  { %v1046_v2 = vpop.xlane.xlu0 %1045 }
 0x65a   :  { %v1048_v3 = vsub.f32 %v1035_v45, %v1046_v2 }
 0x65c   :  { %v1051_v4 = vmul.f32 1.442695, %v1048_v3 }
 0x65d   :  { %v1062_v5 = vpop.permute.xlu0 %1061 }
 0x65e   :  { %1838 = vpow2.f32 %v1051_v4  ;;  %1750 = vmatpush3.bf16.msra.mxu1 %v1062_v5 }
 0x65f   :  { %1761 = vmatprep.subr.bf16.mxu1 %v2053_v0 }
 0x668   :  { %v1839_v6 = vpop.eup %1838 }
 0x669   :  { %v1056_v7 = vsel %vm508_vm3, %v1839_v6, 0.0  ;;  %v1060_v12 = vpack.c.bf16 %v1839_v6, %v1839_v6 }
 0x66a   :  { %1057 = vadd.xlane.f32.xlu0 %v1056_v7 }
 0x680   :  { %1211 = vrot.lane.b32.xlu0 %v2294_v43, %s2057_s30 }
 0x684   :  { %1259 = vrot.lane.b32.xlu0 %v2304_v51, %s2057_s30 }
 0x6a0   :  { %v1043_v8 = vpop.xlane.xlu1 %1042 }
 0x6a1   :  { %v1047_v9 = vsub.f32 %v985_v58, %v1043_v8  ;;  %v1597_v8 = vld [vmem:[%s2511_s10 + $0xc] sm:$0xf] }
 0x6a3   :  { %v1049_v10 = vmul.f32 1.442695, %v1047_v9  ;;  %v1432_v9 = vsel %vm849_vm4, %v1597_v8, 0 }
 0x6a4   :  { %v1108_v11 = vpop.permute.xlu1 %1107 }
 0x6a5   :  { %1840 = vpow2.f32 %v1049_v10  ;;  %1756 = vmatpush3.bf16.msra.mxu0 %v1108_v11 }
 0x6a6   :  { %1767 = vmatprep.subr.bf16.mxu0 %v2053_v0 }
 0x6a8   :  { %1758 = vmatmul.mubr.msk.bf16.vlgmr.msra.gmra.mrb[32].mxu0 %vm508_vm3, %v1060_v12 }
 0x6a9   :  { %1769 = vmatprep.mubr.msk.bf16.mxu0 %vm2054_vm0, %v2053_v0 }
 0x6af   :  { %v1841_v13 = vpop.eup %1840 }
 0x6b0   :  { %v1053_v43 = vsel %vm508_vm3, %v1841_v13, 0.0  ;;  %v1059_v14 = vpack.c.bf16 %v1841_v13, %v1841_v13 }
 0x6b1   :  { %1054 = vadd.xlane.f32.xlu1 %v1053_v43 }
 0x6b2   :  { %1752 = vmatmul.mubr.msk.bf16.vlgmr.msra.gmra.mrb[28].mxu1 %vm508_vm3, %v1059_v14 }
 0x6b3   :  { %1763 = vmatprep.mubr.msk.bf16.mxu1 %vm2054_vm0, %v2053_v0  ;;  %1762 = vmatpush3.bf16.msra.mxu1 %v1164_v19 }
 0x6b4   :  { %1773 = vmatprep.subr.bf16.mxu1 %v2053_v0 }
 0x6c2   :  { %1261 = vrot.lane.b32.xlu1 %v2292_v41, %s2057_s30 }
 0x6c6   :  { %1209 = vrot.lane.b32.xlu1 %v2306_v52, %s2057_s30 }
 0x6f7   :  { %v1058_v51 = vpop.xlane.xlu0 %1057 }
 0x6f8   :  { %1842 = vrcp.f32 %v1058_v51 }
 0x6fb   :  { %v1212_v15 = vpop.permute.xlu0 %1211 }
 0x6fc   :  { %v1217_v16 = vsel %vm415_vm2, %v1212_v15, 0 }
 0x6fd   :  { %1768 = vmatpush3.bf16.xpose.msra.mxu0 %v1217_v16 }
 0x6fe   :  { %1779 = vmatprep.subr.bf16.mxu0 %v2053_v0 }
 0x6ff   :  { %v1260_v36 = vpop.permute.xlu0 %1259 }
 0x702   :  { %v1843_v52 = vpop.eup %1842 }
 0x73e   :  { %v1055_v41 = vpop.xlane.xlu1 %1054 }
 0x73f   :  { %1844 = vrcp.f32 %v1055_v41 }
 0x742   :  { %v1262_v21 = vpop.permute.xlu1 %1261 }
 0x743   :  { %v1267_v35 = vsel %vm415_vm2, %v1262_v21, 0 }
 0x746   :  { %v1210_v22 = vpop.permute.xlu1 %1209 }
 0x747   :  { %1770 = vmatmul.mubr.msk.bf16.vlgmr.msra.gmra.mrb[36].mxu0 %vm415_vm2, %v1210_v22 }
 0x748   :  { %1781 = vmatprep.mubr.msk.bf16.mxu0 %vm2054_vm0, %v2053_v0 }
 0x749   :  { %v1845_v28 = vpop.eup %1844 }
 0x77b   :  { %v1147_v23 = vpop.f32.mrb[32].mxu0 }
 0x77c   :  { %v1156_v24 = vmul.f32 %v1843_v52, %v1147_v23  ;;  %v1759_v25 = vpop.f32.mrb[33].mxu0  ;;  %v1599_v23 = vld [vmem:[%s2512_s11] ss:$0 sm:$0xff] }
 0x77d   :  { %v1150_v26 = vpop.f32.mrb[34].mxu0 }
 0x77e   :  { %v1760_v27 = vpop.f32.mrb[35].mxu0  ;;  %v1486_v26 = vunpack.c.l.bf16 %v2268_v18 }
 0x785   :  { %v1101_v29 = vpop.f32.mrb[28].mxu1 }
 0x786   :  { %v1155_v30 = vmul.f32 %v1845_v28, %v1101_v29  ;;  %v1753_v31 = vpop.f32.mrb[29].mxu1 }
 0x787   :  { %v1104_v32 = vpop.f32.mrb[30].mxu1  ;;  %v1487_v31 = vunpack.c.l.bf16 %v2270_v20 }
 0x788   :  { %v1157_v33 = vpack.c.bf16 %v1156_v24, %v1155_v30  ;;  %v1754_v34 = vpop.f32.mrb[31].mxu1 }
 0x78a   :  { %1764 = vmatmul.mubr.msk.bf16.vlgmr.msra.gmra.mrb[32].mxu1 %vm415_vm2, %v1157_v33 }
 0x78b   :  { %1774 = vmatpush3.bf16.xpose.msra.mxu1 %v1267_v35  ;;  %1775 = vmatprep.mubr.msk.bf16.mxu1 %vm2054_vm0, %v2053_v0 }
 0x78c   :  { %1785 = vmatprep.subr.bf16.mxu1 %v2053_v0 }
 0x792   :  { %1776 = vmatmul.mubr.msk.bf16.vlgmr.msra.gmra.mrb[36].mxu1 %vm415_vm2, %v1260_v36 }
 0x793   :  { %1787 = vmatprep.mubr.msk.bf16.mxu1 %vm2054_vm0, %v2053_v0 }
 0x81a   :  { %v1253_v37 = vpop.f32.mrb[36].mxu0 }
 0x81b   :  { %v1771_v38 = vpop.f32.mrb[37].mxu0  ;;  %v1309_v39 = vsel %vm508_vm3, %v1253_v37, -inf }
 0x81c   :  { %1310 = vmax.xlane.f32.xlu1 %v1309_v39  ;;  %v1256_v40 = vpop.f32.mrb[38].mxu0 }
 0x81d   :  { %v1772_v42 = vpop.f32.mrb[39].mxu0 }
 0x82d   :  { %1375 = vrot.lane.b32.xlu1 %v2316_v61, %s2057_s30 }
 0x85d   :  { %v1200_v44 = vpop.f32.mrb[32].mxu1 }
 0x85e   :  { %v1207_v45 = vadd.f32 %v1200_v44, %v2409_v53  ;;  %v1765_v46 = vpop.f32.mrb[33].mxu1 }
 0x85f   :  { %v1203_v47 = vpop.f32.mrb[34].mxu1 }
 0x860   :  { %v1208_v48 = vadd.f32 %v1203_v47, %v2411_v56  ;;  %v1766_v49 = vpop.f32.mrb[35].mxu1 }
 0x865   :  { %v1303_v50 = vpop.f32.mrb[36].mxu1 }
 0x866   :  { %v1777_v54 = vpop.f32.mrb[37].mxu1  ;;  %v1312_v55 = vsel %vm508_vm3, %v1303_v50, -inf }
 0x867   :  { %1313 = vmax.xlane.f32.xlu0 %v1312_v55  ;;  %v1306_v57 = vpop.f32.mrb[38].mxu1 }
 0x868   :  { %v1778_v58 = vpop.f32.mrb[39].mxu1 }
 0x869   :  { %v1600_v58 = vld [vmem:[%s2513_s12] ss:$0 sm:$0xff] }
 0x87d   :  { %1329 = vrot.lane.b32.xlu0 %v2322_v62, %s2057_s30 }
 0x8a9   :  { %v1311_v59 = vpop.xlane.xlu1 %1310 }
 0x8aa   :  { %v1315_v61 = vsub.f32 %v1253_v37, %v1311_v59 }
 0x8ac   :  { %v1317_v60 = vmul.f32 1.442695, %v1315_v61 }
 0x8ad   :  { %v1376_v63 = vpop.permute.xlu1 %1375 }
 0x8ae   :  { %1846 = vpow2.f32 %v1317_v60  ;;  %1786 = vmatpush3.bf16.msra.mxu1 %v1376_v63  ;;  %v1601_v60 = vld [vmem:[%s2514_s13] ss:$0 sm:$0xff] }
 0x8b8   :  { %v1847_v53 = vpop.eup %1846 }
 0x8b9   :  { %v1321_v56 = vsel %vm508_vm3, %v1847_v53, 0.0  ;;  %v1327_v5 = vpack.c.bf16 %v1847_v53, %v1847_v53 }
 0x8ba   :  { %1322 = vadd.xlane.f32.xlu1 %v1321_v56 }
 0x8f4   :  { %v1314_v1 = vpop.xlane.xlu0 %1313 }
 0x8f5   :  { %v1316_v2 = vsub.f32 %v1303_v50, %v1314_v1 }
 0x8f7   :  { %v1319_v3 = vmul.f32 1.442695, %v1316_v2 }
 0x8f8   :  { %v1330_v4 = vpop.permute.xlu0 %1329 }
 0x8f9   :  { %1848 = vpow2.f32 %v1319_v3  ;;  %1780 = vmatpush3.bf16.msra.mxu0 %v1330_v4 }
 0x8fa   :  { %1791 = vmatprep.subr.bf16.mxu0 %v2053_v0 }
 0x8fc   :  { %1782 = vmatmul.mubr.msk.bf16.vlgmr.msra.gmra.mrb[40].mxu0 %vm508_vm3, %v1327_v5 }
 0x8fd   :  { %1793 = vmatprep.mubr.msk.bf16.mxu0 %vm2054_vm0, %v2053_v0  ;;  %1792 = vmatpush3.bf16.msra.mxu0 %v1432_v9 }
 0x903   :  { %v1849_v62 = vpop.eup %1848 }
 0x904   :  { %v1324_v6 = vsel %vm508_vm3, %v1849_v62, 0.0  ;;  %v1328_v7 = vpack.c.bf16 %v1849_v62, %v1849_v62 }
 0x905   :  { %1325 = vadd.xlane.f32.xlu0 %v1324_v6 }
 0x906   :  { %1788 = vmatmul.mubr.msk.bf16.vlgmr.msra.gmra.mrb[40].mxu1 %vm508_vm3, %v1328_v7 }
 0x947   :  { %v1323_v10 = vpop.xlane.xlu1 %1322 }
 0x948   :  { %1850 = vrcp.f32 %v1323_v10 }
 0x952   :  { %v1851_v14 = vpop.eup %1850 }
 0x992   :  { %v1326_v11 = vpop.xlane.xlu0 %1325 }
 0x993   :  { %1852 = vrcp.f32 %v1326_v11 }
 0x99d   :  { %v1853_v51 = vpop.eup %1852 }
 0x9cf   :  { %v1369_v12 = vpop.f32.mrb[40].mxu0 }
 0x9d0   :  { %v1783_v0 = vpop.f32.mrb[41].mxu0  ;;  %v1423_v16 = vmul.f32 %v1851_v14, %v1369_v12 }
 0x9d1   :  { %v1372_v13 = vpop.f32.mrb[42].mxu0 }
 0x9d2   :  { %v1784_v43 = vpop.f32.mrb[43].mxu0 }
 0x9d9   :  { %v1415_v15 = vpop.f32.mrb[40].mxu1 }
 0x9da   :  { %v1424_v17 = vmul.f32 %v1853_v51, %v1415_v15  ;;  %v1789_v19 = vpop.f32.mrb[41].mxu1 }
 0x9db   :  { %v1418_v41 = vpop.f32.mrb[42].mxu1 }
 0x9dc   :  { %v1425_v21 = vpack.c.bf16 %v1424_v17, %v1423_v16  ;;  %v1790_v22 = vpop.f32.mrb[43].mxu1 }
 0x9de   :  { %1794 = vmatmul.mubr.msk.bf16.vlgmr.msra.gmra.mrb[44].mxu0 %vm415_vm2, %v1425_v21 }
 0xab1   :  { %v1468_v52 = vpop.f32.mrb[44].mxu0 }
 0xab2   :  { %v1475_v24 = vadd.f32 %v1468_v52, %v1207_v45  ;;  %v1795_v25 = vpop.f32.mrb[45].mxu0 }
 0xab3   :  { %v1471_v27 = vpop.f32.mrb[46].mxu0 }
 0xab4   :  { %v1484_v28 = vadd.f32 %v1599_v23, %v1475_v24  ;;  %v1476_v29 = vadd.f32 %v1471_v27, %v1208_v48  ;;  %v1796_v30 = vpop.f32.mrb[47].mxu0 }
 0xab6   :  { %v1485_v32 = vadd.f32 %v1599_v23, %v1476_v29  ;;  %v1488_v33 = vadd.f32 %v1486_v26, %v1484_v28 }
 0xab8   :  { %v1490_v34 = vsel %vm188_vm1, %v1488_v33, 0.0  ;;  %v1489_v35 = vadd.f32 %v1487_v31, %v1485_v32 }
 0xab9   :  { %1491 = vadd.xlane.f32.xlu0 %v1490_v34 }
 0xaba   :  { %v1493_v36 = vsel %vm188_vm1, %v1489_v35, 0.0 }
 0xabb   :  { %1494 = vadd.xlane.f32.xlu1 %v1493_v36 }
 0xb46   :  { %v1492_v37 = vpop.xlane.xlu0 %1491 }
 0xb47   :  { %v1497_v38 = vmul.f32 0.03125, %v1492_v37 }
 0xb48   :  { %v1495_v39 = vpop.xlane.xlu1 %1494 }
 0xb49   :  { %v1499_v40 = vsub.f32 %v1488_v33, %v1497_v38  ;;  %v1498_v18 = vmul.f32 0.03125, %v1495_v39 }
 0xb4b   :  { %v1500_v42 = vsub.f32 %v1489_v35, %v1498_v18  ;;  %v1501_v44 = vmul.f32 %v1499_v40, %v1499_v40 }
 0xb4d   :  { %v1503_v45 = vsel %vm188_vm1, %v1501_v44, 0.0  ;;  %v1502_v46 = vmul.f32 %v1500_v42, %v1500_v42 }
 0xb4e   :  { %1504 = vadd.xlane.f32.xlu0 %v1503_v45 }
 0xb4f   :  { %v1506_v20 = vsel %vm188_vm1, %v1502_v46, 0.0 }
 0xb50   :  { %1507 = vadd.xlane.f32.xlu1 %v1506_v20 }
 0xbdb   :  { %v1505_v47 = vpop.xlane.xlu0 %1504 }
 0xbdc   :  { %v1509_v48 = vmul.f32 0.03125, %v1505_v47 }
 0xbdd   :  { %v1508_v49 = vpop.xlane.xlu1 %1507 }
 0xbde   :  { %v1511_v50 = vadd.f32 1e-05, %v1509_v48  ;;  %v1510_v54 = vmul.f32 0.03125, %v1508_v49 }
 0xbe0   :  { %1854 = vrsqrt.f32 %v1511_v50  ;;  %v1512_v55 = vadd.f32 1e-05, %v1510_v54 }
 0xbe2   :  { %1856 = vrsqrt.f32 %v1512_v55 }
 0xbea   :  { %v1855_v57 = vpop.eup %1854 }
 0xbeb   :  { %v1515_v59 = vmul.f32 %v1855_v57, %v1499_v40 }
 0xbec   :  { %v1857_v61 = vpop.eup %1856 }
 0xbed   :  { %v1524_v63 = vmul.f32 %v1600_v58, %v1515_v59  ;;  %v1516_v53 = vmul.f32 %v1857_v61, %v1500_v42 }
 0xbef   :  { %v1525_v56 = vmul.f32 %v1600_v58, %v1516_v53  ;;  %v1533_v1 = vadd.f32 %v1601_v60, %v1524_v63 }
 0xbf1   :  { %v1534_v2 = vadd.f32 %v1601_v60, %v1525_v56  ;;  %1535 = vst.msk [vmem:[#allocation14] sm:$0xff] %vm188_vm1, %v1533_v1 }
 0xbf3   :  { %1536 = vst.msk [vmem:[#allocation14 + $0x8] sm:$0xff] %vm188_vm1, %v1534_v2 }
 0xbf4   :  { %2023 = shalt.err (!%p2020_p4)
}
 0xbf5   :  { %s2024_s3 = scalar_lea.hbm %s2515_s14, 256 }
 0xbf6   :  { %p2025_p5 = scmp.ne.s32.totalorder %s2515_s14, %s2024_s3  ;;  %p2028_p6 = scmp.lt.u32.totalorder %s2024_s3, %s2515_s14 }
 0xbf8   :  { %p2030_p7 = pnand %p2028_p6, %p2025_p5 }
 0xbfa   :  { %2033 = shalt.err (!%p2030_p7)
}
 0xbfb   :  { %s2059_s19 = smov 128   ;;  %s2060_s21 = smov 8  }
 0xbfc   :  { %1548 = dma.vmem_to_hbm [thread:$0]  %s1543_s25, 256, %s2515_s14, [#allocation4], %s2059_s19, %s2059_s19, %s2060_s21  }
 0xbfd   :  { %2042 = dma.done.wait [#allocation4], 256  }
 0xbfe   :  { %2043 = vsyncadd [#allocation4], 4294967040 }
 0xbff   :  { %1552 = vsyncpa [#allocation3], 1 }
 0xc00   :  { %1553 = vsyncpa [#allocation6], 1 }
 0xc01   :  { %1554 = vsyncpa [#allocation9], 1 }
 0xc02   :  { %1555 = vsyncpa [#allocation12], 1 }
 0xc03   :  { %1556 = vsyncpa [#allocation4], 1 }

// kernel: tpu_custom_call.1
= control target key start
LH: loop header
LB: loop body
LE: loop exit
PB: predicated region body
PF: predicated region fallthrough
CT: control target
= control target key end

     0   :  { %19 = vsyncpa [#allocation3], 0  ;;  %s2501_s0 = inlined_call_operand.hbm [shape: bf16[2,8,32], index: 0, kind: input, shape index: {}]   ;;  %s2502_s1 = inlined_call_operand.hbm [shape: bf16[2,8,32], index: 1, kind: input, shape index: {}]   ;;  %s2503_s2 = inlined_call_operand.hbm [shape: bf16[2,16,32], index: 2, kind: input, shape index: {}]   ;;  %s2504_s3 = inlined_call_operand.hbm [shape: bf16[2,16,32], index: 3, kind: input, shape index: {}]   ;;  %s2505_s4 = inlined_call_operand.hbm [shape: bf16[32,32], index: 4, kind: input, shape index: {}]   ;;  %s2506_s5 = inlined_call_operand.vmem [shape: bf16[32,32], index: 5, kind: input, shape index: {}]   ;;  %s2507_s6 = inlined_call_operand.hbm [shape: bf16[32,32], index: 6, kind: input, shape index: {}]   ;;  %s2508_s7 = inlined_call_operand.vmem [shape: f32[1,32], index: 7, kind: input, shape index: {}]   ;;  %s2509_s8 = inlined_call_operand.vmem [shape: f32[1,32], index: 8, kind: input, shape index: {}]   ;;  %s2510_s9 = inlined_call_operand.hbm [shape: f32[1,32], index: 9, kind: input, shape index: {}]   ;;  %s2511_s10 = inlined_call_operand.vmem [shape: bf16[4,8,32], index: 10, kind: input, shape index: {}]   ;;  %s2512_s11 = inlined_call_operand.vmem [shape: f32[1,32], index: 11, kind: input, shape index: {}]   ;;  %s2513_s12 = inlined_call_operand.vmem [shape: f32[1,32], index: 12, kind: input, shape index: {}]   ;;  %s2514_s13 = inlined_call_operand.vmem [shape: f32[1,32], index: 13, kind: input, shape index: {}]   ;;  %s2515_s14 = inlined_call_operand.hbm [shape: f32[2,8,32], index: 14, kind: output, shape index: {}]  }
   0x1   :  { %20 = vsyncpa [#allocation6], 0 }
   0x2   :  { %21 = vsyncpa [#allocation9], 0 }
   0x3   :  { %22 = vsyncpa [#allocation12], 0 }
   0x4   :  { %23 = vsyncpa [#allocation4], 0  ;;  %s2044_s29 = smov [#allocation5]   ;;  %s2045_s15 = smov [#allocation8]  }
   0x5   :  { %s41_s30 = sshll.u32 %s2044_s29, 4  ;;  %s65_s16 = sshll.u32 %s2045_s15, 4  ;;  %s42_s30 = int_to_ptr.vmem [resolvable:$true] %s41_s30  ;;  %s2136_s16 = int_to_ptr.vmem [resolvable:$true] %s65_s16 }
   0x6   :  { %s1858_s19 = scalar_lea.hbm %s2502_s1, 128 }
   0x7   :  { %p1859_p0 = scmp.ne.s32.totalorder %s2502_s1, %s1858_s19  ;;  %p1862_p1 = scmp.lt.u32.totalorder %s1858_s19, %s2502_s1 }
   0x9   :  { %p1864_p2 = pnand %p1862_p1, %p1859_p0 }
   0xb   :  { %1867 = shalt.err (!%p1864_p2)
}
   0xc   :  { %s1868_s24 = scalar_lea.vmem %s42_s30, 128  ;;  %p1873_p4 = scmp.lt.s32.totalorder %s42_s30, %s42_s30 }
   0xd   :  { %p1869_p3 = scmp.ne.s32.totalorder %s42_s30, %s1868_s24  ;;  %p1874_p5 = scmp.lt.s32.totalorder %s1868_s24, %s1868_s24 }
   0xf   :  { %p1875_p6 = por %p1874_p5, %p1873_p4 }
  0x11   :  { %p1876_p7 = pnand %p1875_p6, %p1869_p3 }
  0x13   :  { %1879 = shalt.err (!%p1876_p7)
}
  0x14   :  { %s2046_s25 = smov 64   ;;  %s2047_s26 = smov 4  }
  0x15   :  { %47 = dma.hbm_to_vmem [thread:$0]  %s2502_s1, 128, %s42_s30, [#allocation6], %s2046_s25, %s2046_s25, %s2047_s26  }
  0x16   :  { %s1880_s17 = scalar_lea.hbm %s2504_s3, 256 }
  0x17   :  { %p1881_p8 = scmp.ne.s32.totalorder %s2504_s3, %s1880_s17  ;;  %p1884_p9 = scmp.lt.u32.totalorder %s1880_s17, %s2504_s3 }
  0x19   :  { %p1886_p10 = pnand %p1884_p9, %p1881_p8 }
  0x1b   :  { %1889 = shalt.err (!%p1886_p10)
}
  0x1c   :  { %s1890_s22 = scalar_lea.vmem %s2136_s16, 256  ;;  %p1895_p12 = scmp.lt.s32.totalorder %s2136_s16, %s2136_s16 }
  0x1d   :  { %p1891_p11 = scmp.ne.s32.totalorder %s2136_s16, %s1890_s22  ;;  %p1896_p13 = scmp.lt.s32.totalorder %s1890_s22, %s1890_s22 }
  0x1f   :  { %p1897_p0 = por %p1896_p13, %p1895_p12 }
  0x21   :  { %p1898_p1 = pnand %p1897_p0, %p1891_p11 }
  0x23   :  { %1901 = shalt.err (!%p1898_p1)
}
  0x24   :  { %71 = dma.hbm_to_vmem [thread:$0]  %s2504_s3, 256, %s2136_s16, [#allocation9], %s2046_s25, %s2046_s25, %s2047_s26  }
  0x25   :  { %s2048_s23 = smov [#allocation11]   ;;  %s2049_s27 = smov [#allocation2]  }
  0x26   :  { %s91_s24 = sshll.u32 %s2048_s23, 4  ;;  %s29_s28 = sshll.u32 %s2049_s27, 4  ;;  %s92_s24 = int_to_ptr.vmem [resolvable:$true] %s91_s24  ;;  %s2173_s28 = int_to_ptr.vmem [resolvable:$true] %s29_s28 }
  0x27   :  { %s1902_s17 = scalar_lea.hbm %s2507_s6, 256 }
  0x28   :  { %p1903_p2 = scmp.ne.s32.totalorder %s2507_s6, %s1902_s17  ;;  %p1906_p3 = scmp.lt.u32.totalorder %s1902_s17, %s2507_s6 }
  0x2a   :  { %p1908_p4 = pnand %p1906_p3, %p1903_p2 }
  0x2c   :  { %1911 = shalt.err (!%p1908_p4)
}
  0x2d   :  { %s1912_s3 = scalar_lea.vmem %s92_s24, 256  ;;  %p1917_p6 = scmp.lt.s32.totalorder %s92_s24, %s92_s24 }
  0x2e   :  { %p1913_p5 = scmp.ne.s32.totalorder %s92_s24, %s1912_s3  ;;  %p1918_p7 = scmp.lt.s32.totalorder %s1912_s3, %s1912_s3 }
  0x30   :  { %p1919_p8 = por %p1918_p7, %p1917_p6 }
  0x32   :  { %p1920_p9 = pnand %p1919_p8, %p1913_p5 }
  0x34   :  { %1923 = shalt.err (!%p1920_p9)
}
  0x35   :  { %97 = dma.hbm_to_vmem [thread:$0]  %s2507_s6, 256, %s92_s24, [#allocation12], %s2046_s25, %s2046_s25, %s2047_s26  }
  0x36   :  { %s1924_s23 = scalar_lea.hbm %s2501_s0, 128 }
  0x37   :  { %p1925_p10 = scmp.ne.s32.totalorder %s2501_s0, %s1924_s23  ;;  %p1928_p11 = scmp.lt.u32.totalorder %s1924_s23, %s2501_s0 }
  0x39   :  { %p1930_p12 = pnand %p1928_p11, %p1925_p10 }
  0x3b   :  { %1933 = shalt.err (!%p1930_p12)
}
  0x3c   :  { %s1934_s18 = scalar_lea.vmem %s2173_s28, 128  ;;  %p1939_p0 = scmp.lt.s32.totalorder %s2173_s28, %s2173_s28 }
  0x3d   :  { %p1935_p13 = scmp.ne.s32.totalorder %s2173_s28, %s1934_s18  ;;  %p1940_p1 = scmp.lt.s32.totalorder %s1934_s18, %s1934_s18 }
  0x3f   :  { %p1941_p2 = por %p1940_p1, %p1939_p0 }
  0x41   :  { %p1942_p3 = pnand %p1941_p2, %p1935_p13 }
  0x43   :  { %1945 = shalt.err (!%p1942_p3)
}
  0x44   :  { %35 = dma.hbm_to_vmem [thread:$0]  %s2501_s0, 128, %s2173_s28, [#allocation3], %s2046_s25, %s2046_s25, %s2047_s26  }
  0x45   :  { %s2050_s19 = smov [#allocation7]   ;;  %s2051_s21 = smov [#allocation10]  }
  0x46   :  { %s53_s20 = sshll.u32 %s2050_s19, 4  ;;  %s77_s3 = sshll.u32 %s2051_s21, 4  ;;  %s54_s20 = int_to_ptr.vmem [resolvable:$true] %s53_s20  ;;  %s2210_s3 = int_to_ptr.vmem [resolvable:$true] %s77_s3 }
  0x47   :  { %s1946_s1 = scalar_lea.hbm %s2503_s2, 256 }
  0x48   :  { %p1947_p4 = scmp.ne.s32.totalorder %s2503_s2, %s1946_s1  ;;  %p1950_p5 = scmp.lt.u32.totalorder %s1946_s1, %s2503_s2 }
  0x4a   :  { %p1952_p6 = pnand %p1950_p5, %p1947_p4 }
  0x4c   :  { %1955 = shalt.err (!%p1952_p6)
}
  0x4d   :  { %s1956_s0 = scalar_lea.vmem %s54_s20, 256  ;;  %p1961_p8 = scmp.lt.s32.totalorder %s54_s20, %s54_s20 }
  0x4e   :  { %p1957_p7 = scmp.ne.s32.totalorder %s54_s20, %s1956_s0  ;;  %p1962_p9 = scmp.lt.s32.totalorder %s1956_s0, %s1956_s0 }
  0x50   :  { %p1963_p10 = por %p1962_p9, %p1961_p8 }
  0x52   :  { %p1964_p11 = pnand %p1963_p10, %p1957_p7 }
  0x54   :  { %1967 = shalt.err (!%p1964_p11)
}
  0x55   :  { %59 = dma.hbm_to_vmem [thread:$0]  %s2503_s2, 256, %s54_s20, [#allocation6], %s2046_s25, %s2046_s25, %s2047_s26  }
  0x56   :  { %s1968_s6 = scalar_lea.hbm %s2505_s4, 256 }
  0x57   :  { %p1969_p12 = scmp.ne.s32.totalorder %s2505_s4, %s1968_s6  ;;  %p1972_p13 = scmp.lt.u32.totalorder %s1968_s6, %s2505_s4 }
  0x59   :  { %p1974_p0 = pnand %p1972_p13, %p1969_p12 }
  0x5b   :  { %1977 = shalt.err (!%p1974_p0)
}
  0x5c   :  { %s1978_s22 = scalar_lea.vmem %s2210_s3, 256  ;;  %p1983_p2 = scmp.lt.s32.totalorder %s2210_s3, %s2210_s3 }
  0x5d   :  { %p1979_p1 = scmp.ne.s32.totalorder %s2210_s3, %s1978_s22  ;;  %p1984_p3 = scmp.lt.s32.totalorder %s1978_s22, %s1978_s22 }
  0x5f   :  { %p1985_p4 = por %p1984_p3, %p1983_p2 }
  0x61   :  { %p1986_p5 = pnand %p1985_p4, %p1979_p1 }
  0x63   :  { %1989 = shalt.err (!%p1986_p5)
}
  0x64   :  { %83 = dma.hbm_to_vmem [thread:$0]  %s2505_s4, 256, %s2210_s3, [#allocation9], %s2046_s25, %s2046_s25, %s2047_s26  }
  0x65   :  { %s2052_s1 = smov [#allocation13]   ;;  %s1990_s29 = scalar_lea.hbm %s2510_s9, 16 }
  0x66   :  { %s108_s30 = sshll.u32 %s2052_s1, 4  ;;  %p1991_p6 = scmp.ne.s32.totalorder %s2510_s9, %s1990_s29  ;;  %s109_s30 = int_to_ptr.vmem [resolvable:$true] %s108_s30 }
  0x67   :  { %p1994_p7 = scmp.lt.u32.totalorder %s1990_s29, %s2510_s9 }
  0x69   :  { %p1996_p8 = pnand %p1994_p7, %p1991_p6 }
  0x6b   :  { %1999 = shalt.err (!%p1996_p8)
}
  0x6c   :  { %s2000_s18 = scalar_lea.vmem %s109_s30, 16  ;;  %s2004_s4 = scalar_lea.vmem %s109_s30, 32 }
  0x6d   :  { %p2001_p9 = scmp.ne.s32.totalorder %s109_s30, %s2000_s18  ;;  %p2005_p10 = scmp.lt.s32.totalorder %s109_s30, %s109_s30 }
  0x6e   :  { %p2006_p11 = scmp.lt.s32.totalorder %s2004_s4, %s2000_s18 }
  0x70   :  { %p2007_p12 = por %p2006_p11, %p2005_p10 }
  0x72   :  { %p2008_p13 = pnand %p2007_p12, %p2001_p9 }
  0x74   :  { %2011 = shalt.err (!%p2008_p13)
}
  0x75   :  { %111 = dma.hbm_to_vmem [thread:$0]  %s2510_s9, 16, %s109_s30, [#allocation12]  }
  0x76   :  { %2034 = dma.done.wait [#allocation3], 128  }
  0x77   :  { %2035 = vsyncadd [#allocation3], 4294967168 }
  0x78   :  { %2036 = dma.done.wait [#allocation6], 384  }
  0x79   :  { %2037 = vsyncadd [#allocation6], 4294966912 }
  0x7a   :  { %2038 = dma.done.wait [#allocation9], 512  }
  0x7b   :  { %2039 = vsyncadd [#allocation9], 4294966784 }
  0x7c   :  { %2040 = dma.done.wait [#allocation12], 272  }
  0x7d   :  { %2041 = vsyncadd [#allocation12], 4294967024  ;;  %v2053_v0 = vmov 0.0   ;;  %vm2054_vm0 = vmmov 0   ;;  %v1814_v1 = vld [vmem:[%s2506_s5] sm:$0xff]   ;;  %v1815_v2 = vld [vmem:[%s2506_s5 + $0x8] sm:$0xff]  }
  0x7e   :  { %1653 = vmatprep.subr.bf16.mxu0 %v2053_v0  ;;  %1657 = vmatprep.mubr.msk.bf16.mxu0 %vm2054_vm0, %v2053_v0  ;;  %v148_v3 = vld [vmem:[#allocation7] sm:$0xf]  ;;  %v149_v4 = vld [vmem:[#allocation7 + $0x4] sm:$0xf]  ;;  %v152_v5 = vld [vmem:[#allocation8] sm:$0xf] }
  0x7f   :  { %1661 = vmatprep.subr.bf16.mxu1 %v1814_v1  ;;  %v153_v6 = vld [vmem:[#allocation8 + $0x4] sm:$0xf]  ;;  %v156_v7 = vadd.bf16 %v152_v5, %v148_v3  ;;  %v150_v8 = vld [vmem:[#allocation7 + $0x8] sm:$0xf]  ;;  %v151_v9 = vld [vmem:[#allocation7 + $0xc] sm:$0xf]  ;;  %v1570_v27 = vcombine.low %v148_v3, %v149_v4 }
  0x80   :  { %1662 = vmatpush3.bf16.msra.mxu1 %v1814_v1  ;;  %v157_v10 = vadd.bf16 %v153_v6, %v149_v4  ;;  %v154_v11 = vld [vmem:[#allocation8 + $0x8] sm:$0xf]  ;;  %v155_v12 = vld [vmem:[#allocation8 + $0xc] sm:$0xf]  ;;  %vm188_vm1 = vcmask 261120   ;;  %v1818_v15 = vld [vmem:[#allocation10] sm:$0xff]   ;;  %v1571_v29 = vcombine.low %v150_v8, %v151_v9 }
  0x81   :  { %1663 = vmatprep.subr.bf16.mxu1 %v1815_v2  ;;  %v158_v13 = vadd.bf16 %v154_v11, %v150_v8  ;;  %v159_v14 = vadd.bf16 %v155_v12, %v151_v9  ;;  %v1819_v17 = vld [vmem:[#allocation10 + $0x8] sm:$0xff]   ;;  %v2268_v18 = vld [vmem:[#allocation2] sm:$0xf]  ;;  %1654 = vmatpush3.bf16.msra.mxu0 %v1818_v15  ;;  %v2270_v20 = vld [vmem:[#allocation2 + $0x4] sm:$0xf]  ;;  %vm415_vm2 = vcmask 64512  }
  0x82   :  { %v1563_v16 = vcombine.low %v156_v7, %v157_v10  ;;  %v144_v21 = vld [vmem:[#allocation5] sm:$0xf]  ;;  %v145_v22 = vld [vmem:[#allocation5 + $0x4] sm:$0xf]  ;;  %1655 = vmatprep.subr.bf16.mxu0 %v2053_v0  ;;  %v1820_v25 = vld [vmem:[#allocation11] sm:$0xff]   ;;  %vm508_vm3 = vcmask 130048  }
  0x83   :  { %v1564_v19 = vcombine.low %v158_v13, %v159_v14  ;;  %v146_v23 = vadd.bf16 %v144_v21, %v2268_v18  ;;  %v147_v24 = vadd.bf16 %v145_v22, %v2270_v20  ;;  %v1821_v28 = vld [vmem:[#allocation11 + $0x8] sm:$0xff]   ;;  %v1562_v31 = vld [vmem:[%s2509_s8] ss:$0 sm:$0xff]  ;;  %s2055_s8 = smov 120   ;;  %v1569_v50 = vld [vmem:[#allocation13] ss:$0 sm:$0xff] }
  0x84   :  { %1664 = vmatpush3.bf16.msra.mxu1 %v1815_v2  ;;  %1665 = vmatprep.mubr.msk.bf16.mxu1 %vm188_vm1, %v1563_v16  ;;  %v1557_v39 = vld [vmem:[%s2508_s7] ss:$0 sm:$0xff]  ;;  %s2056_s7 = smov 112   ;;  %vm849_vm4 = vcmask 1043456   ;;  %s2057_s30 = smov 104  }
  0x85   :  { %1677 = vmatprep.subr.bf16.mxu1 %v2053_v0  ;;  %v1558_v26 = vcombine.low %v146_v23, %v147_v24  ;;  %1656 = vmatpush3.bf16.msra.mxu0 %v1819_v17  ;;  %s2058_s4 = smov [#allocation14]  }
  0x86   :  { %1669 = vmatprep.subr.bf16.mxu0 %v1820_v25  ;;  %s1542_s25 = sshll.u32 %s2058_s4, 4  ;;  %s1543_s25 = int_to_ptr.vmem [resolvable:$true] %s1542_s25 }
  0x87   :  { %1666 = vmatmul.mubr.msk.bf16.vlgmr.msra.gmra.mrb[0].mxu1 %vm188_vm1, %v1564_v19  ;;  %s2012_s26 = scalar_lea.vmem %s1543_s25, 256  ;;  %p2017_p1 = scmp.lt.s32.totalorder %s1543_s25, %s1543_s25 }
  0x88   :  { %1679 = vmatprep.mubr.msk.bf16.mxu1 %vm2054_vm0, %v2053_v0  ;;  %1658 = vmatmul.mubr.msk.bf16.vlgmr.msra.gmra.mrb[0].mxu0 %vm188_vm1, %v1558_v26  ;;  %p2013_p0 = scmp.ne.s32.totalorder %s1543_s25, %s2012_s26  ;;  %p2018_p2 = scmp.lt.s32.totalorder %s2012_s26, %s2012_s26 }
  0x89   :  { %1670 = vmatpush3.bf16.msra.mxu0 %v1820_v25  ;;  %1673 = vmatprep.mubr.msk.bf16.mxu0 %vm188_vm1, %v1570_v27 }
  0x8a   :  { %1671 = vmatprep.subr.bf16.mxu0 %v1821_v28  ;;  %p2019_p3 = por %p2018_p2, %p2017_p1 }
  0x8c   :  { %p2020_p4 = pnand %p2019_p3, %p2013_p0 }
  0x8d   :  { %1672 = vmatpush3.bf16.msra.mxu0 %v1821_v28 }
  0x8e   :  { %1683 = vmatprep.subr.bf16.mxu0 %v2053_v0 }
  0x90   :  { %1674 = vmatmul.mubr.msk.bf16.vlgmr.msra.gmra.mrb[4].mxu0 %vm188_vm1, %v1571_v29 }
  0x91   :  { %1685 = vmatprep.mubr.msk.bf16.mxu0 %vm2054_vm0, %v2053_v0 }
 0x15a   :  { %v1667_v30 = vpop.f32.mrb[0].mxu1 }
 0x15b   :  { %v306_v32 = vpop.f32.mrb[1].mxu1  ;;  %v315_v34 = vadd.f32 %v1667_v30, %v1562_v31  ;;  %v226_v40 = vpop.f32.mrb[0].mxu0 }
 0x15c   :  { %v1668_v33 = vpop.f32.mrb[2].mxu1  ;;  %v307_v37 = vadd.f32 %v1562_v31, %v306_v32  ;;  %v1659_v42 = vpop.f32.mrb[1].mxu0  ;;  %v227_v48 = vadd.f32 %v1557_v39, %v226_v40 }
 0x15d   :  { %v318_v35 = vadd.f32 %v1668_v33, %v1562_v31  ;;  %v309_v36 = vpop.f32.mrb[3].mxu1  ;;  %v229_v44 = vpop.f32.mrb[2].mxu0 }
 0x15e   :  { %v310_v38 = vadd.f32 %v1562_v31, %v309_v36  ;;  %v230_v46 = vadd.f32 %v1557_v39, %v229_v44  ;;  %v1660_v47 = vpop.f32.mrb[3].mxu0  ;;  %v2306_v52 = vpack.c.bf16 %v227_v48, %v227_v48 }
 0x15f   :  { %v2292_v41 = vpack.c.bf16 %v318_v35, %v315_v34 }
 0x160   :  { %v2294_v43 = vpack.c.bf16 %v310_v38, %v307_v37  ;;  %v2304_v51 = vpack.c.bf16 %v230_v46, %v230_v46 }
 0x161   :  { %v466_v45 = vsel %vm415_vm2, %v2292_v41, 0 }
 0x162   :  { %625 = vrot.lane.b32.xlu1 %v2294_v43, %s2055_s8  ;;  %1684 = vmatpush3.bf16.xpose.msra.mxu0 %v466_v45  ;;  %v420_v49 = vsel %vm415_vm2, %v2294_v43, 0 }
 0x163   :  { %1678 = vmatpush3.bf16.xpose.msra.mxu1 %v420_v49  ;;  %1695 = vmatprep.subr.bf16.mxu0 %v2053_v0  ;;  %v1675_v53 = vpop.f32.mrb[4].mxu0 }
 0x164   :  { %1689 = vmatprep.subr.bf16.mxu1 %v2053_v0  ;;  %v403_v54 = vadd.f32 %v1675_v53, %v1569_v50  ;;  %v394_v55 = vpop.f32.mrb[5].mxu0 }
 0x165   :  { %v395_v56 = vadd.f32 %v1569_v50, %v394_v55  ;;  %v1676_v57 = vpop.f32.mrb[6].mxu0 }
 0x166   :  { %677 = vrot.lane.b32.xlu1 %v2292_v41, %s2055_s8  ;;  %v406_v58 = vadd.f32 %v1676_v57, %v1569_v50  ;;  %v397_v59 = vpop.f32.mrb[7].mxu0 }
 0x167   :  { %v398_v60 = vadd.f32 %v1569_v50, %v397_v59 }
 0x168   :  { %v2316_v61 = vpack.c.bf16 %v406_v58, %v403_v54 }
 0x169   :  { %1686 = vmatmul.mubr.msk.bf16.vlgmr.msra.gmra.mrb[8].mxu0 %vm415_vm2, %v2304_v51  ;;  %v2322_v62 = vpack.c.bf16 %v398_v60, %v395_v56 }
 0x16a   :  { %1680 = vmatmul.mubr.msk.bf16.vlgmr.msra.gmra.mrb[4].mxu1 %vm415_vm2, %v2306_v52  ;;  %674 = vrot.lane.b32.xlu1 %v2304_v51, %s2055_s8 }
 0x16b   :  { %1691 = vmatprep.mubr.msk.bf16.mxu1 %vm2054_vm0, %v2053_v0  ;;  %1697 = vmatprep.mubr.msk.bf16.mxu0 %vm2054_vm0, %v2053_v0 }
 0x16c   :  { %1696 = vmatpush3.bf16.msra.mxu0 %v2316_v61  ;;  %1690 = vmatpush3.bf16.msra.mxu1 %v2322_v62 }
 0x16d   :  { %1707 = vmatprep.subr.bf16.mxu0 %v2053_v0  ;;  %1701 = vmatprep.subr.bf16.mxu1 %v2053_v0 }
 0x1d4   :  { %v626_v16 = vpop.permute.xlu1 %625 }
 0x1d5   :  { %v631_v21 = vsel %vm415_vm2, %v626_v16, 0  ;;  %v1584_v16 = vld [vmem:[%s2511_s10 + $0x4] sm:$0xf] }
 0x1d8   :  { %v678_v23 = vpop.permute.xlu1 %677 }
 0x1d9   :  { %v683_v25 = vsel %vm415_vm2, %v678_v23, 0 }
 0x1dc   :  { %v675_v27 = vpop.permute.xlu1 %674 }
 0x23c   :  { %v502_v63 = vpop.f32.mrb[8].mxu0 }
 0x23d   :  { %v456_v1 = vpop.f32.mrb[4].mxu1  ;;  %v1687_v2 = vpop.f32.mrb[9].mxu0  ;;  %v512_v9 = vsel %vm508_vm3, %v502_v63, -inf }
 0x23e   :  { %v1681_v3 = vpop.f32.mrb[5].mxu1  ;;  %v505_v4 = vpop.f32.mrb[10].mxu0  ;;  %v509_v5 = vsel %vm508_vm3, %v456_v1, -inf }
 0x23f   :  { %510 = vmax.xlane.f32.xlu0 %v509_v5  ;;  %v459_v6 = vpop.f32.mrb[6].mxu1  ;;  %v1688_v7 = vpop.f32.mrb[11].mxu0 }
 0x240   :  { %v1682_v8 = vpop.f32.mrb[7].mxu1 }
 0x243   :  { %513 = vmax.xlane.f32.xlu0 %v512_v9 }
 0x259   :  { %622 = vrot.lane.b32.xlu0 %v2306_v52, %s2055_s8 }
 0x2cc   :  { %v511_v10 = vpop.xlane.xlu0 %510 }
 0x2cd   :  { %v515_v11 = vsub.f32 %v456_v1, %v511_v10  ;;  %v620_v1 = vld [vmem:[%s2511_s10] sm:$0xf] }
 0x2ce   :  { %v898_v5 = vsel %vm849_vm4, %v620_v1, 0 }
 0x2cf   :  { %v517_v12 = vmul.f32 1.442695, %v515_v11 }
 0x2d0   :  { %v514_v13 = vpop.xlane.xlu0 %513 }
 0x2d1   :  { %1822 = vpow2.f32 %v517_v12  ;;  %v516_v14 = vsub.f32 %v502_v63, %v514_v13 }
 0x2d3   :  { %v519_v15 = vmul.f32 1.442695, %v516_v14 }
 0x2d4   :  { %v623_v26 = vpop.permute.xlu0 %622 }
 0x2d5   :  { %1824 = vpow2.f32 %v519_v15 }
 0x2db   :  { %v1823_v17 = vpop.eup %1822 }
 0x2dc   :  { %v527_v19 = vpack.c.bf16 %v1823_v17, %v1823_v17  ;;  %v521_v48 = vsel %vm508_vm3, %v1823_v17, 0.0  ;;  %v851_v17 = vsel %vm849_vm4, %v1584_v16, 0 }
 0x2de   :  { %1692 = vmatmul.mubr.msk.bf16.vlgmr.msra.gmra.mrb[8].mxu1 %vm508_vm3, %v527_v19 }
 0x2df   :  { %v1825_v22 = vpop.eup %1824  ;;  %1702 = vmatpush3.bf16.xpose.msra.mxu1 %v631_v21  ;;  %1703 = vmatprep.mubr.msk.bf16.mxu1 %vm2054_vm0, %v2053_v0 }
 0x2e0   :  { %v528_v24 = vpack.c.bf16 %v1825_v22, %v1825_v22  ;;  %1713 = vmatprep.subr.bf16.mxu1 %v2053_v0  ;;  %v524_v49 = vsel %vm508_vm3, %v1825_v22, 0.0 }
 0x2e2   :  { %1698 = vmatmul.mubr.msk.bf16.vlgmr.msra.gmra.mrb[12].mxu0 %vm508_vm3, %v528_v24 }
 0x2e3   :  { %1708 = vmatpush3.bf16.xpose.msra.mxu0 %v683_v25  ;;  %1709 = vmatprep.mubr.msk.bf16.mxu0 %vm2054_vm0, %v2053_v0 }
 0x2e4   :  { %1719 = vmatprep.subr.bf16.mxu0 %v2053_v0 }
 0x2e6   :  { %1704 = vmatmul.mubr.msk.bf16.vlgmr.msra.gmra.mrb[12].mxu1 %vm415_vm2, %v623_v26 }
 0x2e7   :  { %1715 = vmatprep.mubr.msk.bf16.mxu1 %vm2054_vm0, %v2053_v0 }
 0x2ea   :  { %1710 = vmatmul.mubr.msk.bf16.vlgmr.msra.gmra.mrb[16].mxu0 %vm415_vm2, %v675_v27 }
 0x2eb   :  { %1721 = vmatprep.mubr.msk.bf16.mxu0 %vm2054_vm0, %v2053_v0 }
 0x3b1   :  { %v2348_v28 = vpop.f32.mrb[8].mxu1 }
 0x3b2   :  { %v1693_v29 = vpop.f32.mrb[9].mxu1 }
 0x3b3   :  { %v569_v30 = vpop.f32.mrb[10].mxu1 }
 0x3b4   :  { %v1694_v31 = vpop.f32.mrb[11].mxu1 }
 0x3b5   :  { %v2350_v32 = vpop.f32.mrb[12].mxu0 }
 0x3b6   :  { %v1699_v33 = vpop.f32.mrb[13].mxu0 }
 0x3b7   :  { %v612_v34 = vpop.f32.mrb[14].mxu0 }
 0x3b8   :  { %v1700_v35 = vpop.f32.mrb[15].mxu0 }
 0x3b9   :  { %v667_v36 = vpop.f32.mrb[12].mxu1 }
 0x3ba   :  { %v1705_v37 = vpop.f32.mrb[13].mxu1  ;;  %v725_v38 = vsel %vm508_vm3, %v667_v36, -inf }
 0x3bb   :  { %726 = vmax.xlane.f32.xlu1 %v725_v38  ;;  %v670_v39 = vpop.f32.mrb[14].mxu1 }
 0x3bc   :  { %v1706_v40 = vpop.f32.mrb[15].mxu1 }
 0x3bd   :  { %v719_v42 = vpop.f32.mrb[16].mxu0 }
 0x3be   :  { %v1711_v44 = vpop.f32.mrb[17].mxu0  ;;  %v728_v45 = vsel %vm508_vm3, %v719_v42, -inf }
 0x3bf   :  { %729 = vmax.xlane.f32.xlu0 %v728_v45  ;;  %v722_v46 = vpop.f32.mrb[18].mxu0 }
 0x3c0   :  { %v1712_v47 = vpop.f32.mrb[19].mxu0 }
 0x3cc   :  { %746 = vrot.lane.b32.xlu1 %v2322_v62, %s2055_s8 }
 0x3d5   :  { %793 = vrot.lane.b32.xlu0 %v2316_v61, %s2055_s8 }
 0x3f0   :  { %522 = vadd.xlane.f32.xlu1 %v521_v48 }
 0x3f4   :  { %525 = vadd.xlane.f32.xlu0 %v524_v49 }
 0x401   :  { %943 = vrot.lane.b32.xlu1 %v2294_v43, %s2056_s7 }
 0x40a   :  { %993 = vrot.lane.b32.xlu0 %v2292_v41, %s2056_s7 }
 0x448   :  { %v727_v50 = vpop.xlane.xlu1 %726 }
 0x449   :  { %v731_v53 = vsub.f32 %v667_v36, %v727_v50 }
 0x44b   :  { %v733_v54 = vmul.f32 1.442695, %v731_v53 }
 0x44c   :  { %v730_v55 = vpop.xlane.xlu0 %729  ;;  %v747_v56 = vpop.permute.xlu1 %746 }
 0x44d   :  { %1826 = vpow2.f32 %v733_v54  ;;  %v732_v57 = vsub.f32 %v719_v42, %v730_v55  ;;  %1714 = vmatpush3.bf16.msra.mxu1 %v747_v56 }
 0x44e   :  { %1725 = vmatprep.subr.bf16.mxu1 %v2053_v0 }
 0x44f   :  { %v735_v58 = vmul.f32 1.442695, %v732_v57 }
 0x450   :  { %v794_v59 = vpop.permute.xlu0 %793 }
 0x451   :  { %1828 = vpow2.f32 %v735_v58  ;;  %1720 = vmatpush3.bf16.msra.mxu0 %v794_v59 }
 0x452   :  { %1731 = vmatprep.subr.bf16.mxu0 %v2053_v0 }
 0x457   :  { %v1827_v60 = vpop.eup %1826 }
 0x458   :  { %v743_v63 = vpack.c.bf16 %v1827_v60, %v1827_v60  ;;  %v737_v6 = vsel %vm508_vm3, %v1827_v60, 0.0 }
 0x45a   :  { %1716 = vmatmul.mubr.msk.bf16.vlgmr.msra.gmra.mrb[16].mxu1 %vm508_vm3, %v743_v63 }
 0x45b   :  { %v1829_v2 = vpop.eup %1828  ;;  %1727 = vmatprep.mubr.msk.bf16.mxu1 %vm2054_vm0, %v2053_v0  ;;  %1726 = vmatpush3.bf16.msra.mxu1 %v851_v17  ;;  %v1591_v17 = vld [vmem:[%s2511_s10 + $0x8] sm:$0xf] }
 0x45c   :  { %v740_v3 = vsel %vm508_vm3, %v1829_v2, 0.0  ;;  %v744_v4 = vpack.c.bf16 %v1829_v2, %v1829_v2  ;;  %1737 = vmatprep.subr.bf16.mxu1 %v2053_v0 }
 0x45d   :  { %741 = vadd.xlane.f32.xlu1 %v740_v3 }
 0x45e   :  { %1722 = vmatmul.mubr.msk.bf16.vlgmr.msra.gmra.mrb[20].mxu0 %vm508_vm3, %v744_v4 }
 0x45f   :  { %1732 = vmatpush3.bf16.msra.mxu0 %v898_v5  ;;  %1733 = vmatprep.mubr.msk.bf16.mxu0 %vm2054_vm0, %v2053_v0 }
 0x460   :  { %1743 = vmatprep.subr.bf16.mxu0 %v2053_v0 }
 0x461   :  { %738 = vadd.xlane.f32.xlu1 %v737_v6 }
 0x472   :  { %941 = vrot.lane.b32.xlu1 %v2306_v52, %s2056_s7 }
 0x476   :  { %991 = vrot.lane.b32.xlu1 %v2304_v51, %s2056_s7 }
 0x47d   :  { %v523_v7 = vpop.xlane.xlu1 %522 }
 0x47e   :  { %1830 = vrcp.f32 %v523_v7 }
 0x481   :  { %v526_v8 = vpop.xlane.xlu0 %525  ;;  %v944_v19 = vpop.permute.xlu1 %943 }
 0x482   :  { %1832 = vrcp.f32 %v526_v8  ;;  %v949_v38 = vsel %vm415_vm2, %v944_v19, 0  ;;  %v1164_v19 = vsel %vm849_vm4, %v1591_v17, 0 }
 0x485   :  { %v994_v13 = vpop.permute.xlu0 %993 }
 0x486   :  { %v999_v15 = vsel %vm415_vm2, %v994_v13, 0 }
 0x488   :  { %v1831_v9 = vpop.eup %1830 }
 0x489   :  { %v617_v11 = vmul.f32 %v1831_v9, %v2348_v28 }
 0x48c   :  { %v1833_v10 = vpop.eup %1832 }
 0x48d   :  { %v618_v12 = vmul.f32 %v1833_v10, %v2350_v32 }
 0x48f   :  { %v619_v14 = vpack.c.bf16 %v618_v12, %v617_v11 }
 0x491   :  { %1734 = vmatmul.mubr.msk.bf16.vlgmr.msra.gmra.mrb[24].mxu0 %vm415_vm2, %v619_v14 }
 0x492   :  { %1744 = vmatpush3.bf16.xpose.msra.mxu0 %v999_v15  ;;  %1745 = vmatprep.mubr.msk.bf16.mxu0 %vm2054_vm0, %v2053_v0 }
 0x493   :  { %1755 = vmatprep.subr.bf16.mxu0 %v2053_v0 }
 0x4ea   :  { %v742_v21 = vpop.xlane.xlu1 %741 }
 0x4eb   :  { %1834 = vrcp.f32 %v742_v21 }
 0x4ee   :  { %v739_v22 = vpop.xlane.xlu1 %738 }
 0x4ef   :  { %1836 = vrcp.f32 %v739_v22 }
 0x4f2   :  { %v942_v23 = vpop.permute.xlu1 %941 }
 0x4f5   :  { %v1835_v28 = vpop.eup %1834 }
 0x4f6   :  { %v992_v24 = vpop.permute.xlu1 %991 }
 0x4f7   :  { %1746 = vmatmul.mubr.msk.bf16.vlgmr.msra.gmra.mrb[28].mxu0 %vm415_vm2, %v992_v24 }
 0x4f8   :  { %1757 = vmatprep.mubr.msk.bf16.mxu0 %vm2054_vm0, %v2053_v0 }
 0x4f9   :  { %v1837_v30 = vpop.eup %1836 }
 0x52d   :  { %v786_v25 = vpop.f32.mrb[16].mxu1 }
 0x52e   :  { %v1717_v26 = vpop.f32.mrb[17].mxu1  ;;  %v841_v32 = vmul.f32 %v1837_v30, %v786_v25 }
 0x52f   :  { %v789_v27 = vpop.f32.mrb[18].mxu1 }
 0x530   :  { %v1718_v29 = vpop.f32.mrb[19].mxu1 }
 0x531   :  { %v833_v31 = vpop.f32.mrb[20].mxu0 }
 0x532   :  { %v842_v33 = vmul.f32 %v1835_v28, %v833_v31  ;;  %v1723_v34 = vpop.f32.mrb[21].mxu0 }
 0x533   :  { %v836_v35 = vpop.f32.mrb[22].mxu0 }
 0x534   :  { %v843_v36 = vpack.c.bf16 %v842_v33, %v841_v32  ;;  %v1724_v37 = vpop.f32.mrb[23].mxu0 }
 0x536   :  { %1728 = vmatmul.mubr.msk.bf16.vlgmr.msra.gmra.mrb[20].mxu1 %vm415_vm2, %v843_v36 }
 0x537   :  { %1738 = vmatpush3.bf16.xpose.msra.mxu1 %v949_v38  ;;  %1739 = vmatprep.mubr.msk.bf16.mxu1 %vm2054_vm0, %v2053_v0 }
 0x538   :  { %1749 = vmatprep.subr.bf16.mxu1 %v2053_v0 }
 0x53e   :  { %1740 = vmatmul.mubr.msk.bf16.vlgmr.msra.gmra.mrb[24].mxu1 %vm415_vm2, %v942_v23 }
 0x53f   :  { %1751 = vmatprep.mubr.msk.bf16.mxu1 %vm2054_vm0, %v2053_v0 }
 0x564   :  { %v934_v39 = vpop.f32.mrb[24].mxu0 }
 0x565   :  { %v1735_v40 = vpop.f32.mrb[25].mxu0 }
 0x566   :  { %v937_v42 = vpop.f32.mrb[26].mxu0 }
 0x567   :  { %v1736_v44 = vpop.f32.mrb[27].mxu0 }
 0x5ca   :  { %v1035_v45 = vpop.f32.mrb[28].mxu0 }
 0x5cb   :  { %v1747_v46 = vpop.f32.mrb[29].mxu0  ;;  %v1044_v47 = vsel %vm508_vm3, %v1035_v45, -inf }
 0x5cc   :  { %1045 = vmax.xlane.f32.xlu0 %v1044_v47  ;;  %v1038_v48 = vpop.f32.mrb[30].mxu0 }
 0x5cd   :  { %v1748_v49 = vpop.f32.mrb[31].mxu0 }
 0x5e2   :  { %1061 = vrot.lane.b32.xlu0 %v2322_v62, %s2056_s7 }
 0x609   :  { %v887_v50 = vpop.f32.mrb[20].mxu1 }
 0x60a   :  { %v2409_v53 = vadd.f32 %v934_v39, %v887_v50  ;;  %v1729_v54 = vpop.f32.mrb[21].mxu1 }
 0x60b   :  { %v890_v55 = vpop.f32.mrb[22].mxu1 }
 0x60c   :  { %v2411_v56 = vadd.f32 %v937_v42, %v890_v55  ;;  %v1730_v57 = vpop.f32.mrb[23].mxu1 }
 0x611   :  { %v985_v58 = vpop.f32.mrb[24].mxu1 }
 0x612   :  { %v1741_v59 = vpop.f32.mrb[25].mxu1  ;;  %v1041_v60 = vsel %vm508_vm3, %v985_v58, -inf }
 0x613   :  { %1042 = vmax.xlane.f32.xlu1 %v1041_v60  ;;  %v988_v63 = vpop.f32.mrb[26].mxu1 }
 0x614   :  { %v1742_v1 = vpop.f32.mrb[27].mxu1 }
 0x624   :  { %1107 = vrot.lane.b32.xlu1 %v2316_v61, %s2056_s7 }
 0x659   :  { %v1046_v2 = vpop.xlane.xlu0 %1045 }
 0x65a   :  { %v1048_v3 = vsub.f32 %v1035_v45, %v1046_v2 }
 0x65c   :  { %v1051_v4 = vmul.f32 1.442695, %v1048_v3 }
 0x65d   :  { %v1062_v5 = vpop.permute.xlu0 %1061 }
 0x65e   :  { %1838 = vpow2.f32 %v1051_v4  ;;  %1750 = vmatpush3.bf16.msra.mxu1 %v1062_v5 }
 0x65f   :  { %1761 = vmatprep.subr.bf16.mxu1 %v2053_v0 }
 0x668   :  { %v1839_v6 = vpop.eup %1838 }
 0x669   :  { %v1056_v7 = vsel %vm508_vm3, %v1839_v6, 0.0  ;;  %v1060_v12 = vpack.c.bf16 %v1839_v6, %v1839_v6 }
 0x66a   :  { %1057 = vadd.xlane.f32.xlu0 %v1056_v7 }
 0x680   :  { %1211 = vrot.lane.b32.xlu0 %v2294_v43, %s2057_s30 }
 0x684   :  { %1259 = vrot.lane.b32.xlu0 %v2304_v51, %s2057_s30 }
 0x6a0   :  { %v1043_v8 = vpop.xlane.xlu1 %1042 }
 0x6a1   :  { %v1047_v9 = vsub.f32 %v985_v58, %v1043_v8  ;;  %v1597_v8 = vld [vmem:[%s2511_s10 + $0xc] sm:$0xf] }
 0x6a3   :  { %v1049_v10 = vmul.f32 1.442695, %v1047_v9  ;;  %v1432_v9 = vsel %vm849_vm4, %v1597_v8, 0 }
 0x6a4   :  { %v1108_v11 = vpop.permute.xlu1 %1107 }
 0x6a5   :  { %1840 = vpow2.f32 %v1049_v10  ;;  %1756 = vmatpush3.bf16.msra.mxu0 %v1108_v11 }
 0x6a6   :  { %1767 = vmatprep.subr.bf16.mxu0 %v2053_v0 }
 0x6a8   :  { %1758 = vmatmul.mubr.msk.bf16.vlgmr.msra.gmra.mrb[32].mxu0 %vm508_vm3, %v1060_v12 }
 0x6a9   :  { %1769 = vmatprep.mubr.msk.bf16.mxu0 %vm2054_vm0, %v2053_v0 }
 0x6af   :  { %v1841_v13 = vpop.eup %1840 }
 0x6b0   :  { %v1053_v43 = vsel %vm508_vm3, %v1841_v13, 0.0  ;;  %v1059_v14 = vpack.c.bf16 %v1841_v13, %v1841_v13 }
 0x6b1   :  { %1054 = vadd.xlane.f32.xlu1 %v1053_v43 }
 0x6b2   :  { %1752 = vmatmul.mubr.msk.bf16.vlgmr.msra.gmra.mrb[28].mxu1 %vm508_vm3, %v1059_v14 }
 0x6b3   :  { %1763 = vmatprep.mubr.msk.bf16.mxu1 %vm2054_vm0, %v2053_v0  ;;  %1762 = vmatpush3.bf16.msra.mxu1 %v1164_v19 }
 0x6b4   :  { %1773 = vmatprep.subr.bf16.mxu1 %v2053_v0 }
 0x6c2   :  { %1261 = vrot.lane.b32.xlu1 %v2292_v41, %s2057_s30 }
 0x6c6   :  { %1209 = vrot.lane.b32.xlu1 %v2306_v52, %s2057_s30 }
 0x6f7   :  { %v1058_v51 = vpop.xlane.xlu0 %1057 }
 0x6f8   :  { %1842 = vrcp.f32 %v1058_v51 }
 0x6fb   :  { %v1212_v15 = vpop.permute.xlu0 %1211 }
 0x6fc   :  { %v1217_v16 = vsel %vm415_vm2, %v1212_v15, 0 }
 0x6fd   :  { %1768 = vmatpush3.bf16.xpose.msra.mxu0 %v1217_v16 }
 0x6fe   :  { %1779 = vmatprep.subr.bf16.mxu0 %v2053_v0 }
 0x6ff   :  { %v1260_v36 = vpop.permute.xlu0 %1259 }
 0x702   :  { %v1843_v52 = vpop.eup %1842 }
 0x73e   :  { %v1055_v41 = vpop.xlane.xlu1 %1054 }
 0x73f   :  { %1844 = vrcp.f32 %v1055_v41 }
 0x742   :  { %v1262_v21 = vpop.permute.xlu1 %1261 }
 0x743   :  { %v1267_v35 = vsel %vm415_vm2, %v1262_v21, 0 }
 0x746   :  { %v1210_v22 = vpop.permute.xlu1 %1209 }
 0x747   :  { %1770 = vmatmul.mubr.msk.bf16.vlgmr.msra.gmra.mrb[36].mxu0 %vm415_vm2, %v1210_v22 }
 0x748   :  { %1781 = vmatprep.mubr.msk.bf16.mxu0 %vm2054_vm0, %v2053_v0 }
 0x749   :  { %v1845_v28 = vpop.eup %1844 }
 0x77b   :  { %v1147_v23 = vpop.f32.mrb[32].mxu0 }
 0x77c   :  { %v1156_v24 = vmul.f32 %v1843_v52, %v1147_v23  ;;  %v1759_v25 = vpop.f32.mrb[33].mxu0  ;;  %v1599_v23 = vld [vmem:[%s2512_s11] ss:$0 sm:$0xff] }
 0x77d   :  { %v1150_v26 = vpop.f32.mrb[34].mxu0 }
 0x77e   :  { %v1760_v27 = vpop.f32.mrb[35].mxu0  ;;  %v1486_v26 = vunpack.c.l.bf16 %v2268_v18 }
 0x785   :  { %v1101_v29 = vpop.f32.mrb[28].mxu1 }
 0x786   :  { %v1155_v30 = vmul.f32 %v1845_v28, %v1101_v29  ;;  %v1753_v31 = vpop.f32.mrb[29].mxu1 }
 0x787   :  { %v1104_v32 = vpop.f32.mrb[30].mxu1  ;;  %v1487_v31 = vunpack.c.l.bf16 %v2270_v20 }
 0x788   :  { %v1157_v33 = vpack.c.bf16 %v1156_v24, %v1155_v30  ;;  %v1754_v34 = vpop.f32.mrb[31].mxu1 }
 0x78a   :  { %1764 = vmatmul.mubr.msk.bf16.vlgmr.msra.gmra.mrb[32].mxu1 %vm415_vm2, %v1157_v33 }
 0x78b   :  { %1774 = vmatpush3.bf16.xpose.msra.mxu1 %v1267_v35  ;;  %1775 = vmatprep.mubr.msk.bf16.mxu1 %vm2054_vm0, %v2053_v0 }
 0x78c   :  { %1785 = vmatprep.subr.bf16.mxu1 %v2053_v0 }
 0x792   :  { %1776 = vmatmul.mubr.msk.bf16.vlgmr.msra.gmra.mrb[36].mxu1 %vm415_vm2, %v1260_v36 }
 0x793   :  { %1787 = vmatprep.mubr.msk.bf16.mxu1 %vm2054_vm0, %v2053_v0 }
 0x81a   :  { %v1253_v37 = vpop.f32.mrb[36].mxu0 }
 0x81b   :  { %v1771_v38 = vpop.f32.mrb[37].mxu0  ;;  %v1309_v39 = vsel %vm508_vm3, %v1253_v37, -inf }
 0x81c   :  { %1310 = vmax.xlane.f32.xlu1 %v1309_v39  ;;  %v1256_v40 = vpop.f32.mrb[38].mxu0 }
 0x81d   :  { %v1772_v42 = vpop.f32.mrb[39].mxu0 }
 0x82d   :  { %1375 = vrot.lane.b32.xlu1 %v2316_v61, %s2057_s30 }
 0x85d   :  { %v1200_v44 = vpop.f32.mrb[32].mxu1 }
 0x85e   :  { %v1207_v45 = vadd.f32 %v1200_v44, %v2409_v53  ;;  %v1765_v46 = vpop.f32.mrb[33].mxu1 }
 0x85f   :  { %v1203_v47 = vpop.f32.mrb[34].mxu1 }
 0x860   :  { %v1208_v48 = vadd.f32 %v1203_v47, %v2411_v56  ;;  %v1766_v49 = vpop.f32.mrb[35].mxu1 }
 0x865   :  { %v1303_v50 = vpop.f32.mrb[36].mxu1 }
 0x866   :  { %v1777_v54 = vpop.f32.mrb[37].mxu1  ;;  %v1312_v55 = vsel %vm508_vm3, %v1303_v50, -inf }
 0x867   :  { %1313 = vmax.xlane.f32.xlu0 %v1312_v55  ;;  %v1306_v57 = vpop.f32.mrb[38].mxu1 }
 0x868   :  { %v1778_v58 = vpop.f32.mrb[39].mxu1 }
 0x869   :  { %v1600_v58 = vld [vmem:[%s2513_s12] ss:$0 sm:$0xff] }
 0x87d   :  { %1329 = vrot.lane.b32.xlu0 %v2322_v62, %s2057_s30 }
 0x8a9   :  { %v1311_v59 = vpop.xlane.xlu1 %1310 }
 0x8aa   :  { %v1315_v61 = vsub.f32 %v1253_v37, %v1311_v59 }
 0x8ac   :  { %v1317_v60 = vmul.f32 1.442695, %v1315_v61 }
 0x8ad   :  { %v1376_v63 = vpop.permute.xlu1 %1375 }
 0x8ae   :  { %1846 = vpow2.f32 %v1317_v60  ;;  %1786 = vmatpush3.bf16.msra.mxu1 %v1376_v63  ;;  %v1601_v60 = vld [vmem:[%s2514_s13] ss:$0 sm:$0xff] }
 0x8b8   :  { %v1847_v53 = vpop.eup %1846 }
 0x8b9   :  { %v1321_v56 = vsel %vm508_vm3, %v1847_v53, 0.0  ;;  %v1327_v5 = vpack.c.bf16 %v1847_v53, %v1847_v53 }
 0x8ba   :  { %1322 = vadd.xlane.f32.xlu1 %v1321_v56 }
 0x8f4   :  { %v1314_v1 = vpop.xlane.xlu0 %1313 }
 0x8f5   :  { %v1316_v2 = vsub.f32 %v1303_v50, %v1314_v1 }
 0x8f7   :  { %v1319_v3 = vmul.f32 1.442695, %v1316_v2 }
 0x8f8   :  { %v1330_v4 = vpop.permute.xlu0 %1329 }
 0x8f9   :  { %1848 = vpow2.f32 %v1319_v3  ;;  %1780 = vmatpush3.bf16.msra.mxu0 %v1330_v4 }
 0x8fa   :  { %1791 = vmatprep.subr.bf16.mxu0 %v2053_v0 }
 0x8fc   :  { %1782 = vmatmul.mubr.msk.bf16.vlgmr.msra.gmra.mrb[40].mxu0 %vm508_vm3, %v1327_v5 }
 0x8fd   :  { %1793 = vmatprep.mubr.msk.bf16.mxu0 %vm2054_vm0, %v2053_v0  ;;  %1792 = vmatpush3.bf16.msra.mxu0 %v1432_v9 }
 0x903   :  { %v1849_v62 = vpop.eup %1848 }
 0x904   :  { %v1324_v6 = vsel %vm508_vm3, %v1849_v62, 0.0  ;;  %v1328_v7 = vpack.c.bf16 %v1849_v62, %v1849_v62 }
 0x905   :  { %1325 = vadd.xlane.f32.xlu0 %v1324_v6 }
 0x906   :  { %1788 = vmatmul.mubr.msk.bf16.vlgmr.msra.gmra.mrb[40].mxu1 %vm508_vm3, %v1328_v7 }
 0x947   :  { %v1323_v10 = vpop.xlane.xlu1 %1322 }
 0x948   :  { %1850 = vrcp.f32 %v1323_v10 }
 0x952   :  { %v1851_v14 = vpop.eup %1850 }
 0x992   :  { %v1326_v11 = vpop.xlane.xlu0 %1325 }
 0x993   :  { %1852 = vrcp.f32 %v1326_v11 }
 0x99d   :  { %v1853_v51 = vpop.eup %1852 }
 0x9cf   :  { %v1369_v12 = vpop.f32.mrb[40].mxu0 }
 0x9d0   :  { %v1783_v0 = vpop.f32.mrb[41].mxu0  ;;  %v1423_v16 = vmul.f32 %v1851_v14, %v1369_v12 }
 0x9d1   :  { %v1372_v13 = vpop.f32.mrb[42].mxu0 }
 0x9d2   :  { %v1784_v43 = vpop.f32.mrb[43].mxu0 }
 0x9d9   :  { %v1415_v15 = vpop.f32.mrb[40].mxu1 }
 0x9da   :  { %v1424_v17 = vmul.f32 %v1853_v51, %v1415_v15  ;;  %v1789_v19 = vpop.f32.mrb[41].mxu1 }
 0x9db   :  { %v1418_v41 = vpop.f32.mrb[42].mxu1 }
 0x9dc   :  { %v1425_v21 = vpack.c.bf16 %v1424_v17, %v1423_v16  ;;  %v1790_v22 = vpop.f32.mrb[43].mxu1 }
 0x9de   :  { %1794 = vmatmul.mubr.msk.bf16.vlgmr.msra.gmra.mrb[44].mxu0 %vm415_vm2, %v1425_v21 }
 0xab1   :  { %v1468_v52 = vpop.f32.mrb[44].mxu0 }
 0xab2   :  { %v1475_v24 = vadd.f32 %v1468_v52, %v1207_v45  ;;  %v1795_v25 = vpop.f32.mrb[45].mxu0 }
 0xab3   :  { %v1471_v27 = vpop.f32.mrb[46].mxu0 }
 0xab4   :  { %v1484_v28 = vadd.f32 %v1599_v23, %v1475_v24  ;;  %v1476_v29 = vadd.f32 %v1471_v27, %v1208_v48  ;;  %v1796_v30 = vpop.f32.mrb[47].mxu0 }
 0xab6   :  { %v1485_v32 = vadd.f32 %v1599_v23, %v1476_v29  ;;  %v1488_v33 = vadd.f32 %v1486_v26, %v1484_v28 }
 0xab8   :  { %v1490_v34 = vsel %vm188_vm1, %v1488_v33, 0.0  ;;  %v1489_v35 = vadd.f32 %v1487_v31, %v1485_v32 }
 0xab9   :  { %1491 = vadd.xlane.f32.xlu0 %v1490_v34 }
 0xaba   :  { %v1493_v36 = vsel %vm188_vm1, %v1489_v35, 0.0 }
 0xabb   :  { %1494 = vadd.xlane.f32.xlu1 %v1493_v36 }
 0xb46   :  { %v1492_v37 = vpop.xlane.xlu0 %1491 }
 0xb47   :  { %v1497_v38 = vmul.f32 0.03125, %v1492_v37 }
 0xb48   :  { %v1495_v39 = vpop.xlane.xlu1 %1494 }
 0xb49   :  { %v1499_v40 = vsub.f32 %v1488_v33, %v1497_v38  ;;  %v1498_v18 = vmul.f32 0.03125, %v1495_v39 }
 0xb4b   :  { %v1500_v42 = vsub.f32 %v1489_v35, %v1498_v18  ;;  %v1501_v44 = vmul.f32 %v1499_v40, %v1499_v40 }
 0xb4d   :  { %v1503_v45 = vsel %vm188_vm1, %v1501_v44, 0.0  ;;  %v1502_v46 = vmul.f32 %v1500_v42, %v1500_v42 }
 0xb4e   :  { %1504 = vadd.xlane.f32.xlu0 %v1503_v45 }
 0xb4f   :  { %v1506_v20 = vsel %vm188_vm1, %v1502_v46, 0.0 }
 0xb50   :  { %1507 = vadd.xlane.f32.xlu1 %v1506_v20 }
 0xbdb   :  { %v1505_v47 = vpop.xlane.xlu0 %1504 }
 0xbdc   :  { %v1509_v48 = vmul.f32 0.03125, %v1505_v47 }
 0xbdd   :  { %v1508_v49 = vpop.xlane.xlu1 %1507 }
 0xbde   :  { %v1511_v50 = vadd.f32 1e-05, %v1509_v48  ;;  %v1510_v54 = vmul.f32 0.03125, %v1508_v49 }
 0xbe0   :  { %1854 = vrsqrt.f32 %v1511_v50  ;;  %v1512_v55 = vadd.f32 1e-05, %v1510_v54 }
 0xbe2   :  { %1856 = vrsqrt.f32 %v1512_v55 }
 0xbea   :  { %v1855_v57 = vpop.eup %1854 }
 0xbeb   :  { %v1515_v59 = vmul.f32 %v1855_v57, %v1499_v40 }
 0xbec   :  { %v1857_v61 = vpop.eup %1856 }
 0xbed   :  { %v1524_v63 = vmul.f32 %v1600_v58, %v1515_v59  ;;  %v1516_v53 = vmul.f32 %v1857_v61, %v1500_v42 }
 0xbef   :  { %v1525_v56 = vmul.f32 %v1600_v58, %v1516_v53  ;;  %v1533_v1 = vadd.f32 %v1601_v60, %v1524_v63 }
 0xbf1   :  { %v1534_v2 = vadd.f32 %v1601_v60, %v1525_v56  ;;  %1535 = vst.msk [vmem:[#allocation14] sm:$0xff] %vm188_vm1, %v1533_v1 }
 0xbf3   :  { %1536 = vst.msk [vmem:[#allocation14 + $0x8] sm:$0xff] %vm188_vm1, %v1534_v2 }
 0xbf4   :  { %2023 = shalt.err (!%p2020_p4)
}
 0xbf5   :  { %s2024_s3 = scalar_lea.hbm %s2515_s14, 256 }
 0xbf6   :  { %p2025_p5 = scmp.ne.s32.totalorder %s2515_s14, %s2024_s3  ;;  %p2028_p6 = scmp.lt.u32.totalorder %s2024_s3, %s2515_s14 }
 0xbf8   :  { %p2030_p7 = pnand %p2028_p6, %p2025_p5 }
 0xbfa   :  { %2033 = shalt.err (!%p2030_p7)
}
 0xbfb   :  { %s2059_s19 = smov 128   ;;  %s2060_s21 = smov 8  }
 0xbfc   :  { %1548 = dma.vmem_to_hbm [thread:$0]  %s1543_s25, 256, %s2515_s14, [#allocation4], %s2059_s19, %s2059_s19, %s2060_s21  }
 0xbfd   :  { %2042 = dma.done.wait [#allocation4], 256  }
 0xbfe   :  { %2043 = vsyncadd [#allocation4], 4294967040 }
 0xbff   :  { %1552 = vsyncpa [#allocation3], 1 }
 0xc00   :  { %1553 = vsyncpa [#allocation6], 1 }
 0xc01   :  { %1554 = vsyncpa [#allocation9], 1 }
 0xc02   :  { %1555 = vsyncpa [#allocation12], 1 }
 0xc03   :  { %1556 = vsyncpa [#allocation4], 1 }

</bundles_post_ra>
